<compile_context>
chip_gen: v7x
topology: tpu7x:2x2x1
jax: 0.10.0
libtpu: 0.0.40
codegen_flags: <defaults>
</compile_context>

<pallas_src>
import math

import jax
import jax.numpy as jnp
from jax.experimental import pallas as pl
from jax.experimental.pallas import tpu as pltpu


# ----------------------------------------------------------------------------
# Fused GCNConv + ReLU + SAGPooling score, row-tiled over the adjacency
# ----------------------------------------------------------------------------
def _gcn_pool_kernel(a_ref, x_ref, dsq_ref, w_ref, b_ref, wp_ref, sb_ref,
                     h_ref, s_ref, xws_ref, hall_ref):
    t = pl.program_id(1)            # row-tile index within the graph
    nt = pl.num_programs(1)
    tm = a_ref.shape[1]             # static tile height

    # --- per-graph prologue: XW once, pre-scaled by D^-1/2; zero score acc ---
    @pl.when(t == 0)
    def _():
        xw = jnp.dot(x_ref[0], w_ref[...], preferred_element_type=jnp.float32)
        xws_ref[...] = (dsq_ref[0] * xw).astype(xws_ref.dtype)   # (N, Fout) bf16
        s_ref[...] = jnp.zeros_like(s_ref)

    a = a_ref[0]                                          # (TM, N) bf16 A row tile
    row0 = pl.multiple_of(t * tm, tm)
    dsq_t = dsq_ref[0, pl.ds(row0, tm), :]                # (TM, 1)  D^-1/2 of tile rows
    xws_t = xws_ref[pl.ds(row0, tm), :].astype(jnp.float32)  # (TM, Fout)

    # --- GCNConv + ReLU for this row tile -------------------------------------
    # h = relu(D^-1/2 (A+I) D^-1/2 X W + b)
    #   = relu(dsq_tile * (A_tile @ (dsq*XW) + (dsq*XW)_tile) + b)
    ax = jnp.dot(a, xws_ref[...], preferred_element_type=jnp.float32)   # bf16 MXU, f32 acc
    h = jnp.maximum(dsq_t * (ax + xws_t) + b_ref[...], 0.0)
    h_ref[0] = h
    hall_ref[pl.ds(row0, tm), :] = h                      # kept for the root score term

    # --- SAGPooling GraphConv scorer, neighbour term (A symmetric) ------------
    # s_j += sum_{i in tile} A_ij * (h_i . w_neigh), accumulated over row tiles
    nt_dims = (((1,), (1,)), ((), ()))
    hwn = jax.lax.dot_general(wp_ref[1:2, :], h, nt_dims,
                              preferred_element_type=jnp.float32)       # (1, TM)
    s_ref[0] += jnp.dot(hwn.astype(a.dtype), a,
                        preferred_element_type=jnp.float32)             # (1, N)

    # --- per-graph epilogue: root term + bias (needs the full h) --------------
    @pl.when(t == nt - 1)
    def _():
        hwr = jax.lax.dot_general(wp_ref[0:1, :], hall_ref[...], nt_dims,
                                  preferred_element_type=jnp.float32)   # (1, N)
        s_ref[0] += hwr + sb_ref[...]


def _choose_tile_rows(n, max_rows):
    """Largest row tile <= max_rows that divides n and is a multiple of 16
    (bf16 sublane packing); falls back to the full dimension."""
    start = min(max_rows, n)
    start -= start % 16
    for tm in range(start, 15, -16):
        if n % tm == 0:
            return tm
    return n


def gcn_relu_score(a_bf16, x, dsq, w, b, wp, sb, *, max_tile_rows=128):
    """Fused GCNConv+ReLU and SAGPooling score. Returns (h, score_row).

    a_bf16: (B, N, N) symmetric weighted adjacency (bf16, no self loops)
    dsq   : (B, N, 1) precomputed 1/sqrt(rowsum(A) + 1)  (f32)
    wp    : (2, Fout) stacked [w_root; w_neigh] scorer weights
    """
    B, N, Fin = x.shape
    Fout = w.shape[1]
    # Production guidance: max_tile_rows ~512 on v5e/v6e, ~256 on v7x; a third
    # pipeline buffer (pipeline_mode=pl.Buffered(3)) on the A spec is worth a
    # try on v7x once tiles are small.
    tm = _choose_tile_rows(N, max_tile_rows)
    nt = N // tm
    return pl.pallas_call(
        _gcn_pool_kernel,
        out_shape=(
            jax.ShapeDtypeStruct((B, N, Fout), jnp.float32),
            jax.ShapeDtypeStruct((B, 1, N), jnp.float32),    # lane-dense score
        ),
        grid=(B, nt),
        in_specs=[
            pl.BlockSpec((1, tm, N), lambda i, t: (i, t, 0)),     # A row tile (bf16)
            pl.BlockSpec((1, N, Fin), lambda i, t: (i, 0, 0)),    # x, resident per graph
            pl.BlockSpec((1, N, 1), lambda i, t: (i, 0, 0)),      # D^-1/2
            pl.BlockSpec((Fin, Fout), lambda i, t: (0, 0)),
            pl.BlockSpec((1, Fout), lambda i, t: (0, 0)),
            pl.BlockSpec((2, Fout), lambda i, t: (0, 0)),         # [w_root; w_neigh]
            pl.BlockSpec((1, 1), lambda i, t: (0, 0)),
        ],
        out_specs=(
            pl.BlockSpec((1, tm, Fout), lambda i, t: (i, t, 0)),
            pl.BlockSpec((1, 1, N), lambda i, t: (i, 0, 0)),      # resident accumulator
        ),
        scratch_shapes=[
            pltpu.VMEM((N, Fout), jnp.bfloat16),    # dsq * (X @ W), reused by every tile
            pltpu.VMEM((N, Fout), jnp.float32),     # full h for the root scorer term
        ],
        compiler_params=pltpu.CompilerParams(
            # B shards across TensorCores (v7x megacore); tile axis is a
            # sequential accumulation.  No vmem_limit override: defaults are
            # ample once A is row-tiled, and 64 MiB would be the whole v7x VMEM.
            dimension_semantics=("parallel", "arbitrary"),
        ),
    )(a_bf16, x, dsq, w, b, wp, sb)


def _deg_inv_sqrt(a_bf16):
    """1/sqrt(weighted degree + self loop), precomputed outside the kernel."""
    deg = jnp.sum(a_bf16.astype(jnp.float32), axis=2, keepdims=True) + 1.0
    return jax.lax.rsqrt(deg)                                   # (B, N, 1) f32


# ----------------------------------------------------------------------------
# SAGPooling selection (top-k, gather, tanh scaling, filter_adj) -- JAX glue
# ----------------------------------------------------------------------------
def sag_pool(a, x, score_row, node_ids, ratio):
    # TODO(synk): torch_geometric top-k tie-breaking / ragged-batch masking not
    # reproduced; filter_adj is a plain-JAX gather -- at production scale this
    # should become a scalar-prefetched row selection + one-hot column matmul
    # inside the next layer's kernel to avoid re-streaming A through XLA gather.
    B, N, _ = x.shape
    k = int(math.ceil(ratio * N))
    s = score_row[:, 0, :]                                  # (B, N)
    vals, idx = jax.lax.top_k(s, k)                         # per-graph top-k
    xp = jnp.take_along_axis(x, idx[:, :, None], axis=1)
    xp = xp * jnp.tanh(vals)[:, :, None]                    # x[perm] * tanh(score[perm])
    ap = jnp.take_along_axis(a, idx[:, :, None], axis=1)
    ap = jnp.take_along_axis(ap, idx[:, None, :], axis=2)   # filter_adj (stays bf16)
    ids = jnp.take_along_axis(node_ids, idx, axis=1)        # indexs = indexs[perm]
    return ap, xp, ids


# ----------------------------------------------------------------------------
# Readout + Conv1d(1,1,5,pad=2) + MLP + log_softmax
# ----------------------------------------------------------------------------
def _head_kernel(x_ref, ta_ref, tmx_ref, cb_ref, w1_ref, b1_ref, w2_ref, b2_ref,
                 w3_ref, b3_ref, o_ref):
    x = x_ref[...]                                   # (B, n3, F)
    # PyG's pool3 is (B*n3, F); torch.max/mean(pool3, dim=1) reduces over the
    # FEATURE axis, then .view(B, -1) -> (B, n3).  Here that is axis=-1.
    gmax = jnp.max(x, axis=-1)                       # (B, n3)
    gavg = jnp.mean(x, axis=-1)                      # (B, n3)
    # readout = cat([avg, max]); Conv1d expressed as readout @ Toeplitz + b,
    # with the Toeplitz pre-split so no in-kernel non-aligned slicing:
    conv = (jnp.dot(gavg, ta_ref[...], preferred_element_type=jnp.float32)
            + jnp.dot(gmax, tmx_ref[...], preferred_element_type=jnp.float32)
            + cb_ref[...])
    h1 = jnp.maximum(jnp.dot(conv, w1_ref[...], preferred_element_type=jnp.float32)
                     + b1_ref[...], 0.0)
    h2 = jnp.maximum(jnp.dot(h1, w2_ref[...], preferred_element_type=jnp.float32)
                     + b2_ref[...], 0.0)
    logits = jnp.dot(h2, w3_ref[...], preferred_element_type=jnp.float32) + b3_ref[...]
    m = jnp.max(logits, axis=-1, keepdims=True)
    z = logits - m
    lse = jnp.log(jnp.sum(jnp.exp(z), axis=-1, keepdims=True))
    o_ref[...] = z - lse                             # F.log_softmax(logits, dim=1)


def head(pool3, t_avg, t_max, conv_b, w1, b1, w2, b2, w3, b3):
    # TODO(synk): L / num_select are not padded to 128 -- the head is tiny, so
    # masked stores here are negligible.
    B = pool3.shape[0]
    return pl.pallas_call(
        _head_kernel,
        out_shape=jax.ShapeDtypeStruct((B, 12), jnp.float32),
    )(pool3, t_avg, t_max, conv_b, w1, b1, w2, b2, w3, b3)


# ----------------------------------------------------------------------------
# Parameter setup (plain JAX)
# ----------------------------------------------------------------------------
def _init(key, shape, scale=0.1):
    return (scale * jax.random.normal(key, shape)).astype(jnp.float32)


def _conv_toeplitz(w5, L):
    """Conv1d(1,1,5,padding=2) as an (L, L) matrix: out = readout @ T."""
    j = jnp.arange(L)[:, None]   # input position
    i = jnp.arange(L)[None, :]   # output position
    kk = j - i + 2
    valid = (kk >= 0) & (kk < 5)
    return jnp.where(valid, w5[jnp.clip(kk, 0, 4)], 0.0).astype(jnp.float32)


class SAGCNPallas:
    """Pallas/TPU re-implementation of SAGCN's forward pass (dense-graph form)."""

    def __init__(self, sag_rate_3, n_nodes, f_in, hidden, key, max_tile_rows=128):
        # Production dims (2000 nodes / 200 in / 100 hidden) should be padded to
        # lane multiples (200->256, 100->128) with zero weight/bias pads so h
        # stores are unmasked and MXU tiles are full.  Demo dims are aligned.
        self.n_nodes = n_nodes
        self.max_tile_rows = max_tile_rows
        n1 = math.ceil(0.5 * n_nodes)
        n2 = math.ceil(0.5 * n1)
        self.num_select = math.ceil(sag_rate_3 * n2)        # == int(500*k3) scaled down
        self.sag_rates = (0.5, 0.5, sag_rate_3)
        L = 2 * self.num_select

        ks = iter(jax.random.split(key, 32))

        # GCNConv weights (in_features, out_features) + bias (1, out_features)
        self.conv_params = []
        for fin in (f_in, hidden, hidden):
            self.conv_params.append((_init(next(ks), (fin, hidden)),
                                     _init(next(ks), (1, hidden))))
        # SAGPooling scoring GNN: stacked [w_root; w_neigh] rows + bias
        self.pool_params = []
        for _ in range(3):
            self.pool_params.append((_init(next(ks), (2, hidden)),
                                     _init(next(ks), (1, 1))))
        # cnnlayer: Conv1d(1, 1, 5, padding=2) -> Toeplitz matmul, pre-split
        self.conv1d_w = _init(next(ks), (5,))
        self.conv1d_b = _init(next(ks), (1, 1))
        T = _conv_toeplitz(self.conv1d_w, L)
        self.conv1d_T_avg = T[:self.num_select]              # (n3, L)
        self.conv1d_T_max = T[self.num_select:]              # (n3, L)
        # MLP: Linear(2*ns, ns) -> ReLU -> Linear(ns, ns//2) -> ReLU -> Linear(ns//2, 12)
        ns = self.num_select
        self.w1 = _init(next(ks), (L, ns));        self.b1 = _init(next(ks), (1, ns))
        self.w2 = _init(next(ks), (ns, ns // 2));  self.b2 = _init(next(ks), (1, ns // 2))
        self.w3 = _init(next(ks), (ns // 2, 12));  self.b3 = _init(next(ks), (1, 12))

    def __call__(self, x, a):
        B, N, _ = x.shape
        # indexs = range(N) per graph, tracked through the pooling perms
        node_ids = jnp.tile(jnp.arange(N, dtype=jnp.int32)[None, :], (B, 1))
        a = a.astype(jnp.bfloat16)       # bf16 A: halves HBM traffic (f32 accumulation)

        for layer in range(3):
            w, b = self.conv_params[layer]
            wp, sb = self.pool_params[layer]
            dsq = _deg_inv_sqrt(a)                                  # (B, N, 1)
            h, score = gcn_relu_score(a, x, dsq, w, b, wp, sb,
                                      max_tile_rows=self.max_tile_rows)
            a, x, node_ids = sag_pool(a, h, score, node_ids, self.sag_rates[layer])

        log_probs = head(x, self.conv1d_T_avg, self.conv1d_T_max, self.conv1d_b,
                         self.w1, self.b1, self.w2, self.b2, self.w3, self.b3)
        return log_probs, node_ids                   # (B, 12), (B, num_select)


if __name__ == "__main__":
    # Production 2000 nodes / 200 feats / 100 hidden scaled to 256 / 128 / 128
    # (feature dims kept 128-aligned per the lane-density guidance).
    B, N, F_IN, HIDDEN = 2, 256, 128, 128
    key = jax.random.PRNGKey(0)
    kx, ka, km = jax.random.split(key, 3)

    x = jax.random.normal(kx, (B, N, F_IN), jnp.float32)
    # random sparse SYMMETRIC weighted adjacency (no self loops; GCN adds them)
    raw = jax.random.uniform(ka, (B, N, N), jnp.float32)
    mask = (jax.random.uniform(km, (B, N, N)) > 0.85).astype(jnp.float32)
    adj = raw * mask
    adj = 0.5 * (adj + jnp.transpose(adj, (0, 2, 1)))
    adj = adj * (1.0 - jnp.eye(N, dtype=jnp.float32)[None])

    model = SAGCNPallas(sag_rate_3=0.5, n_nodes=N, f_in=F_IN, hidden=HIDDEN,
                        key=jax.random.PRNGKey(42), max_tile_rows=128)

    fwd = jax.jit(lambda xx, aa: model(xx, aa))
    log_probs, indexs = fwd(x, adj)
    jax.block_until_ready((log_probs, indexs))

    assert log_probs.shape == (B, 12), log_probs.shape
    assert indexs.shape == (B, model.num_select), indexs.shape
    assert bool(jnp.all(jnp.isfinite(log_probs)))
    # rows of log_softmax should sum to ~1 in prob space
    assert bool(jnp.allclose(jnp.sum(jnp.exp(log_probs), axis=1), 1.0, atol=1e-4))
    print("KERNEL_OK")
</pallas_src>

<mosaic_0001>
module attributes {stable_mosaic.version = 11 : i64} {
  func.func @_gcn_pool_kernel(%arg0: i32, %arg1: i32, %arg2: memref<1x128x256xbf16, #tpu.memory_space<vmem>>, %arg3: memref<1x256x128xf32, #tpu.memory_space<vmem>>, %arg4: memref<1x256x1xf32, #tpu.memory_space<vmem>>, %arg5: memref<128x128xf32, #tpu.memory_space<vmem>>, %arg6: memref<1x128xf32, #tpu.memory_space<vmem>>, %arg7: memref<2x128xf32, #tpu.memory_space<vmem>>, %arg8: memref<1x1xf32, #tpu.memory_space<vmem>>, %arg9: memref<1x128x128xf32, #tpu.memory_space<vmem>>, %arg10: memref<1x1x256xf32, #tpu.memory_space<vmem>>, %arg11: memref<256x128xbf16, #tpu.memory_space<vmem>>, %arg12: memref<256x128xf32, #tpu.memory_space<vmem>>) attributes {dimension_semantics = [#tpu.dimension_semantics<parallel>, #tpu.dimension_semantics<arbitrary>], iteration_bounds = array<i64: 2, 2>, scalar_prefetch = 0 : i64, scratch_operands = 2 : i64, tpu.core_type = #tpu.core_type<tc>, window_params = [{transform_indices = @transform_0, window_bounds = array<i64: 1, 128, 256>}, {transform_indices = @transform_1, window_bounds = array<i64: 1, 256, 128>}, {transform_indices = @transform_2, window_bounds = array<i64: 1, 256, 1>}, {pipeline_mode = #tpu.pipeline_mode<synchronous>, transform_indices = @transform_3, window_bounds = array<i64: 128, 128>}, {pipeline_mode = #tpu.pipeline_mode<synchronous>, transform_indices = @transform_4, window_bounds = array<i64: 1, 128>}, {pipeline_mode = #tpu.pipeline_mode<synchronous>, transform_indices = @transform_5, window_bounds = array<i64: 2, 128>}, {pipeline_mode = #tpu.pipeline_mode<synchronous>, transform_indices = @transform_6, window_bounds = array<i64: 1, 1>}, {transform_indices = @transform_7, window_bounds = array<i64: 1, 128, 128>}, {transform_indices = @transform_8, window_bounds = array<i64: 1, 1, 256>}]} {
    %c0_i32 = arith.constant 0 : i32
    %0 = arith.cmpi eq, %arg1, %c0_i32 : i32
    %1 = arith.extui %0 : i1 to i32
    %c0_i32_0 = arith.constant 0 : i32
    %2 = arith.cmpi ne, %1, %c0_i32_0 : i32
    scf.if %2 {
      %c0_25 = arith.constant 0 : index
      %c0_26 = arith.constant 0 : index
      %c0_27 = arith.constant 0 : index
      %41 = vector.load %arg3[%c0_25, %c0_26, %c0_27] : memref<1x256x128xf32, #tpu.memory_space<vmem>>, vector<1x256x128xf32>
      %42 = vector.shape_cast %41 : vector<1x256x128xf32> to vector<256x128xf32>
      %c0_28 = arith.constant 0 : index
      %c0_29 = arith.constant 0 : index
      %43 = vector.load %arg5[%c0_28, %c0_29] : memref<128x128xf32, #tpu.memory_space<vmem>>, vector<128x128xf32>
      %cst_30 = arith.constant dense<0.000000e+00> : vector<256x128xf32>
      %44 = tpu.matmul %42, %43, %cst_30 {dimension_numbers = #tpu.dot_dimension_numbers<[1], [0], [0], [1], [0, 0, 1, 1], [], []>} : vector<256x128xf32>, vector<128x128xf32>, vector<256x128xf32> -> vector<256x128xf32>
      %c0_31 = arith.constant 0 : index
      %c0_32 = arith.constant 0 : index
      %c0_33 = arith.constant 0 : index
      %45 = vector.load %arg4[%c0_31, %c0_32, %c0_33] : memref<1x256x1xf32, #tpu.memory_space<vmem>>, vector<1x256x1xf32>
      %46 = vector.shape_cast %45 : vector<1x256x1xf32> to vector<256x1xf32>
      %47 = vector.broadcast %46 : vector<256x1xf32> to vector<256x128xf32>
      %48 = arith.mulf %47, %44 : vector<256x128xf32>
      %49 = arith.truncf %48 : vector<256x128xf32> to vector<256x128xbf16>
      %c0_34 = arith.constant 0 : index
      %c0_35 = arith.constant 0 : index
      %50 = vector.load %arg11[%c0_34, %c0_35] : memref<256x128xbf16, #tpu.memory_space<vmem>>, vector<256x128xbf16>
      tpu.vector_store %arg11[%c0_34, %c0_35], %49 {strides = array<i32>} : memref<256x128xbf16, #tpu.memory_space<vmem>>, vector<256x128xbf16>,
      %cst_36 = arith.constant 0.000000e+00 : f32
      %51 = vector.broadcast %cst_36 : f32 to vector<1x1x256xf32>
      %c0_37 = arith.constant 0 : index
      %c0_38 = arith.constant 0 : index
      %c0_39 = arith.constant 0 : index
      %52 = vector.load %arg10[%c0_37, %c0_38, %c0_39] : memref<1x1x256xf32, #tpu.memory_space<vmem>>, vector<1x1x256xf32>
      tpu.vector_store %arg10[%c0_37, %c0_38, %c0_39], %51 {strides = array<i32>} : memref<1x1x256xf32, #tpu.memory_space<vmem>>, vector<1x1x256xf32>,
    } else {
    }
    %c0 = arith.constant 0 : index
    %c0_1 = arith.constant 0 : index
    %c0_2 = arith.constant 0 : index
    %3 = vector.load %arg2[%c0, %c0_1, %c0_2] : memref<1x128x256xbf16, #tpu.memory_space<vmem>>, vector<1x128x256xbf16>
    %4 = vector.shape_cast %3 : vector<1x128x256xbf16> to vector<128x256xbf16>
    %c128_i32 = arith.constant 128 : i32
    %5 = arith.muli %arg1, %c128_i32 : i32
    %6 = tpu.assume_multiple %5, 128 : i32
    %c0_3 = arith.constant 0 : index
    %7 = arith.index_cast %6 : i32 to index
    %c0_4 = arith.constant 0 : index
    %8 = vector.load %arg4[%c0_3, %7, %c0_4] : memref<1x256x1xf32, #tpu.memory_space<vmem>>, vector<1x128x1xf32>
    %9 = vector.shape_cast %8 : vector<1x128x1xf32> to vector<128x1xf32>
    %10 = arith.index_cast %6 : i32 to index
    %c0_5 = arith.constant 0 : index
    %11 = vector.load %arg11[%10, %c0_5] : memref<256x128xbf16, #tpu.memory_space<vmem>>, vector<128x128xbf16>
    %12 = arith.extf %11 : vector<128x128xbf16> to vector<128x128xf32>
    %c0_6 = arith.constant 0 : index
    %c0_7 = arith.constant 0 : index
    %13 = vector.load %arg11[%c0_6, %c0_7] : memref<256x128xbf16, #tpu.memory_space<vmem>>, vector<256x128xbf16>
    %cst = arith.constant dense<0.000000e+00> : vector<128x128xf32>
    %14 = tpu.matmul %4, %13, %cst {dimension_numbers = #tpu.dot_dimension_numbers<[1], [0], [0], [1], [0, 0, 1, 1], [], []>} : vector<128x256xbf16>, vector<256x128xbf16>, vector<128x128xf32> -> vector<128x128xf32>
    %15 = arith.addf %14, %12 : vector<128x128xf32>
    %16 = vector.broadcast %9 : vector<128x1xf32> to vector<128x128xf32>
    %17 = arith.mulf %16, %15 : vector<128x128xf32>
    %c0_8 = arith.constant 0 : index
    %c0_9 = arith.constant 0 : index
    %18 = vector.load %arg6[%c0_8, %c0_9] : memref<1x128xf32, #tpu.memory_space<vmem>>, vector<1x128xf32>
    %19 = vector.broadcast %18 : vector<1x128xf32> to vector<128x128xf32>
    %20 = arith.addf %17, %19 : vector<128x128xf32>
    %cst_10 = arith.constant 0.000000e+00 : f32
    %21 = vector.broadcast %cst_10 : f32 to vector<128x128xf32>
    %22 = arith.maximumf %20, %21 : vector<128x128xf32>
    %c0_11 = arith.constant 0 : index
    %c0_12 = arith.constant 0 : index
    %c0_13 = arith.constant 0 : index
    %23 = vector.load %arg9[%c0_11, %c0_12, %c0_13] : memref<1x128x128xf32, #tpu.memory_space<vmem>>, vector<1x128x128xf32>
    %24 = vector.shape_cast %23 : vector<1x128x128xf32> to vector<128x128xf32>
    %25 = vector.shape_cast %22 : vector<128x128xf32> to vector<1x128x128xf32>
    tpu.vector_store %arg9[%c0_11, %c0_12, %c0_13], %25 {strides = array<i32>} : memref<1x128x128xf32, #tpu.memory_space<vmem>>, vector<1x128x128xf32>,
    %26 = arith.index_cast %6 : i32 to index
    %c0_14 = arith.constant 0 : index
    %27 = vector.load %arg12[%26, %c0_14] : memref<256x128xf32, #tpu.memory_space<vmem>>, vector<128x128xf32>
    tpu.vector_store %arg12[%26, %c0_14], %22 {strides = array<i32>} : memref<256x128xf32, #tpu.memory_space<vmem>>, vector<128x128xf32>,
    %c1 = arith.constant 1 : index
    %c0_15 = arith.constant 0 : index
    %28 = vector.load %arg7[%c1, %c0_15] : memref<2x128xf32, #tpu.memory_space<vmem>>, vector<1x128xf32>
    %cst_16 = arith.constant dense<0.000000e+00> : vector<1x128xf32>
    %29 = tpu.matmul %28, %22, %cst_16 {dimension_numbers = #tpu.dot_dimension_numbers<[1], [1], [0], [0], [0, 0, 1, 0], [], []>} : vector<1x128xf32>, vector<128x128xf32>, vector<1x128xf32> -> vector<1x128xf32>
    %c0_17 = arith.constant 0 : index
    %c0_18 = arith.constant 0 : index
    %c0_19 = arith.constant 0 : index
    %30 = vector.load %arg10[%c0_17, %c0_18, %c0_19] : memref<1x1x256xf32, #tpu.memory_space<vmem>>, vector<1x1x256xf32>
    %31 = vector.shape_cast %30 : vector<1x1x256xf32> to vector<1x256xf32>
    %32 = arith.truncf %29 : vector<1x128xf32> to vector<1x128xbf16>
    %cst_20 = arith.constant dense<0.000000e+00> : vector<1x256xf32>
    %33 = tpu.matmul %32, %4, %cst_20 {dimension_numbers = #tpu.dot_dimension_numbers<[1], [0], [0], [1], [0, 0, 1, 1], [], []>} : vector<1x128xbf16>, vector<128x256xbf16>, vector<1x256xf32> -> vector<1x256xf32>
    %34 = arith.addf %31, %33 : vector<1x256xf32>
    %c0_21 = arith.constant 0 : index
    %c0_22 = arith.constant 0 : index
    %c0_23 = arith.constant 0 : index
    %35 = vector.load %arg10[%c0_21, %c0_22, %c0_23] : memref<1x1x256xf32, #tpu.memory_space<vmem>>, vector<1x1x256xf32>
    %36 = vector.shape_cast %35 : vector<1x1x256xf32> to vector<1x256xf32>
    %37 = vector.shape_cast %34 : vector<1x256xf32> to vector<1x1x256xf32>
    tpu.vector_store %arg10[%c0_21, %c0_22, %c0_23], %37 {strides = array<i32>} : memref<1x1x256xf32, #tpu.memory_space<vmem>>, vector<1x1x256xf32>,
    %c1_i32 = arith.constant 1 : i32
    %38 = arith.cmpi eq, %arg1, %c1_i32 : i32
    %39 = arith.extui %38 : i1 to i32
    %c0_i32_24 = arith.constant 0 : i32
    %40 = arith.cmpi ne, %39, %c0_i32_24 : i32
    scf.if %40 {
      %c0_25 = arith.constant 0 : index
      %c0_26 = arith.constant 0 : index
      %41 = vector.load %arg7[%c0_25, %c0_26] : memref<2x128xf32, #tpu.memory_space<vmem>>, vector<1x128xf32>
      %c0_27 = arith.constant 0 : index
      %c0_28 = arith.constant 0 : index
      %42 = vector.load %arg12[%c0_27, %c0_28] : memref<256x128xf32, #tpu.memory_space<vmem>>, vector<256x128xf32>
      %cst_29 = arith.constant dense<0.000000e+00> : vector<1x256xf32>
      %43 = tpu.matmul %41, %42, %cst_29 {dimension_numbers = #tpu.dot_dimension_numbers<[1], [1], [0], [0], [0, 0, 1, 0], [], []>} : vector<1x128xf32>, vector<256x128xf32>, vector<1x256xf32> -> vector<1x256xf32>
      %c0_30 = arith.constant 0 : index
      %c0_31 = arith.constant 0 : index
      %c0_32 = arith.constant 0 : index
      %44 = vector.load %arg10[%c0_30, %c0_31, %c0_32] : memref<1x1x256xf32, #tpu.memory_space<vmem>>, vector<1x1x256xf32>
      %45 = vector.shape_cast %44 : vector<1x1x256xf32> to vector<1x256xf32>
      %c0_33 = arith.constant 0 : index
      %c0_34 = arith.constant 0 : index
      %46 = vector.load %arg8[%c0_33, %c0_34] : memref<1x1xf32, #tpu.memory_space<vmem>>, vector<1x1xf32>
      %47 = vector.broadcast %46 : vector<1x1xf32> to vector<1x256xf32>
      %48 = arith.addf %43, %47 : vector<1x256xf32>
      %49 = arith.addf %45, %48 : vector<1x256xf32>
      %c0_35 = arith.constant 0 : index
      %c0_36 = arith.constant 0 : index
      %c0_37 = arith.constant 0 : index
      %50 = vector.load %arg10[%c0_35, %c0_36, %c0_37] : memref<1x1x256xf32, #tpu.memory_space<vmem>>, vector<1x1x256xf32>
      %51 = vector.shape_cast %50 : vector<1x1x256xf32> to vector<1x256xf32>
      %52 = vector.shape_cast %49 : vector<1x256xf32> to vector<1x1x256xf32>
      tpu.vector_store %arg10[%c0_35, %c0_36, %c0_37], %52 {strides = array<i32>} : memref<1x1x256xf32, #tpu.memory_space<vmem>>, vector<1x1x256xf32>,
    } else {
    }
    return
  }
  func.func @transform_0(%arg0: i32, %arg1: i32) -> (i32, i32, i32) {
    %c0_i32 = arith.constant 0 : i32
    %c0_i32_0 = arith.constant 0 : i32
    return %arg0, %arg1, %c0_i32 : i32, i32, i32
  }
  func.func @transform_1(%arg0: i32, %arg1: i32) -> (i32, i32, i32) {
    %c0_i32 = arith.constant 0 : i32
    %c0_i32_0 = arith.constant 0 : i32
    %c0_i32_1 = arith.constant 0 : i32
    return %arg0, %c0_i32, %c0_i32_0 : i32, i32, i32
  }
  func.func @transform_2(%arg0: i32, %arg1: i32) -> (i32, i32, i32) {
    %c0_i32 = arith.constant 0 : i32
    %c0_i32_0 = arith.constant 0 : i32
    %c0_i32_1 = arith.constant 0 : i32
    return %arg0, %c0_i32, %c0_i32_0 : i32, i32, i32
  }
  func.func @transform_3(%arg0: i32, %arg1: i32) -> (i32, i32) {
    %c0_i32 = arith.constant 0 : i32
    %c0_i32_0 = arith.constant 0 : i32
    %c0_i32_1 = arith.constant 0 : i32
    return %c0_i32, %c0_i32_0 : i32, i32
  }
  func.func @transform_4(%arg0: i32, %arg1: i32) -> (i32, i32) {
    %c0_i32 = arith.constant 0 : i32
    %c0_i32_0 = arith.constant 0 : i32
    %c0_i32_1 = arith.constant 0 : i32
    return %c0_i32, %c0_i32_0 : i32, i32
  }
  func.func @transform_5(%arg0: i32, %arg1: i32) -> (i32, i32) {
    %c0_i32 = arith.constant 0 : i32
    %c0_i32_0 = arith.constant 0 : i32
    %c0_i32_1 = arith.constant 0 : i32
    return %c0_i32, %c0_i32_0 : i32, i32
  }
  func.func @transform_6(%arg0: i32, %arg1: i32) -> (i32, i32) {
    %c0_i32 = arith.constant 0 : i32
    %c0_i32_0 = arith.constant 0 : i32
    %c0_i32_1 = arith.constant 0 : i32
    return %c0_i32, %c0_i32_0 : i32, i32
  }
  func.func @transform_7(%arg0: i32, %arg1: i32) -> (i32, i32, i32) {
    %c0_i32 = arith.constant 0 : i32
    %c0_i32_0 = arith.constant 0 : i32
    return %arg0, %arg1, %c0_i32 : i32, i32, i32
  }
  func.func @transform_8(%arg0: i32, %arg1: i32) -> (i32, i32, i32) {
    %c0_i32 = arith.constant 0 : i32
    %c0_i32_0 = arith.constant 0 : i32
    %c0_i32_1 = arith.constant 0 : i32
    return %arg0, %c0_i32, %c0_i32_0 : i32, i32, i32
  }
}

module attributes {stable_mosaic.version = 11 : i64} {
  func.func @_gcn_pool_kernel(%arg0: i32, %arg1: i32, %arg2: memref<1x128x128xbf16, #tpu.memory_space<vmem>>, %arg3: memref<1x128x128xf32, #tpu.memory_space<vmem>>, %arg4: memref<1x128x1xf32, #tpu.memory_space<vmem>>, %arg5: memref<128x128xf32, #tpu.memory_space<vmem>>, %arg6: memref<1x128xf32, #tpu.memory_space<vmem>>, %arg7: memref<2x128xf32, #tpu.memory_space<vmem>>, %arg8: memref<1x1xf32, #tpu.memory_space<vmem>>, %arg9: memref<1x128x128xf32, #tpu.memory_space<vmem>>, %arg10: memref<1x1x128xf32, #tpu.memory_space<vmem>>, %arg11: memref<128x128xbf16, #tpu.memory_space<vmem>>, %arg12: memref<128x128xf32, #tpu.memory_space<vmem>>) attributes {dimension_semantics = [#tpu.dimension_semantics<parallel>, #tpu.dimension_semantics<arbitrary>], iteration_bounds = array<i64: 2, 1>, scalar_prefetch = 0 : i64, scratch_operands = 2 : i64, tpu.core_type = #tpu.core_type<tc>, window_params = [{transform_indices = @transform_0, window_bounds = array<i64: 1, 128, 128>}, {transform_indices = @transform_1, window_bounds = array<i64: 1, 128, 128>}, {transform_indices = @transform_2, window_bounds = array<i64: 1, 128, 1>}, {pipeline_mode = #tpu.pipeline_mode<synchronous>, transform_indices = @transform_3, window_bounds = array<i64: 128, 128>}, {pipeline_mode = #tpu.pipeline_mode<synchronous>, transform_indices = @transform_4, window_bounds = array<i64: 1, 128>}, {pipeline_mode = #tpu.pipeline_mode<synchronous>, transform_indices = @transform_5, window_bounds = array<i64: 2, 128>}, {pipeline_mode = #tpu.pipeline_mode<synchronous>, transform_indices = @transform_6, window_bounds = array<i64: 1, 1>}, {transform_indices = @transform_7, window_bounds = array<i64: 1, 128, 128>}, {transform_indices = @transform_8, window_bounds = array<i64: 1, 1, 128>}]} {
    %c0_i32 = arith.constant 0 : i32
    %0 = arith.cmpi eq, %arg1, %c0_i32 : i32
    %1 = arith.extui %0 : i1 to i32
    %c0_i32_0 = arith.constant 0 : i32
    %2 = arith.cmpi ne, %1, %c0_i32_0 : i32
    scf.if %2 {
      %c0_26 = arith.constant 0 : index
      %c0_27 = arith.constant 0 : index
      %c0_28 = arith.constant 0 : index
      %41 = vector.load %arg3[%c0_26, %c0_27, %c0_28] : memref<1x128x128xf32, #tpu.memory_space<vmem>>, vector<1x128x128xf32>
      %42 = vector.shape_cast %41 : vector<1x128x128xf32> to vector<128x128xf32>
      %c0_29 = arith.constant 0 : index
      %c0_30 = arith.constant 0 : index
      %43 = vector.load %arg5[%c0_29, %c0_30] : memref<128x128xf32, #tpu.memory_space<vmem>>, vector<128x128xf32>
      %cst_31 = arith.constant dense<0.000000e+00> : vector<128x128xf32>
      %44 = tpu.matmul %42, %43, %cst_31 {dimension_numbers = #tpu.dot_dimension_numbers<[1], [0], [0], [1], [0, 0, 1, 1], [], []>} : vector<128x128xf32>, vector<128x128xf32>, vector<128x128xf32> -> vector<128x128xf32>
      %c0_32 = arith.constant 0 : index
      %c0_33 = arith.constant 0 : index
      %c0_34 = arith.constant 0 : index
      %45 = vector.load %arg4[%c0_32, %c0_33, %c0_34] : memref<1x128x1xf32, #tpu.memory_space<vmem>>, vector<1x128x1xf32>
      %46 = vector.shape_cast %45 : vector<1x128x1xf32> to vector<128x1xf32>
      %47 = vector.broadcast %46 : vector<128x1xf32> to vector<128x128xf32>
      %48 = arith.mulf %47, %44 : vector<128x128xf32>
      %49 = arith.truncf %48 : vector<128x128xf32> to vector<128x128xbf16>
      %c0_35 = arith.constant 0 : index
      %c0_36 = arith.constant 0 : index
      %50 = vector.load %arg11[%c0_35, %c0_36] : memref<128x128xbf16, #tpu.memory_space<vmem>>, vector<128x128xbf16>
      tpu.vector_store %arg11[%c0_35, %c0_36], %49 {strides = array<i32>} : memref<128x128xbf16, #tpu.memory_space<vmem>>, vector<128x128xbf16>,
      %cst_37 = arith.constant 0.000000e+00 : f32
      %51 = vector.broadcast %cst_37 : f32 to vector<1x1x128xf32>
      %c0_38 = arith.constant 0 : index
      %c0_39 = arith.constant 0 : index
      %c0_40 = arith.constant 0 : index
      %52 = vector.load %arg10[%c0_38, %c0_39, %c0_40] : memref<1x1x128xf32, #tpu.memory_space<vmem>>, vector<1x1x128xf32>
      tpu.vector_store %arg10[%c0_38, %c0_39, %c0_40], %51 {strides = array<i32>} : memref<1x1x128xf32, #tpu.memory_space<vmem>>, vector<1x1x128xf32>,
    } else {
    }
    %c0 = arith.constant 0 : index
    %c0_1 = arith.constant 0 : index
    %c0_2 = arith.constant 0 : index
    %3 = vector.load %arg2[%c0, %c0_1, %c0_2] : memref<1x128x128xbf16, #tpu.memory_space<vmem>>, vector<1x128x128xbf16>
    %4 = vector.shape_cast %3 : vector<1x128x128xbf16> to vector<128x128xbf16>
    %c128_i32 = arith.constant 128 : i32
    %5 = arith.muli %arg1, %c128_i32 : i32
    %6 = tpu.assume_multiple %5, 128 : i32
    %c0_3 = arith.constant 0 : index
    %7 = arith.index_cast %6 : i32 to index
    %c0_4 = arith.constant 0 : index
    %8 = vector.load %arg4[%c0_3, %7, %c0_4] : memref<1x128x1xf32, #tpu.memory_space<vmem>>, vector<1x128x1xf32>
    %9 = vector.shape_cast %8 : vector<1x128x1xf32> to vector<128x1xf32>
    %10 = arith.index_cast %6 : i32 to index
    %c0_5 = arith.constant 0 : index
    %11 = vector.load %arg11[%10, %c0_5] : memref<128x128xbf16, #tpu.memory_space<vmem>>, vector<128x128xbf16>
    %12 = arith.extf %11 : vector<128x128xbf16> to vector<128x128xf32>
    %c0_6 = arith.constant 0 : index
    %c0_7 = arith.constant 0 : index
    %13 = vector.load %arg11[%c0_6, %c0_7] : memref<128x128xbf16, #tpu.memory_space<vmem>>, vector<128x128xbf16>
    %cst = arith.constant dense<0.000000e+00> : vector<128x128xf32>
    %14 = tpu.matmul %4, %13, %cst {dimension_numbers = #tpu.dot_dimension_numbers<[1], [0], [0], [1], [0, 0, 1, 1], [], []>} : vector<128x128xbf16>, vector<128x128xbf16>, vector<128x128xf32> -> vector<128x128xf32>
    %15 = arith.addf %14, %12 : vector<128x128xf32>
    %16 = vector.broadcast %9 : vector<128x1xf32> to vector<128x128xf32>
    %17 = arith.mulf %16, %15 : vector<128x128xf32>
    %c0_8 = arith.constant 0 : index
    %c0_9 = arith.constant 0 : index
    %18 = vector.load %arg6[%c0_8, %c0_9] : memref<1x128xf32, #tpu.memory_space<vmem>>, vector<1x128xf32>
    %19 = vector.broadcast %18 : vector<1x128xf32> to vector<128x128xf32>
    %20 = arith.addf %17, %19 : vector<128x128xf32>
    %cst_10 = arith.constant 0.000000e+00 : f32
    %21 = vector.broadcast %cst_10 : f32 to vector<128x128xf32>
    %22 = arith.maximumf %20, %21 : vector<128x128xf32>
    %c0_11 = arith.constant 0 : index
    %c0_12 = arith.constant 0 : index
    %c0_13 = arith.constant 0 : index
    %23 = vector.load %arg9[%c0_11, %c0_12, %c0_13] : memref<1x128x128xf32, #tpu.memory_space<vmem>>, vector<1x128x128xf32>
    %24 = vector.shape_cast %23 : vector<1x128x128xf32> to vector<128x128xf32>
    %25 = vector.shape_cast %22 : vector<128x128xf32> to vector<1x128x128xf32>
    tpu.vector_store %arg9[%c0_11, %c0_12, %c0_13], %25 {strides = array<i32>} : memref<1x128x128xf32, #tpu.memory_space<vmem>>, vector<1x128x128xf32>,
    %26 = arith.index_cast %6 : i32 to index
    %c0_14 = arith.constant 0 : index
    %27 = vector.load %arg12[%26, %c0_14] : memref<128x128xf32, #tpu.memory_space<vmem>>, vector<128x128xf32>
    tpu.vector_store %arg12[%26, %c0_14], %22 {strides = array<i32>} : memref<128x128xf32, #tpu.memory_space<vmem>>, vector<128x128xf32>,
    %c1 = arith.constant 1 : index
    %c0_15 = arith.constant 0 : index
    %28 = vector.load %arg7[%c1, %c0_15] : memref<2x128xf32, #tpu.memory_space<vmem>>, vector<1x128xf32>
    %cst_16 = arith.constant dense<0.000000e+00> : vector<1x128xf32>
    %29 = tpu.matmul %28, %22, %cst_16 {dimension_numbers = #tpu.dot_dimension_numbers<[1], [1], [0], [0], [0, 0, 1, 0], [], []>} : vector<1x128xf32>, vector<128x128xf32>, vector<1x128xf32> -> vector<1x128xf32>
    %c0_17 = arith.constant 0 : index
    %c0_18 = arith.constant 0 : index
    %c0_19 = arith.constant 0 : index
    %30 = vector.load %arg10[%c0_17, %c0_18, %c0_19] : memref<1x1x128xf32, #tpu.memory_space<vmem>>, vector<1x1x128xf32>
    %31 = vector.shape_cast %30 : vector<1x1x128xf32> to vector<1x128xf32>
    %32 = arith.truncf %29 : vector<1x128xf32> to vector<1x128xbf16>
    %cst_20 = arith.constant dense<0.000000e+00> : vector<1x128xf32>
    %33 = tpu.matmul %32, %4, %cst_20 {dimension_numbers = #tpu.dot_dimension_numbers<[1], [0], [0], [1], [0, 0, 1, 1], [], []>} : vector<1x128xbf16>, vector<128x128xbf16>, vector<1x128xf32> -> vector<1x128xf32>
    %34 = arith.addf %31, %33 : vector<1x128xf32>
    %c0_21 = arith.constant 0 : index
    %c0_22 = arith.constant 0 : index
    %c0_23 = arith.constant 0 : index
    %35 = vector.load %arg10[%c0_21, %c0_22, %c0_23] : memref<1x1x128xf32, #tpu.memory_space<vmem>>, vector<1x1x128xf32>
    %36 = vector.shape_cast %35 : vector<1x1x128xf32> to vector<1x128xf32>
    %37 = vector.shape_cast %34 : vector<1x128xf32> to vector<1x1x128xf32>
    tpu.vector_store %arg10[%c0_21, %c0_22, %c0_23], %37 {strides = array<i32>} : memref<1x1x128xf32, #tpu.memory_space<vmem>>, vector<1x1x128xf32>,
    %c0_i32_24 = arith.constant 0 : i32
    %38 = arith.cmpi eq, %arg1, %c0_i32_24 : i32
    %39 = arith.extui %38 : i1 to i32
    %c0_i32_25 = arith.constant 0 : i32
    %40 = arith.cmpi ne, %39, %c0_i32_25 : i32
    scf.if %40 {
      %c0_26 = arith.constant 0 : index
      %c0_27 = arith.constant 0 : index
      %41 = vector.load %arg7[%c0_26, %c0_27] : memref<2x128xf32, #tpu.memory_space<vmem>>, vector<1x128xf32>
      %c0_28 = arith.constant 0 : index
      %c0_29 = arith.constant 0 : index
      %42 = vector.load %arg12[%c0_28, %c0_29] : memref<128x128xf32, #tpu.memory_space<vmem>>, vector<128x128xf32>
      %cst_30 = arith.constant dense<0.000000e+00> : vector<1x128xf32>
      %43 = tpu.matmul %41, %42, %cst_30 {dimension_numbers = #tpu.dot_dimension_numbers<[1], [1], [0], [0], [0, 0, 1, 0], [], []>} : vector<1x128xf32>, vector<128x128xf32>, vector<1x128xf32> -> vector<1x128xf32>
      %c0_31 = arith.constant 0 : index
      %c0_32 = arith.constant 0 : index
      %c0_33 = arith.constant 0 : index
      %44 = vector.load %arg10[%c0_31, %c0_32, %c0_33] : memref<1x1x128xf32, #tpu.memory_space<vmem>>, vector<1x1x128xf32>
      %45 = vector.shape_cast %44 : vector<1x1x128xf32> to vector<1x128xf32>
      %c0_34 = arith.constant 0 : index
      %c0_35 = arith.constant 0 : index
      %46 = vector.load %arg8[%c0_34, %c0_35] : memref<1x1xf32, #tpu.memory_space<vmem>>, vector<1x1xf32>
      %47 = vector.broadcast %46 : vector<1x1xf32> to vector<1x128xf32>
      %48 = arith.addf %43, %47 : vector<1x128xf32>
      %49 = arith.addf %45, %48 : vector<1x128xf32>
      %c0_36 = arith.constant 0 : index
      %c0_37 = arith.constant 0 : index
      %c0_38 = arith.constant 0 : index
      %50 = vector.load %arg10[%c0_36, %c0_37, %c0_38] : memref<1x1x128xf32, #tpu.memory_space<vmem>>, vector<1x1x128xf32>
      %51 = vector.shape_cast %50 : vector<1x1x128xf32> to vector<1x128xf32>
      %52 = vector.shape_cast %49 : vector<1x128xf32> to vector<1x1x128xf32>
      tpu.vector_store %arg10[%c0_36, %c0_37, %c0_38], %52 {strides = array<i32>} : memref<1x1x128xf32, #tpu.memory_space<vmem>>, vector<1x1x128xf32>,
    } else {
    }
    return
  }
  func.func @transform_0(%arg0: i32, %arg1: i32) -> (i32, i32, i32) {
    %c0_i32 = arith.constant 0 : i32
    %c0_i32_0 = arith.constant 0 : i32
    return %arg0, %arg1, %c0_i32 : i32, i32, i32
  }
  func.func @transform_1(%arg0: i32, %arg1: i32) -> (i32, i32, i32) {
    %c0_i32 = arith.constant 0 : i32
    %c0_i32_0 = arith.constant 0 : i32
    %c0_i32_1 = arith.constant 0 : i32
    return %arg0, %c0_i32, %c0_i32_0 : i32, i32, i32
  }
  func.func @transform_2(%arg0: i32, %arg1: i32) -> (i32, i32, i32) {
    %c0_i32 = arith.constant 0 : i32
    %c0_i32_0 = arith.constant 0 : i32
    %c0_i32_1 = arith.constant 0 : i32
    return %arg0, %c0_i32, %c0_i32_0 : i32, i32, i32
  }
  func.func @transform_3(%arg0: i32, %arg1: i32) -> (i32, i32) {
    %c0_i32 = arith.constant 0 : i32
    %c0_i32_0 = arith.constant 0 : i32
    %c0_i32_1 = arith.constant 0 : i32
    return %c0_i32, %c0_i32_0 : i32, i32
  }
  func.func @transform_4(%arg0: i32, %arg1: i32) -> (i32, i32) {
    %c0_i32 = arith.constant 0 : i32
    %c0_i32_0 = arith.constant 0 : i32
    %c0_i32_1 = arith.constant 0 : i32
    return %c0_i32, %c0_i32_0 : i32, i32
  }
  func.func @transform_5(%arg0: i32, %arg1: i32) -> (i32, i32) {
    %c0_i32 = arith.constant 0 : i32
    %c0_i32_0 = arith.constant 0 : i32
    %c0_i32_1 = arith.constant 0 : i32
    return %c0_i32, %c0_i32_0 : i32, i32
  }
  func.func @transform_6(%arg0: i32, %arg1: i32) -> (i32, i32) {
    %c0_i32 = arith.constant 0 : i32
    %c0_i32_0 = arith.constant 0 : i32
    %c0_i32_1 = arith.constant 0 : i32
    return %c0_i32, %c0_i32_0 : i32, i32
  }
  func.func @transform_7(%arg0: i32, %arg1: i32) -> (i32, i32, i32) {
    %c0_i32 = arith.constant 0 : i32
    %c0_i32_0 = arith.constant 0 : i32
    return %arg0, %arg1, %c0_i32 : i32, i32, i32
  }
  func.func @transform_8(%arg0: i32, %arg1: i32) -> (i32, i32, i32) {
    %c0_i32 = arith.constant 0 : i32
    %c0_i32_0 = arith.constant 0 : i32
    %c0_i32_1 = arith.constant 0 : i32
    return %arg0, %c0_i32, %c0_i32_0 : i32, i32, i32
  }
}

module attributes {stable_mosaic.version = 11 : i64} {
  func.func @_gcn_pool_kernel(%arg0: i32, %arg1: i32, %arg2: memref<1x64x64xbf16, #tpu.memory_space<vmem>>, %arg3: memref<1x64x128xf32, #tpu.memory_space<vmem>>, %arg4: memref<1x64x1xf32, #tpu.memory_space<vmem>>, %arg5: memref<128x128xf32, #tpu.memory_space<vmem>>, %arg6: memref<1x128xf32, #tpu.memory_space<vmem>>, %arg7: memref<2x128xf32, #tpu.memory_space<vmem>>, %arg8: memref<1x1xf32, #tpu.memory_space<vmem>>, %arg9: memref<1x64x128xf32, #tpu.memory_space<vmem>>, %arg10: memref<1x1x64xf32, #tpu.memory_space<vmem>>, %arg11: memref<64x128xbf16, #tpu.memory_space<vmem>>, %arg12: memref<64x128xf32, #tpu.memory_space<vmem>>) attributes {dimension_semantics = [#tpu.dimension_semantics<parallel>, #tpu.dimension_semantics<arbitrary>], iteration_bounds = array<i64: 2, 1>, scalar_prefetch = 0 : i64, scratch_operands = 2 : i64, tpu.core_type = #tpu.core_type<tc>, window_params = [{transform_indices = @transform_0, window_bounds = array<i64: 1, 64, 64>}, {transform_indices = @transform_1, window_bounds = array<i64: 1, 64, 128>}, {transform_indices = @transform_2, window_bounds = array<i64: 1, 64, 1>}, {pipeline_mode = #tpu.pipeline_mode<synchronous>, transform_indices = @transform_3, window_bounds = array<i64: 128, 128>}, {pipeline_mode = #tpu.pipeline_mode<synchronous>, transform_indices = @transform_4, window_bounds = array<i64: 1, 128>}, {pipeline_mode = #tpu.pipeline_mode<synchronous>, transform_indices = @transform_5, window_bounds = array<i64: 2, 128>}, {pipeline_mode = #tpu.pipeline_mode<synchronous>, transform_indices = @transform_6, window_bounds = array<i64: 1, 1>}, {transform_indices = @transform_7, window_bounds = array<i64: 1, 64, 128>}, {transform_indices = @transform_8, window_bounds = array<i64: 1, 1, 64>}]} {
    %c0_i32 = arith.constant 0 : i32
    %0 = arith.cmpi eq, %arg1, %c0_i32 : i32
    %1 = arith.extui %0 : i1 to i32
    %c0_i32_0 = arith.constant 0 : i32
    %2 = arith.cmpi ne, %1, %c0_i32_0 : i32
    scf.if %2 {
      %c0_26 = arith.constant 0 : index
      %c0_27 = arith.constant 0 : index
      %c0_28 = arith.constant 0 : index
      %41 = vector.load %arg3[%c0_26, %c0_27, %c0_28] : memref<1x64x128xf32, #tpu.memory_space<vmem>>, vector<1x64x128xf32>
      %42 = vector.shape_cast %41 : vector<1x64x128xf32> to vector<64x128xf32>
      %c0_29 = arith.constant 0 : index
      %c0_30 = arith.constant 0 : index
      %43 = vector.load %arg5[%c0_29, %c0_30] : memref<128x128xf32, #tpu.memory_space<vmem>>, vector<128x128xf32>
      %cst_31 = arith.constant dense<0.000000e+00> : vector<64x128xf32>
      %44 = tpu.matmul %42, %43, %cst_31 {dimension_numbers = #tpu.dot_dimension_numbers<[1], [0], [0], [1], [0, 0, 1, 1], [], []>} : vector<64x128xf32>, vector<128x128xf32>, vector<64x128xf32> -> vector<64x128xf32>
      %c0_32 = arith.constant 0 : index
      %c0_33 = arith.constant 0 : index
      %c0_34 = arith.constant 0 : index
      %45 = vector.load %arg4[%c0_32, %c0_33, %c0_34] : memref<1x64x1xf32, #tpu.memory_space<vmem>>, vector<1x64x1xf32>
      %46 = vector.shape_cast %45 : vector<1x64x1xf32> to vector<64x1xf32>
      %47 = vector.broadcast %46 : vector<64x1xf32> to vector<64x128xf32>
      %48 = arith.mulf %47, %44 : vector<64x128xf32>
      %49 = arith.truncf %48 : vector<64x128xf32> to vector<64x128xbf16>
      %c0_35 = arith.constant 0 : index
      %c0_36 = arith.constant 0 : index
      %50 = vector.load %arg11[%c0_35, %c0_36] : memref<64x128xbf16, #tpu.memory_space<vmem>>, vector<64x128xbf16>
      tpu.vector_store %arg11[%c0_35, %c0_36], %49 {strides = array<i32>} : memref<64x128xbf16, #tpu.memory_space<vmem>>, vector<64x128xbf16>,
      %cst_37 = arith.constant 0.000000e+00 : f32
      %51 = vector.broadcast %cst_37 : f32 to vector<1x1x64xf32>
      %c0_38 = arith.constant 0 : index
      %c0_39 = arith.constant 0 : index
      %c0_40 = arith.constant 0 : index
      %52 = vector.load %arg10[%c0_38, %c0_39, %c0_40] : memref<1x1x64xf32, #tpu.memory_space<vmem>>, vector<1x1x64xf32>
      tpu.vector_store %arg10[%c0_38, %c0_39, %c0_40], %51 {strides = array<i32>} : memref<1x1x64xf32, #tpu.memory_space<vmem>>, vector<1x1x64xf32>,
    } else {
    }
    %c0 = arith.constant 0 : index
    %c0_1 = arith.constant 0 : index
    %c0_2 = arith.constant 0 : index
    %3 = vector.load %arg2[%c0, %c0_1, %c0_2] : memref<1x64x64xbf16, #tpu.memory_space<vmem>>, vector<1x64x64xbf16>
    %4 = vector.shape_cast %3 : vector<1x64x64xbf16> to vector<64x64xbf16>
    %c64_i32 = arith.constant 64 : i32
    %5 = arith.muli %arg1, %c64_i32 : i32
    %6 = tpu.assume_multiple %5, 64 : i32
    %c0_3 = arith.constant 0 : index
    %7 = arith.index_cast %6 : i32 to index
    %c0_4 = arith.constant 0 : index
    %8 = vector.load %arg4[%c0_3, %7, %c0_4] : memref<1x64x1xf32, #tpu.memory_space<vmem>>, vector<1x64x1xf32>
    %9 = vector.shape_cast %8 : vector<1x64x1xf32> to vector<64x1xf32>
    %10 = arith.index_cast %6 : i32 to index
    %c0_5 = arith.constant 0 : index
    %11 = vector.load %arg11[%10, %c0_5] : memref<64x128xbf16, #tpu.memory_space<vmem>>, vector<64x128xbf16>
    %12 = arith.extf %11 : vector<64x128xbf16> to vector<64x128xf32>
    %c0_6 = arith.constant 0 : index
    %c0_7 = arith.constant 0 : index
    %13 = vector.load %arg11[%c0_6, %c0_7] : memref<64x128xbf16, #tpu.memory_space<vmem>>, vector<64x128xbf16>
    %cst = arith.constant dense<0.000000e+00> : vector<64x128xf32>
    %14 = tpu.matmul %4, %13, %cst {dimension_numbers = #tpu.dot_dimension_numbers<[1], [0], [0], [1], [0, 0, 1, 1], [], []>} : vector<64x64xbf16>, vector<64x128xbf16>, vector<64x128xf32> -> vector<64x128xf32>
    %15 = arith.addf %14, %12 : vector<64x128xf32>
    %16 = vector.broadcast %9 : vector<64x1xf32> to vector<64x128xf32>
    %17 = arith.mulf %16, %15 : vector<64x128xf32>
    %c0_8 = arith.constant 0 : index
    %c0_9 = arith.constant 0 : index
    %18 = vector.load %arg6[%c0_8, %c0_9] : memref<1x128xf32, #tpu.memory_space<vmem>>, vector<1x128xf32>
    %19 = vector.broadcast %18 : vector<1x128xf32> to vector<64x128xf32>
    %20 = arith.addf %17, %19 : vector<64x128xf32>
    %cst_10 = arith.constant 0.000000e+00 : f32
    %21 = vector.broadcast %cst_10 : f32 to vector<64x128xf32>
    %22 = arith.maximumf %20, %21 : vector<64x128xf32>
    %c0_11 = arith.constant 0 : index
    %c0_12 = arith.constant 0 : index
    %c0_13 = arith.constant 0 : index
    %23 = vector.load %arg9[%c0_11, %c0_12, %c0_13] : memref<1x64x128xf32, #tpu.memory_space<vmem>>, vector<1x64x128xf32>
    %24 = vector.shape_cast %23 : vector<1x64x128xf32> to vector<64x128xf32>
    %25 = vector.shape_cast %22 : vector<64x128xf32> to vector<1x64x128xf32>
    tpu.vector_store %arg9[%c0_11, %c0_12, %c0_13], %25 {strides = array<i32>} : memref<1x64x128xf32, #tpu.memory_space<vmem>>, vector<1x64x128xf32>,
    %26 = arith.index_cast %6 : i32 to index
    %c0_14 = arith.constant 0 : index
    %27 = vector.load %arg12[%26, %c0_14] : memref<64x128xf32, #tpu.memory_space<vmem>>, vector<64x128xf32>
    tpu.vector_store %arg12[%26, %c0_14], %22 {strides = array<i32>} : memref<64x128xf32, #tpu.memory_space<vmem>>, vector<64x128xf32>,
    %c1 = arith.constant 1 : index
    %c0_15 = arith.constant 0 : index
    %28 = vector.load %arg7[%c1, %c0_15] : memref<2x128xf32, #tpu.memory_space<vmem>>, vector<1x128xf32>
    %cst_16 = arith.constant dense<0.000000e+00> : vector<1x64xf32>
    %29 = tpu.matmul %28, %22, %cst_16 {dimension_numbers = #tpu.dot_dimension_numbers<[1], [1], [0], [0], [0, 0, 1, 0], [], []>} : vector<1x128xf32>, vector<64x128xf32>, vector<1x64xf32> -> vector<1x64xf32>
    %c0_17 = arith.constant 0 : index
    %c0_18 = arith.constant 0 : index
    %c0_19 = arith.constant 0 : index
    %30 = vector.load %arg10[%c0_17, %c0_18, %c0_19] : memref<1x1x64xf32, #tpu.memory_space<vmem>>, vector<1x1x64xf32>
    %31 = vector.shape_cast %30 : vector<1x1x64xf32> to vector<1x64xf32>
    %32 = arith.truncf %29 : vector<1x64xf32> to vector<1x64xbf16>
    %cst_20 = arith.constant dense<0.000000e+00> : vector<1x64xf32>
    %33 = tpu.matmul %32, %4, %cst_20 {dimension_numbers = #tpu.dot_dimension_numbers<[1], [0], [0], [1], [0, 0, 1, 1], [], []>} : vector<1x64xbf16>, vector<64x64xbf16>, vector<1x64xf32> -> vector<1x64xf32>
    %34 = arith.addf %31, %33 : vector<1x64xf32>
    %c0_21 = arith.constant 0 : index
    %c0_22 = arith.constant 0 : index
    %c0_23 = arith.constant 0 : index
    %35 = vector.load %arg10[%c0_21, %c0_22, %c0_23] : memref<1x1x64xf32, #tpu.memory_space<vmem>>, vector<1x1x64xf32>
    %36 = vector.shape_cast %35 : vector<1x1x64xf32> to vector<1x64xf32>
    %37 = vector.shape_cast %34 : vector<1x64xf32> to vector<1x1x64xf32>
    tpu.vector_store %arg10[%c0_21, %c0_22, %c0_23], %37 {strides = array<i32>} : memref<1x1x64xf32, #tpu.memory_space<vmem>>, vector<1x1x64xf32>,
    %c0_i32_24 = arith.constant 0 : i32
    %38 = arith.cmpi eq, %arg1, %c0_i32_24 : i32
    %39 = arith.extui %38 : i1 to i32
    %c0_i32_25 = arith.constant 0 : i32
    %40 = arith.cmpi ne, %39, %c0_i32_25 : i32
    scf.if %40 {
      %c0_26 = arith.constant 0 : index
      %c0_27 = arith.constant 0 : index
      %41 = vector.load %arg7[%c0_26, %c0_27] : memref<2x128xf32, #tpu.memory_space<vmem>>, vector<1x128xf32>
      %c0_28 = arith.constant 0 : index
      %c0_29 = arith.constant 0 : index
      %42 = vector.load %arg12[%c0_28, %c0_29] : memref<64x128xf32, #tpu.memory_space<vmem>>, vector<64x128xf32>
      %cst_30 = arith.constant dense<0.000000e+00> : vector<1x64xf32>
      %43 = tpu.matmul %41, %42, %cst_30 {dimension_numbers = #tpu.dot_dimension_numbers<[1], [1], [0], [0], [0, 0, 1, 0], [], []>} : vector<1x128xf32>, vector<64x128xf32>, vector<1x64xf32> -> vector<1x64xf32>
      %c0_31 = arith.constant 0 : index
      %c0_32 = arith.constant 0 : index
      %c0_33 = arith.constant 0 : index
      %44 = vector.load %arg10[%c0_31, %c0_32, %c0_33] : memref<1x1x64xf32, #tpu.memory_space<vmem>>, vector<1x1x64xf32>
      %45 = vector.shape_cast %44 : vector<1x1x64xf32> to vector<1x64xf32>
      %c0_34 = arith.constant 0 : index
      %c0_35 = arith.constant 0 : index
      %46 = vector.load %arg8[%c0_34, %c0_35] : memref<1x1xf32, #tpu.memory_space<vmem>>, vector<1x1xf32>
      %47 = vector.broadcast %46 : vector<1x1xf32> to vector<1x64xf32>
      %48 = arith.addf %43, %47 : vector<1x64xf32>
      %49 = arith.addf %45, %48 : vector<1x64xf32>
      %c0_36 = arith.constant 0 : index
      %c0_37 = arith.constant 0 : index
      %c0_38 = arith.constant 0 : index
      %50 = vector.load %arg10[%c0_36, %c0_37, %c0_38] : memref<1x1x64xf32, #tpu.memory_space<vmem>>, vector<1x1x64xf32>
      %51 = vector.shape_cast %50 : vector<1x1x64xf32> to vector<1x64xf32>
      %52 = vector.shape_cast %49 : vector<1x64xf32> to vector<1x1x64xf32>
      tpu.vector_store %arg10[%c0_36, %c0_37, %c0_38], %52 {strides = array<i32>} : memref<1x1x64xf32, #tpu.memory_space<vmem>>, vector<1x1x64xf32>,
    } else {
    }
    return
  }
  func.func @transform_0(%arg0: i32, %arg1: i32) -> (i32, i32, i32) {
    %c0_i32 = arith.constant 0 : i32
    %c0_i32_0 = arith.constant 0 : i32
    return %arg0, %arg1, %c0_i32 : i32, i32, i32
  }
  func.func @transform_1(%arg0: i32, %arg1: i32) -> (i32, i32, i32) {
    %c0_i32 = arith.constant 0 : i32
    %c0_i32_0 = arith.constant 0 : i32
    %c0_i32_1 = arith.constant 0 : i32
    return %arg0, %c0_i32, %c0_i32_0 : i32, i32, i32
  }
  func.func @transform_2(%arg0: i32, %arg1: i32) -> (i32, i32, i32) {
    %c0_i32 = arith.constant 0 : i32
    %c0_i32_0 = arith.constant 0 : i32
    %c0_i32_1 = arith.constant 0 : i32
    return %arg0, %c0_i32, %c0_i32_0 : i32, i32, i32
  }
  func.func @transform_3(%arg0: i32, %arg1: i32) -> (i32, i32) {
    %c0_i32 = arith.constant 0 : i32
    %c0_i32_0 = arith.constant 0 : i32
    %c0_i32_1 = arith.constant 0 : i32
    return %c0_i32, %c0_i32_0 : i32, i32
  }
  func.func @transform_4(%arg0: i32, %arg1: i32) -> (i32, i32) {
    %c0_i32 = arith.constant 0 : i32
    %c0_i32_0 = arith.constant 0 : i32
    %c0_i32_1 = arith.constant 0 : i32
    return %c0_i32, %c0_i32_0 : i32, i32
  }
  func.func @transform_5(%arg0: i32, %arg1: i32) -> (i32, i32) {
    %c0_i32 = arith.constant 0 : i32
    %c0_i32_0 = arith.constant 0 : i32
    %c0_i32_1 = arith.constant 0 : i32
    return %c0_i32, %c0_i32_0 : i32, i32
  }
  func.func @transform_6(%arg0: i32, %arg1: i32) -> (i32, i32) {
    %c0_i32 = arith.constant 0 : i32
    %c0_i32_0 = arith.constant 0 : i32
    %c0_i32_1 = arith.constant 0 : i32
    return %c0_i32, %c0_i32_0 : i32, i32
  }
  func.func @transform_7(%arg0: i32, %arg1: i32) -> (i32, i32, i32) {
    %c0_i32 = arith.constant 0 : i32
    %c0_i32_0 = arith.constant 0 : i32
    return %arg0, %arg1, %c0_i32 : i32, i32, i32
  }
  func.func @transform_8(%arg0: i32, %arg1: i32) -> (i32, i32, i32) {
    %c0_i32 = arith.constant 0 : i32
    %c0_i32_0 = arith.constant 0 : i32
    %c0_i32_1 = arith.constant 0 : i32
    return %arg0, %c0_i32, %c0_i32_0 : i32, i32, i32
  }
}

module attributes {stable_mosaic.version = 11 : i64} {
  func.func @_head_kernel(%arg0: memref<2x32x128xf32, #tpu.memory_space<vmem>>, %arg1: memref<32x64xf32, #tpu.memory_space<vmem>>, %arg2: memref<32x64xf32, #tpu.memory_space<vmem>>, %arg3: memref<1x1xf32, #tpu.memory_space<vmem>>, %arg4: memref<64x32xf32, #tpu.memory_space<vmem>>, %arg5: memref<1x32xf32, #tpu.memory_space<vmem>>, %arg6: memref<32x16xf32, #tpu.memory_space<vmem>>, %arg7: memref<1x16xf32, #tpu.memory_space<vmem>>, %arg8: memref<16x12xf32, #tpu.memory_space<vmem>>, %arg9: memref<1x12xf32, #tpu.memory_space<vmem>>, %arg10: memref<2x12xf32, #tpu.memory_space<vmem>>) attributes {dimension_semantics = [], scalar_prefetch = 0 : i64, scratch_operands = 0 : i64, tpu.core_type = #tpu.core_type<tc>} {
    %c0 = arith.constant 0 : index
    %c0_0 = arith.constant 0 : index
    %c0_1 = arith.constant 0 : index
    %0 = vector.load %arg0[%c0, %c0_0, %c0_1] : memref<2x32x128xf32, #tpu.memory_space<vmem>>, vector<2x32x128xf32>
    %cst = arith.constant dense<0xFF800000> : vector<2x32xf32>
    %1 = vector.multi_reduction <maximumf>, %0, %cst [2] : vector<2x32x128xf32> to vector<2x32xf32>
    %cst_2 = arith.constant dense<0.000000e+00> : vector<2x32xf32>
    %2 = vector.multi_reduction <add>, %0, %cst_2 [2] : vector<2x32x128xf32> to vector<2x32xf32>
    %cst_3 = arith.constant 1.280000e+02 : f32
    %3 = vector.broadcast %cst_3 : f32 to vector<2x32xf32>
    %4 = arith.divf %2, %3 : vector<2x32xf32>
    %c0_4 = arith.constant 0 : index
    %c0_5 = arith.constant 0 : index
    %5 = vector.load %arg1[%c0_4, %c0_5] : memref<32x64xf32, #tpu.memory_space<vmem>>, vector<32x64xf32>
    %cst_6 = arith.constant dense<0.000000e+00> : vector<2x64xf32>
    %6 = tpu.matmul %4, %5, %cst_6 {dimension_numbers = #tpu.dot_dimension_numbers<[1], [0], [0], [1], [0, 0, 1, 1], [], []>} : vector<2x32xf32>, vector<32x64xf32>, vector<2x64xf32> -> vector<2x64xf32>
    %c0_7 = arith.constant 0 : index
    %c0_8 = arith.constant 0 : index
    %7 = vector.load %arg2[%c0_7, %c0_8] : memref<32x64xf32, #tpu.memory_space<vmem>>, vector<32x64xf32>
    %cst_9 = arith.constant dense<0.000000e+00> : vector<2x64xf32>
    %8 = tpu.matmul %1, %7, %cst_9 {dimension_numbers = #tpu.dot_dimension_numbers<[1], [0], [0], [1], [0, 0, 1, 1], [], []>} : vector<2x32xf32>, vector<32x64xf32>, vector<2x64xf32> -> vector<2x64xf32>
    %9 = arith.addf %6, %8 : vector<2x64xf32>
    %c0_10 = arith.constant 0 : index
    %c0_11 = arith.constant 0 : index
    %10 = vector.load %arg3[%c0_10, %c0_11] : memref<1x1xf32, #tpu.memory_space<vmem>>, vector<1x1xf32>
    %11 = vector.broadcast %10 : vector<1x1xf32> to vector<2x64xf32>
    %12 = arith.addf %9, %11 : vector<2x64xf32>
    %c0_12 = arith.constant 0 : index
    %c0_13 = arith.constant 0 : index
    %13 = vector.load %arg4[%c0_12, %c0_13] : memref<64x32xf32, #tpu.memory_space<vmem>>, vector<64x32xf32>
    %cst_14 = arith.constant dense<0.000000e+00> : vector<2x32xf32>
    %14 = tpu.matmul %12, %13, %cst_14 {dimension_numbers = #tpu.dot_dimension_numbers<[1], [0], [0], [1], [0, 0, 1, 1], [], []>} : vector<2x64xf32>, vector<64x32xf32>, vector<2x32xf32> -> vector<2x32xf32>
    %c0_15 = arith.constant 0 : index
    %c0_16 = arith.constant 0 : index
    %15 = vector.load %arg5[%c0_15, %c0_16] : memref<1x32xf32, #tpu.memory_space<vmem>>, vector<1x32xf32>
    %16 = vector.broadcast %15 : vector<1x32xf32> to vector<2x32xf32>
    %17 = arith.addf %14, %16 : vector<2x32xf32>
    %cst_17 = arith.constant 0.000000e+00 : f32
    %18 = vector.broadcast %cst_17 : f32 to vector<2x32xf32>
    %19 = arith.maximumf %17, %18 : vector<2x32xf32>
    %c0_18 = arith.constant 0 : index
    %c0_19 = arith.constant 0 : index
    %20 = vector.load %arg6[%c0_18, %c0_19] : memref<32x16xf32, #tpu.memory_space<vmem>>, vector<32x16xf32>
    %cst_20 = arith.constant dense<0.000000e+00> : vector<2x16xf32>
    %21 = tpu.matmul %19, %20, %cst_20 {dimension_numbers = #tpu.dot_dimension_numbers<[1], [0], [0], [1], [0, 0, 1, 1], [], []>} : vector<2x32xf32>, vector<32x16xf32>, vector<2x16xf32> -> vector<2x16xf32>
    %c0_21 = arith.constant 0 : index
    %c0_22 = arith.constant 0 : index
    %22 = vector.load %arg7[%c0_21, %c0_22] : memref<1x16xf32, #tpu.memory_space<vmem>>, vector<1x16xf32>
    %23 = vector.broadcast %22 : vector<1x16xf32> to vector<2x16xf32>
    %24 = arith.addf %21, %23 : vector<2x16xf32>
    %cst_23 = arith.constant 0.000000e+00 : f32
    %25 = vector.broadcast %cst_23 : f32 to vector<2x16xf32>
    %26 = arith.maximumf %24, %25 : vector<2x16xf32>
    %c0_24 = arith.constant 0 : index
    %c0_25 = arith.constant 0 : index
    %27 = vector.load %arg8[%c0_24, %c0_25] : memref<16x12xf32, #tpu.memory_space<vmem>>, vector<16x12xf32>
    %cst_26 = arith.constant dense<0.000000e+00> : vector<2x12xf32>
    %28 = tpu.matmul %26, %27, %cst_26 {dimension_numbers = #tpu.dot_dimension_numbers<[1], [0], [0], [1], [0, 0, 1, 1], [], []>} : vector<2x16xf32>, vector<16x12xf32>, vector<2x12xf32> -> vector<2x12xf32>
    %c0_27 = arith.constant 0 : index
    %c0_28 = arith.constant 0 : index
    %29 = vector.load %arg9[%c0_27, %c0_28] : memref<1x12xf32, #tpu.memory_space<vmem>>, vector<1x12xf32>
    %30 = vector.broadcast %29 : vector<1x12xf32> to vector<2x12xf32>
    %31 = arith.addf %28, %30 : vector<2x12xf32>
    %cst_29 = arith.constant dense<0xFF800000> : vector<2xf32>
    %32 = vector.multi_reduction <maximumf>, %31, %cst_29 [1] : vector<2x12xf32> to vector<2xf32>
    %33 = vector.shape_cast %32 : vector<2xf32> to vector<2x1xf32>
    %34 = vector.broadcast %33 : vector<2x1xf32> to vector<2x12xf32>
    %35 = arith.subf %31, %34 : vector<2x12xf32>
    %36 = math.exp %35 : vector<2x12xf32>
    %cst_30 = arith.constant dense<0.000000e+00> : vector<2xf32>
    %37 = vector.multi_reduction <add>, %36, %cst_30 [1] : vector<2x12xf32> to vector<2xf32>
    %38 = vector.shape_cast %37 : vector<2xf32> to vector<2x1xf32>
    %39 = math.log %38 : vector<2x1xf32>
    %40 = vector.broadcast %39 : vector<2x1xf32> to vector<2x12xf32>
    %41 = arith.subf %35, %40 : vector<2x12xf32>
    %c0_31 = arith.constant 0 : index
    %c0_32 = arith.constant 0 : index
    %42 = vector.load %arg10[%c0_31, %c0_32] : memref<2x12xf32, #tpu.memory_space<vmem>>, vector<2x12xf32>
    tpu.vector_store %arg10[%c0_31, %c0_32], %41 {strides = array<i32>} : memref<2x12xf32, #tpu.memory_space<vmem>>, vector<2x12xf32>,
    return
  }
}

</mosaic_0001>

<bundles_post_ra>
// kernel: _lambda_.4
= control target key start
LH: loop header
LB: loop body
LE: loop exit
PB: predicated region body
PF: predicated region fallthrough
CT: control target
= control target key end

     0   :  { %s2391_s29 = smov 0   ;;  %s2393_s30 = smov 0   ;;  %s2772_s0 = inlined_call_operand.vmem [shape: bf16[2,256,256], index: 0, kind: input, shape index: {}]   ;;  %s2773_s1 = inlined_call_operand.vmem [shape: f32[2,256,128], index: 1, kind: input, shape index: {}]   ;;  %s2774_s2 = inlined_call_operand.vmem [shape: f32[2,256,1], index: 2, kind: input, shape index: {}]   ;;  %s2775_s3 = inlined_call_operand.vmem [shape: f32[128,128], index: 3, kind: input, shape index: {}]   ;;  %s2776_s4 = inlined_call_operand.vmem [shape: f32[1,128], index: 4, kind: input, shape index: {}]   ;;  %s2777_s5 = inlined_call_operand.vmem [shape: f32[2,128], index: 5, kind: input, shape index: {}]   ;;  %s2778_s6 = inlined_call_operand.<no memory space> [shape: f32[1,1], index: 6, kind: input, shape index: {}]   ;;  %s2779_s7 = inlined_call_operand.vmem [shape: f32[2,256,128], index: 7, kind: output, shape index: {0}]   ;;  %s2780_s8 = inlined_call_operand.vmem [shape: f32[2,1,256], index: 8, kind: output, shape index: {1}]  }
   0x1   :  { %v14_v0 = vstv %s2778_s6  ;;  %s2395_s9 = smov 0   ;;  %s2397_s10 = smov 0  }
   0x2   :  { %15 = vst [vmem:[#allocation4] sm:$0x1] %v14_v0  ;;  %s2399_s11 = smov 0  }
   0x3 LB: > { %2783 = sst [smem:[#allocation5_spill]] %s2325_s9  ;;  %s30_s6 = sadd.s32 1, %s2325_s9  ;;  %s2333_s11 = sphi %s2399_s11, %s21_s11   ;;  %s2329_s10 = sphi %s2397_s10, %s2792_s10   ;;  %s2325_s9 = sphi %s2395_s9, %s2791_s9   ;;  %s2321_s30 = sphi %s2393_s30, %s2790_s30   ;;  %s2317_s29 = sphi %s2391_s29, %s2789_s29  }
   0x4   : > { %2784 = sst [smem:[#allocation6_spill]] %s2329_s10  ;;  %s33_s12 = sadd.s32 1, %s2329_s10 }
   0x5   : > { %p31_p0 = scmp.ge.s32.totalorder %s30_s6, 2  ;;  %p1798_p1 = scmp.ge.s32.totalorder %s2333_s11, 1 }
   0x6   : > { %p309_p2 = scmp.lt.s32.totalorder %s2333_s11, 5 }
   0x7   : > { %s2794_s6 = smov (%p31_p0, %s30_s6), 0  ;;  %s2796_s12 = smov (!%p31_p0, %s33_s12), %s2329_s10 }
   0x8   : > { %2785 = sst [smem:[#allocation7_spill]] %s2794_s6  ;;  %p310_p3 = pnand %p1798_p1, %p309_p2 }
   0x9   : > { %p35_p4 = scmp.ge.s32.totalorder %s2796_s12, 2  ;;  %s1799_s13 = sshll.u32 (!%p310_p3), %s2317_s29, 4 }
   0xa   : > { %313 = sbr.rel (%p310_p3) target bundleno = 1272 (0x4f8), region = 48  ;;  %p367_p5 = scmp.lt.s32.totalorder (!%p310_p3), %s2321_s30, 1 }
   0xb   : > { %s2798_s12 = smov (%p35_p4, %s2796_s12), 0  ;;  %p369_p6 = scmp.lt.s32.totalorder (!%p310_p3), %s1799_s13, 31 }
   0xc   : > { %2786 = sst [smem:[#allocation8_spill]] %s2798_s12  ;;  %p1811_p7 = scmp.ne.s32.totalorder (!%p310_p3), %s2317_s29, 0 }
  0x11   : > { %s2800_s30 = smov (!%p367_p5, %s2321_s30), 1  ;;  %s2802_s13 = smov (!%p369_p6, %s1799_s13), 31 }
  0x12   : > { %s1801_s14 = sshll.u32 %s2800_s30, 6  ;;  %s1834_s15 = sshll.u32 %s2800_s30, 8  ;;  %v438_v1 = vld [vmem:[%s2775_s3] sm:$0xff] (!%p1811_p7)  ;;  %v439_v2 = vld [vmem:[%s2775_s3 + $0x8] sm:$0xff] (!%p1811_p7)  ;;  %v440_v3 = vld [vmem:[%s2775_s3 + $0x10] sm:$0xff] (!%p1811_p7)  ;;  %v2335_v6 = vmov (!%p1811_p7), 0  }
  0x13   : > { %s1800_s16 = sshll.u32 %s2802_s13, 1  ;;  %s2427_s19 = scalar_lea.vmem %s2773_s1, %s1834_s15  ;;  %v2114_v4 = vpack.c.bf16 (!%p1811_p7), %v439_v2, %v438_v1  ;;  %v441_v5 = vld [vmem:[%s2775_s3 + $0x18] sm:$0xff] (!%p1811_p7)  ;;  %2267 = vset.pattern.permute.xlu1 (!%p1811_p7), %v2335_v6  ;;  %2266 = vset.pattern.permute.xlu0 (!%p1811_p7), %v2335_v6  ;;  %v442_v8 = vld [vmem:[%s2775_s3 + $0x20] sm:$0xff] (!%p1811_p7)  ;;  %v443_v9 = vld [vmem:[%s2775_s3 + $0x28] sm:$0xff] (!%p1811_p7) }
  0x14   : > { %s373_s20 = sadd.s32 %s1801_s14, %s1800_s16  ;;  %s2432_s23 = scalar_lea.vmem %s2774_s2, %s1834_s15  ;;  %v2118_v7 = vpack.c.bf16 (!%p1811_p7), %v441_v5, %v440_v3  ;;  %v2122_v11 = vpack.c.bf16 (!%p1811_p7), %v443_v9, %v442_v8  ;;  %v444_v13 = vld [vmem:[%s2775_s3 + $0x30] sm:$0xff] (!%p1811_p7)  ;;  %v445_v14 = vld [vmem:[%s2775_s3 + $0x38] sm:$0xff] (!%p1811_p7)  ;;  %v406_v15 = vld [vmem:[%s2427_s19] sm:$0xff] (!%p1811_p7) }
  0x15   : > { %s1802_s24 = sshll.u32 %s373_s20, 2  ;;  %s1808_s25 = sshll.u32 %s2800_s30, 5  ;;  %2115 = vmatprep.subr.bf16.mxu0 (!%p1811_p7), %v2114_v4  ;;  %2202 = vmatprep.subr.bf16.mxu1 (!%p1811_p7), %v2114_v4  ;;  %v681_v10 = vld [vmem:[%s2432_s23 + $0x10] sm:$0xff] (!%p1811_p7)  ;;  %v679_v12 = vld [vmem:[%s2432_s23] sm:$0xff] (!%p1811_p7)  ;;  %v682_v16 = vld [vmem:[%s2432_s23 + $0x18] sm:$0xff] (!%p1811_p7)  ;;  %v2126_v19 = vpack.c.bf16 (!%p1811_p7), %v445_v14, %v444_v13 }
  0x16   : > { %s2437_s28 = scalar_lea.vmem %s2772_s0, %s1802_s24  ;;  %s393_s12 = sadd.s32 %s1808_s25, %s2802_s13  ;;  %2117 = vmatpush3.bf16.msra.mxu0 (!%p1811_p7), %v2114_v4  ;;  %2210 = vmatpush3.bf16.msra.mxu1 (!%p1811_p7), %v2114_v4  ;;  %v680_v17 = vld [vmem:[%s2432_s23 + $0x8] sm:$0xff] (!%p1811_p7)  ;;  %v422_v18 = vld [vmem:[%s2427_s19 + $0x80] sm:$0xff] (!%p1811_p7)  ;;  %v448_v25 = vld [vmem:[%s2775_s3 + $0x50] sm:$0xff] (!%p1811_p7) }
  0x17   : > { %s1809_s6 = sshll.u32 %s393_s12, 3  ;;  %s1810_s10 = sshll.u32 %s2800_s30, 1  ;;  %2119 = vmatprep.subr.bf16.mxu0 (!%p1811_p7), %v2118_v7  ;;  %2203 = vmatprep.subr.bf16.mxu1 (!%p1811_p7), %v2118_v7  ;;  %v446_v20 = vld [vmem:[%s2775_s3 + $0x40] sm:$0xff] (!%p1811_p7)  ;;  %v447_v21 = vld [vmem:[%s2775_s3 + $0x48] sm:$0xff] (!%p1811_p7)  ;;  %v449_v26 = vld [vmem:[%s2775_s3 + $0x58] sm:$0xff] (!%p1811_p7) }
  0x18   : > { %s2442_s18 = scalar_lea.vmem %s2779_s7, %s1809_s6  ;;  %s2447_s15 = scalar_lea.vmem %s2780_s8, %s1810_s10  ;;  %723 = vperm.xlu1 (!%p1811_p7), %2267, %v681_v10   ;;  %713 = vperm.xlu0 (!%p1811_p7), %2266, %v679_v12   ;;  %v684_v22 = vld [vmem:[%s2432_s23 + $0x28] sm:$0xff] (!%p1811_p7)  ;;  %v683_v23 = vld [vmem:[%s2432_s23 + $0x20] sm:$0xff] (!%p1811_p7)  ;;  %v2130_v24 = vpack.c.bf16 (!%p1811_p7), %v447_v21, %v446_v20  ;;  %v686_v27 = vld [vmem:[%s2432_s23 + $0x38] sm:$0xff] (!%p1811_p7)  ;;  %v2134_v29 = vpack.c.bf16 (!%p1811_p7), %v449_v26, %v448_v25  ;;  %v935_v26 = vlaneseq (!%p1811_p7) }
  0x19   : > { %405 = sbr.rel (%p1811_p7) target bundleno = 299 (0x12b), region = 52  ;;  %2031 = vmatprep.mubr.f32.mxu0 (!%p1811_p7), %v406_v15  ;;  %2055 = vmatprep.mubr.f32.mxu1 (!%p1811_p7), %v422_v18  ;;  %v685_v28 = vld [vmem:[%s2432_s23 + $0x30] sm:$0xff] (!%p1811_p7)  ;;  %v450_v30 = vld [vmem:[%s2775_s3 + $0x60] sm:$0xff] (!%p1811_p7)  ;;  %v451_v31 = vld [vmem:[%s2775_s3 + $0x68] sm:$0xff] (!%p1811_p7) }
  0x1a   : > { %2121 = vmatpush3.bf16.msra.mxu0 (!%p1811_p7), %v2118_v7  ;;  %2211 = vmatpush3.bf16.msra.mxu1 (!%p1811_p7), %v2118_v7  ;;  %v688_v32 = vld [vmem:[%s2432_s23 + $0x48] sm:$0xff] (!%p1811_p7)  ;;  %v687_v33 = vld [vmem:[%s2432_s23 + $0x40] sm:$0xff] (!%p1811_p7)  ;;  %v2138_v34 = vpack.c.bf16 (!%p1811_p7), %v451_v31, %v450_v30  ;;  %v452_v35 = vld [vmem:[%s2775_s3 + $0x70] sm:$0xff] (!%p1811_p7)  ;;  %vm937_vm0 = vcmp.lt.s32.totalorder (!%p1811_p7), %v935_v26, 256 }
  0x1b   : > { %2123 = vmatprep.subr.bf16.mxu0 (!%p1811_p7), %v2122_v11  ;;  %2204 = vmatprep.subr.bf16.mxu1 (!%p1811_p7), %v2122_v11  ;;  %v453_v36 = vld [vmem:[%s2775_s3 + $0x78] sm:$0xff] (!%p1811_p7)  ;;  %v689_v38 = vld [vmem:[%s2432_s23 + $0x50] sm:$0xff] (!%p1811_p7)  ;;  %v692_v40 = vld [vmem:[%s2432_s23 + $0x68] sm:$0xff] (!%p1811_p7) }
  0x1c   : > { %728 = vperm.xlu1 (!%p1811_p7), %2267, %v682_v16   ;;  %718 = vperm.xlu0 (!%p1811_p7), %2266, %v680_v17   ;;  %v690_v37 = vld [vmem:[%s2432_s23 + $0x58] sm:$0xff] (!%p1811_p7)  ;;  %v2142_v39 = vpack.c.bf16 (!%p1811_p7), %v453_v36, %v452_v35  ;;  %v691_v41 = vld [vmem:[%s2432_s23 + $0x60] sm:$0xff] (!%p1811_p7)  ;;  %v693_v43 = vld [vmem:[%s2432_s23 + $0x70] sm:$0xff] (!%p1811_p7) }
  0x1d   : > { %v694_v42 = vld [vmem:[%s2432_s23 + $0x78] sm:$0xff] (!%p1811_p7)  ;;  %v407_v44 = vld [vmem:[%s2427_s19 + $0x8] sm:$0xff] (!%p1811_p7)  ;;  %v408_v46 = vld [vmem:[%s2427_s19 + $0x10] sm:$0xff] (!%p1811_p7) }
  0x1e   : > { %2125 = vmatpush3.bf16.msra.mxu0 (!%p1811_p7), %v2122_v11  ;;  %2212 = vmatpush3.bf16.msra.mxu1 (!%p1811_p7), %v2122_v11  ;;  %v423_v45 = vld [vmem:[%s2427_s19 + $0x88] sm:$0xff] (!%p1811_p7)  ;;  %v424_v47 = vld [vmem:[%s2427_s19 + $0x90] sm:$0xff] (!%p1811_p7)  ;;  %v695_v49 = vld [vmem:[%s2432_s23 + $0x80] sm:$0xff] (!%p1811_p7) }
  0x1f   : > { %2127 = vmatprep.subr.bf16.mxu0 (!%p1811_p7), %v2126_v19  ;;  %2205 = vmatprep.subr.bf16.mxu1 (!%p1811_p7), %v2126_v19  ;;  %v696_v48 = vld [vmem:[%s2432_s23 + $0x88] sm:$0xff] (!%p1811_p7)  ;;  %v409_v50 = vld [vmem:[%s2427_s19 + $0x18] sm:$0xff] (!%p1811_p7)  ;;  %v410_v52 = vld [vmem:[%s2427_s19 + $0x20] sm:$0xff] (!%p1811_p7) }
  0x20   : > { %738 = vperm.xlu1 %2267, %v684_v22   ;;  %733 = vperm.xlu0 %2266, %v683_v23   ;;  %v425_v51 = vld [vmem:[%s2427_s19 + $0x98] sm:$0xff]  ;;  %v426_v53 = vld [vmem:[%s2427_s19 + $0xa0] sm:$0xff]  ;;  %v697_v55 = vld [vmem:[%s2432_s23 + $0x90] sm:$0xff] }
  0x21   : > { %v698_v54 = vld [vmem:[%s2432_s23 + $0x98] sm:$0xff]  ;;  %v411_v56 = vld [vmem:[%s2427_s19 + $0x28] sm:$0xff]  ;;  %v412_v58 = vld [vmem:[%s2427_s19 + $0x30] sm:$0xff] }
  0x22   : > { %2129 = vmatpush3.bf16.msra.mxu0 %v2126_v19  ;;  %2213 = vmatpush3.bf16.msra.mxu1 %v2126_v19  ;;  %v427_v57 = vld [vmem:[%s2427_s19 + $0xa8] sm:$0xff]  ;;  %v428_v59 = vld [vmem:[%s2427_s19 + $0xb0] sm:$0xff]  ;;  %v699_v61 = vld [vmem:[%s2432_s23 + $0xa0] sm:$0xff] }
  0x23   : > { %2131 = vmatprep.subr.bf16.mxu0 %v2130_v24  ;;  %2206 = vmatprep.subr.bf16.mxu1 %v2130_v24  ;;  %v700_v60 = vld [vmem:[%s2432_s23 + $0xa8] sm:$0xff]  ;;  %v413_v62 = vld [vmem:[%s2427_s19 + $0x38] sm:$0xff]  ;;  %v414_v0 = vld [vmem:[%s2427_s19 + $0x40] sm:$0xff] }
  0x24   : > { %748 = vperm.xlu1 %2267, %v686_v27   ;;  %743 = vperm.xlu0 %2266, %v685_v28   ;;  %v429_v63 = vld [vmem:[%s2427_s19 + $0xb8] sm:$0xff]  ;;  %v430_v1 = vld [vmem:[%s2427_s19 + $0xc0] sm:$0xff]  ;;  %v701_v3 = vld [vmem:[%s2432_s23 + $0xb0] sm:$0xff]  ;;  %v2336_v27 = vmov 0.0  }
  0x25   : > { %v702_v2 = vld [vmem:[%s2432_s23 + $0xb8] sm:$0xff]  ;;  %v415_v4 = vld [vmem:[%s2427_s19 + $0x48] sm:$0xff]  ;;  %v416_v6 = vld [vmem:[%s2427_s19 + $0x50] sm:$0xff]  ;;  %939 = vst.msk [vmem:[%s2447_s15] sm:$0x3] %vm937_vm0, %v2336_v27 }
  0x26   : > { %2133 = vmatpush3.bf16.msra.mxu0 %v2130_v24  ;;  %2214 = vmatpush3.bf16.msra.mxu1 %v2130_v24  ;;  %v431_v5 = vld [vmem:[%s2427_s19 + $0xc8] sm:$0xff]  ;;  %v432_v7 = vld [vmem:[%s2427_s19 + $0xd0] sm:$0xff]  ;;  %v703_v9 = vld [vmem:[%s2432_s23 + $0xc0] sm:$0xff] }
  0x27   : > { %2135 = vmatprep.subr.bf16.mxu0 %v2134_v29  ;;  %2207 = vmatprep.subr.bf16.mxu1 %v2134_v29  ;;  %v704_v8 = vld [vmem:[%s2432_s23 + $0xc8] sm:$0xff]  ;;  %v417_v10 = vld [vmem:[%s2427_s19 + $0x58] sm:$0xff]  ;;  %v418_v12 = vld [vmem:[%s2427_s19 + $0x60] sm:$0xff] }
  0x28   : > { %758 = vperm.xlu1 %2267, %v688_v32   ;;  %753 = vperm.xlu0 %2266, %v687_v33   ;;  %v433_v11 = vld [vmem:[%s2427_s19 + $0xd8] sm:$0xff]  ;;  %v434_v13 = vld [vmem:[%s2427_s19 + $0xe0] sm:$0xff]  ;;  %v705_v15 = vld [vmem:[%s2432_s23 + $0xd0] sm:$0xff] }
  0x29   : > { %v706_v14 = vld [vmem:[%s2432_s23 + $0xd8] sm:$0xff]  ;;  %v419_v16 = vld [vmem:[%s2427_s19 + $0x68] sm:$0xff]  ;;  %v420_v18 = vld [vmem:[%s2427_s19 + $0x70] sm:$0xff] }
  0x2a   : > { %2137 = vmatpush3.bf16.msra.mxu0 %v2134_v29  ;;  %2215 = vmatpush3.bf16.msra.mxu1 %v2134_v29  ;;  %v435_v17 = vld [vmem:[%s2427_s19 + $0xe8] sm:$0xff]  ;;  %v436_v19 = vld [vmem:[%s2427_s19 + $0xf0] sm:$0xff]  ;;  %v707_v21 = vld [vmem:[%s2432_s23 + $0xe0] sm:$0xff] }
  0x2b   : > { %2139 = vmatprep.subr.bf16.mxu0 %v2138_v34  ;;  %2208 = vmatprep.subr.bf16.mxu1 %v2138_v34  ;;  %v708_v20 = vld [vmem:[%s2432_s23 + $0xe8] sm:$0xff]  ;;  %v421_v22 = vld [vmem:[%s2427_s19 + $0x78] sm:$0xff]  ;;  %v709_v25 = vld [vmem:[%s2432_s23 + $0xf0] sm:$0xff] }
  0x2c   : > { %768 = vperm.xlu1 %2267, %v690_v37   ;;  %763 = vperm.xlu0 %2266, %v689_v38   ;;  %v437_v23 = vld [vmem:[%s2427_s19 + $0xf8] sm:$0xff] }
  0x2d   : > { %v710_v24 = vld [vmem:[%s2432_s23 + $0xf8] sm:$0xff] }
  0x2e   : > { %2141 = vmatpush3.bf16.msra.mxu0 %v2138_v34  ;;  %2216 = vmatpush3.bf16.msra.mxu1 %v2138_v34 }
  0x2f   : > { %2143 = vmatprep.subr.bf16.mxu0 %v2142_v39  ;;  %2209 = vmatprep.subr.bf16.mxu1 %v2142_v39 }
  0x30   : > { %778 = vperm.xlu1 %2267, %v692_v40   ;;  %773 = vperm.xlu0 %2266, %v691_v41  }
  0x32   : > { %2145 = vmatpush3.bf16.msra.mxu0 %v2142_v39  ;;  %2217 = vmatpush3.bf16.msra.mxu1 %v2142_v39 }
  0x34   : > { %788 = vperm.xlu1 %2267, %v694_v42   ;;  %783 = vperm.xlu0 %2266, %v693_v43  }
  0x35   : > { %2032 = vmatmul.mubr.f32.vlgmr.msra.gmra.mrb[0].mxu0 %v407_v44  ;;  %2056 = vmatmul.mubr.f32.vlgmr.msra.gmra.mrb[0].mxu1 %v423_v45 }
  0x36   : > { %2034 = vmatprep.mubr.f32.mxu0 %v408_v46  ;;  %2058 = vmatprep.mubr.f32.mxu1 %v424_v47 }
  0x38   : > { %798 = vperm.xlu1 %2267, %v696_v48   ;;  %793 = vperm.xlu0 %2266, %v695_v49  }
  0x39   : > { %2035 = vmatmul.mubr.f32.gmra.mrb[2].mxu0 %v409_v50  ;;  %2059 = vmatmul.mubr.f32.gmra.mrb[2].mxu1 %v425_v51 }
  0x3a   : > { %2037 = vmatprep.mubr.f32.mxu0 %v410_v52  ;;  %2061 = vmatprep.mubr.f32.mxu1 %v426_v53 }
  0x3c   : > { %808 = vperm.xlu1 %2267, %v698_v54   ;;  %803 = vperm.xlu0 %2266, %v697_v55  }
  0x3d   : > { %2038 = vmatmul.mubr.f32.gmra.mrb[4].mxu0 %v411_v56  ;;  %2062 = vmatmul.mubr.f32.gmra.mrb[4].mxu1 %v427_v57 }
  0x3e   : > { %2040 = vmatprep.mubr.f32.mxu0 %v412_v58  ;;  %2064 = vmatprep.mubr.f32.mxu1 %v428_v59 }
  0x40   : > { %818 = vperm.xlu1 %2267, %v700_v60   ;;  %813 = vperm.xlu0 %2266, %v699_v61  }
  0x41   : > { %2041 = vmatmul.mubr.f32.gmra.mrb[6].mxu0 %v413_v62  ;;  %2065 = vmatmul.mubr.f32.gmra.mrb[6].mxu1 %v429_v63 }
  0x42   : > { %2043 = vmatprep.mubr.f32.mxu0 %v414_v0  ;;  %2067 = vmatprep.mubr.f32.mxu1 %v430_v1 }
  0x44   : > { %828 = vperm.xlu1 %2267, %v702_v2   ;;  %823 = vperm.xlu0 %2266, %v701_v3  }
  0x45   : > { %2044 = vmatmul.mubr.f32.gmra.mrb[8].mxu0 %v415_v4  ;;  %2068 = vmatmul.mubr.f32.gmra.mrb[8].mxu1 %v431_v5 }
  0x46   : > { %2046 = vmatprep.mubr.f32.mxu0 %v416_v6  ;;  %2070 = vmatprep.mubr.f32.mxu1 %v432_v7 }
  0x48   : > { %838 = vperm.xlu1 %2267, %v704_v8   ;;  %833 = vperm.xlu0 %2266, %v703_v9  }
  0x49   : > { %2047 = vmatmul.mubr.f32.gmra.mrb[10].mxu0 %v417_v10  ;;  %2071 = vmatmul.mubr.f32.gmra.mrb[10].mxu1 %v433_v11 }
  0x4a   : > { %2049 = vmatprep.mubr.f32.mxu0 %v418_v12  ;;  %2073 = vmatprep.mubr.f32.mxu1 %v434_v13 }
  0x4c   : > { %848 = vperm.xlu1 %2267, %v706_v14   ;;  %843 = vperm.xlu0 %2266, %v705_v15  }
  0x4d   : > { %2050 = vmatmul.mubr.f32.gmra.mrb[12].mxu0 %v419_v16  ;;  %2074 = vmatmul.mubr.f32.gmra.mrb[12].mxu1 %v435_v17 }
  0x4e   : > { %2052 = vmatprep.mubr.f32.mxu0 %v420_v18  ;;  %2076 = vmatprep.mubr.f32.mxu1 %v436_v19 }
  0x50   : > { %858 = vperm.xlu1 %2267, %v708_v20   ;;  %853 = vperm.xlu0 %2266, %v707_v21  }
  0x51   : > { %2053 = vmatmul.mubr.f32.gmra.mrb[14].mxu0 %v421_v22  ;;  %2077 = vmatmul.mubr.f32.gmra.mrb[14].mxu1 %v437_v23 }
  0x54   : > { %868 = vperm.xlu1 %2267, %v710_v24   ;;  %863 = vperm.xlu0 %2266, %v709_v25  }
  0x97   : > { %v724_v28 = vpop.permute.xlu1 %723  ;;  %v714_v29 = vpop.permute.xlu0 %713 }
  0x9b   : > { %v729_v30 = vpop.permute.xlu1 %728  ;;  %v719_v31 = vpop.permute.xlu0 %718 }
  0x9f   : > { %v739_v32 = vpop.permute.xlu1 %738  ;;  %v734_v33 = vpop.permute.xlu0 %733 }
  0xa3   : > { %v749_v34 = vpop.permute.xlu1 %748  ;;  %v2563_v35 = vpop.permute.xlu0 %743 }
  0xa7   : > { %v2565_v36 = vpop.permute.xlu1 %758  ;;  %v2567_v37 = vpop.permute.xlu0 %753 }
  0xab   : > { %v2569_v38 = vpop.permute.xlu1 %768  ;;  %v2571_v39 = vpop.permute.xlu0 %763 }
  0xaf   : > { %v2573_v40 = vpop.permute.xlu1 %778  ;;  %v2575_v41 = vpop.permute.xlu0 %773 }
  0xb3   : > { %v2577_v42 = vpop.permute.xlu1 %788  ;;  %v2579_v43 = vpop.permute.xlu0 %783 }
  0xb7   : > { %v799_v44 = vpop.permute.xlu1 %798  ;;  %v794_v45 = vpop.permute.xlu0 %793 }
  0xbb   : > { %v809_v46 = vpop.permute.xlu1 %808  ;;  %v804_v47 = vpop.permute.xlu0 %803 }
  0xbf   : > { %v819_v48 = vpop.permute.xlu1 %818  ;;  %v814_v49 = vpop.permute.xlu0 %813 }
  0xc3   : > { %v829_v50 = vpop.permute.xlu1 %828  ;;  %v824_v51 = vpop.permute.xlu0 %823 }
  0xc7   : > { %v839_v60 = vpop.permute.xlu1 %838  ;;  %v834_v61 = vpop.permute.xlu0 %833 }
  0xcb   : > { %v849_v18 = vpop.permute.xlu1 %848  ;;  %v844_v19 = vpop.permute.xlu0 %843 }
 0x108   : > { %v2033_v52 = vpop.f32.mrb[0].mxu0  ;;  %v2057_v53 = vpop.f32.mrb[0].mxu1 }
 0x109   : > { %v872_v54 = vmul.f32 %v2033_v52, %v719_v31  ;;  %v888_v55 = vmul.f32 %v2057_v53, %v799_v44  ;;  %v520_v56 = vpop.f32.mrb[1].mxu0  ;;  %v600_v57 = vpop.f32.mrb[1].mxu1 }
 0x10a   : > { %v871_v58 = vmul.f32 %v714_v29, %v520_v56  ;;  %v887_v59 = vmul.f32 %v794_v45, %v600_v57 }
 0x10c   : > { %v903_v62 = vpack.c.bf16 %v872_v54, %v871_v58  ;;  %v911_v63 = vpack.c.bf16 %v888_v55, %v887_v59  ;;  %v2036_v0 = vpop.f32.mrb[2].mxu0  ;;  %v2060_v1 = vpop.f32.mrb[2].mxu1 }
 0x10d   : > { %v874_v2 = vmul.f32 %v2036_v0, %v729_v30  ;;  %v890_v3 = vmul.f32 %v2060_v1, %v809_v46  ;;  %v530_v4 = vpop.f32.mrb[3].mxu0  ;;  %v610_v5 = vpop.f32.mrb[3].mxu1 }
 0x10e   : > { %919 = vst [vmem:[#allocation2] sm:$0xff] %v903_v62  ;;  %927 = vst [vmem:[#allocation2 + $0x40] sm:$0xff] %v911_v63  ;;  %v873_v6 = vmul.f32 %v724_v28, %v530_v4  ;;  %v889_v7 = vmul.f32 %v804_v47, %v610_v5 }
 0x110   : > { %v904_v8 = vpack.c.bf16 %v874_v2, %v873_v6  ;;  %v912_v9 = vpack.c.bf16 %v890_v3, %v889_v7  ;;  %v2039_v10 = vpop.f32.mrb[4].mxu0  ;;  %v2063_v11 = vpop.f32.mrb[4].mxu1 }
 0x111   : > { %v876_v12 = vmul.f32 %v2039_v10, %v739_v32  ;;  %v892_v13 = vmul.f32 %v2063_v11, %v819_v48  ;;  %v540_v14 = vpop.f32.mrb[5].mxu0  ;;  %v620_v15 = vpop.f32.mrb[5].mxu1 }
 0x112   : > { %920 = vst [vmem:[#allocation2 + $0x8] sm:$0xff] %v904_v8  ;;  %928 = vst [vmem:[#allocation2 + $0x48] sm:$0xff] %v912_v9  ;;  %v875_v16 = vmul.f32 %v734_v33, %v540_v14  ;;  %v891_v17 = vmul.f32 %v814_v49, %v620_v15  ;;  %v859_v49 = vpop.permute.xlu1 %858 }
 0x114   : > { %v905_v20 = vpack.c.bf16 %v876_v12, %v875_v16  ;;  %v913_v21 = vpack.c.bf16 %v892_v13, %v891_v17  ;;  %v2042_v22 = vpop.f32.mrb[6].mxu0  ;;  %v2066_v23 = vpop.f32.mrb[6].mxu1 }
 0x115   : > { %v878_v24 = vmul.f32 %v2042_v22, %v749_v34  ;;  %v894_v25 = vmul.f32 %v2066_v23, %v829_v50  ;;  %v550_v26 = vpop.f32.mrb[7].mxu0  ;;  %v630_v27 = vpop.f32.mrb[7].mxu1 }
 0x116   : > { %921 = vst [vmem:[#allocation2 + $0x10] sm:$0xff] %v905_v20  ;;  %929 = vst [vmem:[#allocation2 + $0x50] sm:$0xff] %v913_v21  ;;  %v877_v28 = vmul.f32 %v2563_v35, %v550_v26  ;;  %v893_v29 = vmul.f32 %v824_v51, %v630_v27  ;;  %v854_v50 = vpop.permute.xlu0 %853  ;;  %v869_v3 = vpop.permute.xlu1 %868 }
 0x118   : > { %v906_v30 = vpack.c.bf16 %v878_v24, %v877_v28  ;;  %v914_v31 = vpack.c.bf16 %v894_v25, %v893_v29  ;;  %v2045_v32 = vpop.f32.mrb[8].mxu0  ;;  %v2069_v33 = vpop.f32.mrb[8].mxu1 }
 0x119   : > { %v880_v44 = vmul.f32 %v2045_v32, %v2565_v36  ;;  %v896_v45 = vmul.f32 %v2069_v33, %v839_v60  ;;  %v560_v46 = vpop.f32.mrb[9].mxu0  ;;  %v640_v47 = vpop.f32.mrb[9].mxu1 }
 0x11a   : > { %922 = vst [vmem:[#allocation2 + $0x18] sm:$0xff] %v906_v30  ;;  %930 = vst [vmem:[#allocation2 + $0x58] sm:$0xff] %v914_v31  ;;  %v879_v34 = vmul.f32 %v2567_v37, %v560_v46  ;;  %v895_v48 = vmul.f32 %v834_v61, %v640_v47  ;;  %v864_v4 = vpop.permute.xlu0 %863 }
 0x11c   : > { %v907_v52 = vpack.c.bf16 %v880_v44, %v879_v34  ;;  %v915_v53 = vpack.c.bf16 %v896_v45, %v895_v48  ;;  %v2048_v35 = vpop.f32.mrb[10].mxu0  ;;  %v2072_v51 = vpop.f32.mrb[10].mxu1 }
 0x11d   : > { %v882_v54 = vmul.f32 %v2048_v35, %v2569_v38  ;;  %v898_v55 = vmul.f32 %v2072_v51, %v849_v18  ;;  %v570_v56 = vpop.f32.mrb[11].mxu0  ;;  %v650_v57 = vpop.f32.mrb[11].mxu1 }
 0x11e   : > { %923 = vst [vmem:[#allocation2 + $0x20] sm:$0xff] %v907_v52  ;;  %931 = vst [vmem:[#allocation2 + $0x60] sm:$0xff] %v915_v53  ;;  %v881_v36 = vmul.f32 %v2571_v39, %v570_v56  ;;  %v897_v58 = vmul.f32 %v844_v19, %v650_v57 }
 0x120   : > { %v908_v59 = vpack.c.bf16 %v882_v54, %v881_v36  ;;  %v916_v60 = vpack.c.bf16 %v898_v55, %v897_v58  ;;  %v2051_v37 = vpop.f32.mrb[12].mxu0  ;;  %v2075_v61 = vpop.f32.mrb[12].mxu1 }
 0x121   : > { %v884_v62 = vmul.f32 %v2051_v37, %v2573_v40  ;;  %v900_v63 = vmul.f32 %v2075_v61, %v859_v49  ;;  %v580_v0 = vpop.f32.mrb[13].mxu0  ;;  %v660_v1 = vpop.f32.mrb[13].mxu1 }
 0x122   : > { %924 = vst [vmem:[#allocation2 + $0x28] sm:$0xff] %v908_v59  ;;  %932 = vst [vmem:[#allocation2 + $0x68] sm:$0xff] %v916_v60  ;;  %v883_v38 = vmul.f32 %v2575_v41, %v580_v0  ;;  %v899_v2 = vmul.f32 %v854_v50, %v660_v1 }
 0x124   : > { %v909_v5 = vpack.c.bf16 %v884_v62, %v883_v38  ;;  %v917_v6 = vpack.c.bf16 %v900_v63, %v899_v2  ;;  %v2054_v39 = vpop.f32.mrb[14].mxu0  ;;  %v2078_v7 = vpop.f32.mrb[14].mxu1 }
 0x125   : > { %v886_v8 = vmul.f32 %v2054_v39, %v2577_v42  ;;  %v902_v9 = vmul.f32 %v2078_v7, %v869_v3  ;;  %v590_v10 = vpop.f32.mrb[15].mxu0  ;;  %v670_v11 = vpop.f32.mrb[15].mxu1 }
 0x126   : > { %925 = vst [vmem:[#allocation2 + $0x30] sm:$0xff] %v909_v5  ;;  %933 = vst [vmem:[#allocation2 + $0x70] sm:$0xff] %v917_v6  ;;  %v885_v40 = vmul.f32 %v2579_v43, %v590_v10  ;;  %v901_v12 = vmul.f32 %v864_v4, %v670_v11 }
 0x128   : > { %v910_v13 = vpack.c.bf16 %v886_v8, %v885_v40  ;;  %v918_v14 = vpack.c.bf16 %v902_v9, %v901_v12 }
 0x12a   : > { %926 = vst [vmem:[#allocation2 + $0x38] sm:$0xff] %v910_v13  ;;  %934 = vst [vmem:[#allocation2 + $0x78] sm:$0xff] %v918_v14 }
 0x12b PF: > { %v1010_v41 = vld [vmem:[#allocation2 + $0x40] sm:$0xff]  ;;  %v1011_v16 = vld [vmem:[#allocation2 + $0x48] sm:$0xff]  ;;  %v2337_v42 = vmov 0   ;;  %v1012_v17 = vld [vmem:[#allocation2 + $0x50] sm:$0xff]  ;;  %s2599_s19 = sshll.u32 %s2317_s29, 7  ;;  %v2338_v2 = vmov 0.0|0.0  }
 0x12c   : > { %v1002_v15 = vld [vmem:[#allocation2] sm:$0xff]  ;;  %1884 = vmatprep.subr.bf16.mxu1 %v1010_v41  ;;  %2268 = vset.pattern.permute.xlu0 %v2337_v42  ;;  %v1003_v43 = vld [vmem:[#allocation2 + $0x8] sm:$0xff]  ;;  %v1004_v18 = vld [vmem:[#allocation2 + $0x10] sm:$0xff]  ;;  %s2610_s20 = scalar_lea.vmem %s2432_s23, %s2599_s19  ;;  %vm2339_vm1 = vmmov 0   ;;  %v2340_v3 = vmov 0.0   ;;  %s974_s23 = sshra.s32 %s2599_s19, 4 }
 0x12d   : > { %1885 = vmatpush3.bf16.msra.mxu1 %v1002_v15  ;;  %2269 = vset.pattern.permute.xlu1 %v2337_v42  ;;  %v2272_v19 = vld [vmem:[%s2437_s28 + $0x4] ss:$8 sps:$4 sm:$0xff]   ;;  %v1013_v20 = vld [vmem:[#allocation2 + $0x58] sm:$0xff]  ;;  %v2592_v21 = vld [vmem:[%s2437_s28] ss:$8 sps:$4 sm:$0xff]   ;;  %s2668_s9 = scalar_lea.vmem [#allocation3], %s2599_s19 }
 0x12e   : > { %1886 = vmatprep.subr.bf16.mxu1 %v1011_v16  ;;  %1468 = vmatprep.mubr.bf16.mxu0 %v2337_v42  ;;  %v2595_v22 = vld [vmem:[%s2437_s28 + $0x14] ss:$8 sps:$4 sm:$0xff]   ;;  %v1014_v24 = vld [vmem:[#allocation2 + $0x60] sm:$0xff]  ;;  %v2603_v25 = vld [vmem:[%s2437_s28 + $0x10] ss:$8 sps:$4 sm:$0xff]   ;;  %p1831_p8 = scmp.ne.s32.totalorder %s2317_s29, 1 }
 0x12f   : > { %1130 = vmatprep.mubr.bf16.mxu1 %v2272_v19  ;;  %1436 = vmatprep.subr.bf16.mxu0 %v2272_v19  ;;  %v1005_v23 = vld [vmem:[#allocation2 + $0x18] sm:$0xff]  ;;  %v2606_v26 = vld [vmem:[%s2437_s28 + $0x24] ss:$8 sps:$4 sm:$0xff]   ;;  %v2615_v29 = vld [vmem:[%s2437_s28 + $0x20] ss:$8 sps:$4 sm:$0xff]  }
 0x130   : > { %1437 = vmatpush1.bf16.msra.mxu0 %v2592_v21  ;;  %v1006_v27 = vld [vmem:[#allocation2 + $0x20] sm:$0xff]  ;;  %v1015_v28 = vld [vmem:[#allocation2 + $0x68] sm:$0xff]  ;;  %v960_v31 = vld [vmem:[%s2610_s20 + $0x10] sm:$0xff] }
 0x131   : > { %1887 = vmatpush3.bf16.msra.mxu1 %v1003_v43  ;;  %1438 = vmatprep.subr.bf16.mxu0 %v2595_v22  ;;  %v958_v30 = vld [vmem:[%s2610_s20] sm:$0xff]  ;;  %v2620_v32 = vld [vmem:[%s2437_s28 + $0x34] ss:$8 sps:$4 sm:$0xff]   ;;  %v959_v33 = vld [vmem:[%s2610_s20 + $0x8] sm:$0xff] }
 0x132   : > { %1888 = vmatprep.subr.bf16.mxu1 %v1012_v17  ;;  %1197 = vperm.xlu0 %2268, %v958_v30   ;;  %v961_v44 = vld [vmem:[%s2610_s20 + $0x18] sm:$0xff]  ;;  %v1007_v45 = vld [vmem:[#allocation2 + $0x28] sm:$0xff]  ;;  %v1016_v46 = vld [vmem:[#allocation2 + $0x70] sm:$0xff] }
 0x133   : > { %1207 = vperm.xlu1 %2269, %v960_v31   ;;  %v2281_v47 = vld [vmem:[%s2437_s28 + $0x30] ss:$8 sps:$4 sm:$0xff]   ;;  %v2282_v34 = vld [vmem:[%s2437_s28 + $0x44] ss:$8 sps:$4 sm:$0xff]   ;;  %v2284_v53 = vld [vmem:[%s2437_s28 + $0x40] ss:$8 sps:$4 sm:$0xff]  }
 0x134   : > { %1439 = vmatpush1.bf16.msra.mxu0 %v2603_v25  ;;  %v962_v48 = vld [vmem:[%s2610_s20 + $0x20] sm:$0xff]  ;;  %v963_v49 = vld [vmem:[%s2610_s20 + $0x28] sm:$0xff]  ;;  %v1008_v50 = vld [vmem:[#allocation2 + $0x30] sm:$0xff] }
 0x135   : > { %1889 = vmatpush3.bf16.msra.mxu1 %v1004_v18  ;;  %1440 = vmatprep.subr.bf16.mxu0 %v2606_v26  ;;  %v1017_v52 = vld [vmem:[#allocation2 + $0x78] sm:$0xff]  ;;  %v964_v51 = vld [vmem:[%s2610_s20 + $0x30] sm:$0xff]  ;;  %v2288_v57 = vld [vmem:[%s2437_s28 + $0x64] ss:$8 sps:$4 sm:$0xff]  }
 0x136   : > { %1890 = vmatprep.subr.bf16.mxu1 %v1013_v20  ;;  %1202 = vperm.xlu0 %2268, %v959_v33   ;;  %v2285_v35 = vld [vmem:[%s2437_s28 + $0x54] ss:$8 sps:$4 sm:$0xff]   ;;  %v2287_v56 = vld [vmem:[%s2437_s28 + $0x50] ss:$8 sps:$4 sm:$0xff]   ;;  %v966_v36 = vld [vmem:[%s2610_s20 + $0x40] sm:$0xff] }
 0x137   : > { %1212 = vperm.xlu1 %2269, %v961_v44   ;;  %v965_v54 = vld [vmem:[%s2610_s20 + $0x38] sm:$0xff]  ;;  %v967_v58 = vld [vmem:[%s2610_s20 + $0x48] sm:$0xff]  ;;  %v968_v37 = vld [vmem:[%s2610_s20 + $0x50] sm:$0xff] }
 0x138   : > { %1441 = vmatpush1.bf16.msra.mxu0 %v2615_v29  ;;  %v1009_v55 = vld [vmem:[#allocation2 + $0x38] sm:$0xff]  ;;  %v2290_v59 = vld [vmem:[%s2437_s28 + $0x60] ss:$8 sps:$4 sm:$0xff]   ;;  %v972_v1 = vld [vmem:[%s2610_s20 + $0x70] sm:$0xff] }
 0x139   : > { %1891 = vmatpush3.bf16.msra.mxu1 %v1005_v23  ;;  %1442 = vmatprep.subr.bf16.mxu0 %v2620_v32  ;;  %v2291_v60 = vld [vmem:[%s2437_s28 + $0x74] ss:$8 sps:$4 sm:$0xff]   ;;  %v2293_v62 = vld [vmem:[%s2437_s28 + $0x70] ss:$8 sps:$4 sm:$0xff]   ;;  %v970_v63 = vld [vmem:[%s2610_s20 + $0x60] sm:$0xff]  ;;  %s1813_s28 = sshll.u32 %s974_s23, 3 }
 0x13a   : > { %1892 = vmatprep.subr.bf16.mxu1 %v1014_v24  ;;  %1217 = vperm.xlu0 %2268, %v962_v48   ;;  %v969_v61 = vld [vmem:[%s2610_s20 + $0x58] sm:$0xff]  ;;  %v971_v0 = vld [vmem:[%s2610_s20 + $0x68] sm:$0xff]  ;;  %s2655_s21 = scalar_lea.vmem [#allocation2], %s1813_s28  ;;  %v2661_v13 = vld [vmem:[%s2776_s4] ss:$0 sm:$0xff] }
 0x13b   : > { %1222 = vperm.xlu1 %2269, %v963_v49   ;;  %v973_v38 = vld [vmem:[%s2610_s20 + $0x78] sm:$0xff]  ;;  %v978_v4 = vld [vmem:[%s2655_s21] sm:$0xff]  ;;  %v979_v14 = vld [vmem:[%s2655_s21 + $0x8] sm:$0xff] }
 0x13c   : > { %1443 = vmatpush1.bf16.msra.mxu0 %v2281_v47  ;;  %v986_v6 = vunpack.c.l.bf16 %v978_v4  ;;  %v987_v10 = vunpack.c.h.bf16 %v978_v4  ;;  %v988_v18 = vunpack.c.l.bf16 %v979_v14  ;;  %v980_v30 = vld [vmem:[%s2655_s21 + $0x10] sm:$0xff] }
 0x13d   : > { %1893 = vmatpush3.bf16.msra.mxu1 %v1006_v27  ;;  %1444 = vmatprep.subr.bf16.mxu0 %v2282_v34 }
 0x13e   : > { %1894 = vmatprep.subr.bf16.mxu1 %v1015_v28  ;;  %1227 = vperm.xlu0 %2268, %v964_v51  }
 0x13f   : > { %1232 = vperm.xlu1 %2269, %v965_v54  }
 0x140   : > { %1445 = vmatpush1.bf16.msra.mxu0 %v2284_v53 }
 0x141   : > { %1895 = vmatpush3.bf16.msra.mxu1 %v1007_v45  ;;  %1446 = vmatprep.subr.bf16.mxu0 %v2285_v35 }
 0x142   : > { %1896 = vmatprep.subr.bf16.mxu1 %v1016_v46  ;;  %1237 = vperm.xlu0 %2268, %v966_v36   ;;  %v981_v36 = vld [vmem:[%s2655_s21 + $0x18] sm:$0xff] }
 0x143   : > { %1242 = vperm.xlu1 %2269, %v967_v58  }
 0x144   : > { %1447 = vmatpush1.bf16.msra.mxu0 %v2287_v56 }
 0x145   : > { %1897 = vmatpush3.bf16.msra.mxu1 %v1008_v50  ;;  %1448 = vmatprep.subr.bf16.mxu0 %v2288_v57 }
 0x146   : > { %1898 = vmatprep.subr.bf16.mxu1 %v1017_v52  ;;  %1247 = vperm.xlu0 %2268, %v968_v37  }
 0x147   : > { %1252 = vperm.xlu1 %2269, %v969_v61  }
 0x148   : > { %1449 = vmatpush1.bf16.msra.mxu0 %v2290_v59 }
 0x149   : > { %1899 = vmatpush3.bf16.msra.mxu1 %v1009_v55  ;;  %1450 = vmatprep.subr.bf16.mxu0 %v2291_v60 }
 0x14a   : > { %1257 = vperm.xlu0 %2268, %v970_v63   ;;  %2146 = vmatprep.subr.bf16.mxu1 %v2338_v2 }
 0x14b   : > { %1262 = vperm.xlu1 %2269, %v971_v0   ;;  %v992_v0 = vunpack.c.l.bf16 %v981_v36 }
 0x14c   : > { %1131 = vmatmul.mubr.bf16.vlgmr.msra.gmra.mrb[0].mxu1 %v2592_v21  ;;  %1451 = vmatpush1.bf16.msra.mxu0 %v2293_v62 }
 0x14d   : > { %1138 = vmatprep.mubr.bf16.mxu1 %v2595_v22 }
 0x14e   : > { %1267 = vperm.xlu0 %2268, %v972_v1  }
 0x14f   : > { %1272 = vperm.xlu1 %2269, %v973_v38  }
 0x154   : > { %1139 = vmatmul.mubr.bf16.gmra.mrb[4].mxu1 %v2603_v25  ;;  %v989_v25 = vunpack.c.h.bf16 %v979_v14 }
 0x155   : > { %1146 = vmatprep.mubr.bf16.mxu1 %v2606_v26 }
 0x15c   : > { %1147 = vmatmul.mubr.bf16.gmra.mrb[8].mxu1 %v2615_v29 }
 0x15d   : > { %1154 = vmatprep.mubr.bf16.mxu1 %v2620_v32 }
 0x164   : > { %1155 = vmatmul.mubr.bf16.gmra.mrb[12].mxu1 %v2281_v47 }
 0x165   : > { %1162 = vmatprep.mubr.bf16.mxu1 %v2282_v34  ;;  %v990_v34 = vunpack.c.l.bf16 %v980_v30 }
 0x16c   : > { %1163 = vmatmul.mubr.bf16.gmra.mrb[16].mxu1 %v2284_v53 }
 0x16d   : > { %1170 = vmatprep.mubr.bf16.mxu1 %v2285_v35  ;;  %v991_v35 = vunpack.c.h.bf16 %v980_v30 }
 0x174   : > { %1171 = vmatmul.mubr.bf16.gmra.mrb[20].mxu1 %v2287_v56 }
 0x175   : > { %1178 = vmatprep.mubr.bf16.mxu1 %v2288_v57 }
 0x17c   : > { %1179 = vmatmul.mubr.bf16.gmra.mrb[24].mxu1 %v2290_v59 }
 0x17d   : > { %1186 = vmatprep.mubr.bf16.mxu1 %v2291_v60 }
 0x184   : > { %1187 = vmatmul.mubr.bf16.gmra.mrb[28].mxu1 %v2293_v62 }
 0x185   : > { %2111 = vmatprep.mubr.msk.f32.mxu1 %vm2339_vm1, %v2340_v3 }
 0x1b1   : > { %v1198_v39 = vpop.permute.xlu0 %1197 }
 0x1b2   : > { %v1208_v19 = vpop.permute.xlu1 %1207 }
 0x1b5   : > { %v1203_v16 = vpop.permute.xlu0 %1202 }
 0x1b6   : > { %v1213_v44 = vpop.permute.xlu1 %1212 }
 0x1b9   : > { %v1218_v57 = vpop.permute.xlu0 %1217 }
 0x1ba   : > { %v1223_v37 = vpop.permute.xlu1 %1222 }
 0x21f   : > { %v1900_v5 = vpop.f32.mrb[0].mxu1 }
 0x220   : > { %v1901_v7 = vpop.f32.mrb[1].mxu1 }
 0x221   : > { %v1902_v8 = vadd.f32 %v1901_v7, %v1900_v5  ;;  %v1903_v9 = vpop.f32.mrb[2].mxu1 }
 0x222   : > { %v1904_v11 = vpop.f32.mrb[3].mxu1 }
 0x223   : > { %v1133_v40 = vadd.f32 %v1902_v8, %v986_v6  ;;  %v1905_v12 = vadd.f32 %v1904_v11, %v1903_v9  ;;  %v993_v6 = vunpack.c.h.bf16 %v981_v36  ;;  %v982_v11 = vld [vmem:[%s2655_s21 + $0x20] sm:$0xff] }
 0x225   : > { %v1275_v41 = vmul.f32 %v1198_v39, %v1133_v40  ;;  %v1136_v15 = vadd.f32 %v1905_v12, %v987_v10  ;;  %v1228_v10 = vpop.permute.xlu0 %1227 }
 0x227   : > { %v1298_v42 = vadd.f32 %v2661_v13, %v1275_v41  ;;  %v1276_v43 = vmul.f32 %v1203_v16, %v1136_v15  ;;  %v1906_v17 = vpop.f32.mrb[4].mxu1  ;;  %v1233_v41 = vpop.permute.xlu1 %1232 }
 0x228   : > { %v1907_v20 = vpop.f32.mrb[5].mxu1 }
 0x229   : > { %v1314_v21 = vmax.f32 %v1298_v42, 0.0  ;;  %v1299_v22 = vadd.f32 %v2661_v13, %v1276_v43  ;;  %v1908_v23 = vadd.f32 %v1907_v20, %v1906_v17  ;;  %v1909_v24 = vpop.f32.mrb[6].mxu1  ;;  %v994_v43 = vunpack.c.l.bf16 %v982_v11 }
 0x22a   : > { %v1910_v26 = vpop.f32.mrb[7].mxu1 }
 0x22b   : > { %1330 = vst [vmem:[%s2442_s18] sm:$0xff] %v1314_v21  ;;  %1347 = vst [vmem:[%s2668_s9] sm:$0xff] %v1314_v21  ;;  %v1315_v27 = vmax.f32 %v1299_v22, 0.0  ;;  %v1141_v28 = vadd.f32 %v1908_v23, %v988_v18  ;;  %v1911_v29 = vadd.f32 %v1910_v26, %v1909_v24  ;;  %v995_v22 = vunpack.c.h.bf16 %v982_v11 }
 0x22d   : > { %1331 = vst [vmem:[%s2442_s18 + $0x8] sm:$0xff] %v1315_v27  ;;  %1348 = vst [vmem:[%s2668_s9 + $0x8] sm:$0xff] %v1315_v27  ;;  %v1277_v31 = vmul.f32 %v1208_v19, %v1141_v28  ;;  %v1144_v32 = vadd.f32 %v1911_v29, %v989_v25  ;;  %v2147_v33 = vpack.c.bf16 %v1315_v27, %v1314_v21  ;;  %v1238_v27 = vpop.permute.xlu0 %1237  ;;  %v983_v28 = vld [vmem:[%s2655_s21 + $0x28] sm:$0xff] }
 0x22f   : > { %v1300_v45 = vadd.f32 %v2661_v13, %v1277_v31  ;;  %v1278_v46 = vmul.f32 %v1213_v44, %v1144_v32  ;;  %v1912_v47 = vpop.f32.mrb[8].mxu1  ;;  %2148 = vmatpush3.bf16.xpose.msra.mxu1 %v2147_v33  ;;  %v1243_v32 = vpop.permute.xlu1 %1242 }
 0x230   : > { %v1913_v48 = vpop.f32.mrb[9].mxu1  ;;  %2149 = vmatprep.subr.bf16.mxu1 %v2338_v2 }
 0x231   : > { %v1316_v49 = vmax.f32 %v1300_v45, 0.0  ;;  %v1301_v50 = vadd.f32 %v2661_v13, %v1278_v46  ;;  %v1914_v52 = vadd.f32 %v1913_v48, %v1912_v47  ;;  %v1915_v53 = vpop.f32.mrb[10].mxu1  ;;  %v996_v46 = vunpack.c.l.bf16 %v983_v28 }
 0x232   : > { %v1916_v51 = vpop.f32.mrb[11].mxu1 }
 0x233   : > { %1332 = vst [vmem:[%s2442_s18 + $0x10] sm:$0xff] %v1316_v49  ;;  %1349 = vst [vmem:[%s2668_s9 + $0x10] sm:$0xff] %v1316_v49  ;;  %v1317_v54 = vmax.f32 %v1301_v50, 0.0  ;;  %v1149_v55 = vadd.f32 %v1914_v52, %v990_v34  ;;  %v1917_v56 = vadd.f32 %v1916_v51, %v1915_v53  ;;  %v997_v52 = vunpack.c.h.bf16 %v983_v28 }
 0x235   : > { %1333 = vst [vmem:[%s2442_s18 + $0x18] sm:$0xff] %v1317_v54  ;;  %1350 = vst [vmem:[%s2668_s9 + $0x18] sm:$0xff] %v1317_v54  ;;  %v1279_v58 = vmul.f32 %v1218_v57, %v1149_v55  ;;  %v1152_v59 = vadd.f32 %v1917_v56, %v991_v35  ;;  %v2150_v60 = vpack.c.bf16 %v1317_v54, %v1316_v49  ;;  %v1248_v55 = vpop.permute.xlu0 %1247  ;;  %v984_v56 = vld [vmem:[%s2655_s21 + $0x30] sm:$0xff] }
 0x237   : > { %v1302_v61 = vadd.f32 %v2661_v13, %v1279_v58  ;;  %v1280_v62 = vmul.f32 %v1223_v37, %v1152_v59  ;;  %v1918_v63 = vpop.f32.mrb[12].mxu1  ;;  %2151 = vmatpush3.bf16.xpose.msra.mxu1 %v2150_v60  ;;  %v1253_v59 = vpop.permute.xlu1 %1252 }
 0x238   : > { %v1919_v1 = vpop.f32.mrb[13].mxu1  ;;  %2152 = vmatprep.subr.bf16.mxu1 %v2338_v2 }
 0x239   : > { %v1318_v38 = vmax.f32 %v1302_v61, 0.0  ;;  %v1303_v3 = vadd.f32 %v2661_v13, %v1280_v62  ;;  %v1920_v4 = vadd.f32 %v1919_v1, %v1918_v63  ;;  %v1921_v5 = vpop.f32.mrb[14].mxu1  ;;  %v998_v62 = vunpack.c.l.bf16 %v984_v56 }
 0x23a   : > { %v1922_v39 = vpop.f32.mrb[15].mxu1 }
 0x23b   : > { %1334 = vst [vmem:[%s2442_s18 + $0x20] sm:$0xff] %v1318_v38  ;;  %1351 = vst [vmem:[%s2668_s9 + $0x20] sm:$0xff] %v1318_v38  ;;  %v1319_v7 = vmax.f32 %v1303_v3, 0.0  ;;  %v1157_v8 = vadd.f32 %v1920_v4, %v992_v0  ;;  %v1923_v9 = vadd.f32 %v1922_v39, %v1921_v5  ;;  %v999_v4 = vunpack.c.h.bf16 %v984_v56 }
 0x23d   : > { %1335 = vst [vmem:[%s2442_s18 + $0x28] sm:$0xff] %v1319_v7  ;;  %1352 = vst [vmem:[%s2668_s9 + $0x28] sm:$0xff] %v1319_v7  ;;  %v1281_v40 = vmul.f32 %v1228_v10, %v1157_v8  ;;  %v1160_v12 = vadd.f32 %v1923_v9, %v993_v6  ;;  %v2153_v14 = vpack.c.bf16 %v1319_v7, %v1318_v38  ;;  %v1258_v8 = vpop.permute.xlu0 %1257  ;;  %v985_v9 = vld [vmem:[%s2655_s21 + $0x38] sm:$0xff] }
 0x23f   : > { %v1304_v15 = vadd.f32 %v2661_v13, %v1281_v40  ;;  %v1282_v16 = vmul.f32 %v1233_v41, %v1160_v12  ;;  %v1924_v42 = vpop.f32.mrb[16].mxu1  ;;  %2154 = vmatpush3.bf16.xpose.msra.mxu1 %v2153_v14  ;;  %v1263_v12 = vpop.permute.xlu1 %1262 }
 0x240   : > { %v1925_v17 = vpop.f32.mrb[17].mxu1  ;;  %2155 = vmatprep.subr.bf16.mxu1 %v2338_v2 }
 0x241   : > { %v1320_v18 = vmax.f32 %v1304_v15, 0.0  ;;  %v1305_v19 = vadd.f32 %v2661_v13, %v1282_v16  ;;  %v1926_v20 = vadd.f32 %v1925_v17, %v1924_v42  ;;  %v1927_v21 = vpop.f32.mrb[18].mxu1  ;;  %v1000_v16 = vunpack.c.l.bf16 %v985_v9 }
 0x242   : > { %v1928_v23 = vpop.f32.mrb[19].mxu1 }
 0x243   : > { %1336 = vst [vmem:[%s2442_s18 + $0x30] sm:$0xff] %v1320_v18  ;;  %1353 = vst [vmem:[%s2668_s9 + $0x30] sm:$0xff] %v1320_v18  ;;  %v1321_v24 = vmax.f32 %v1305_v19, 0.0  ;;  %v1165_v25 = vadd.f32 %v1926_v20, %v994_v43  ;;  %v1929_v26 = vadd.f32 %v1928_v23, %v1927_v21  ;;  %v1001_v20 = vunpack.c.h.bf16 %v985_v9 }
 0x245   : > { %1337 = vst [vmem:[%s2442_s18 + $0x38] sm:$0xff] %v1321_v24  ;;  %1354 = vst [vmem:[%s2668_s9 + $0x38] sm:$0xff] %v1321_v24  ;;  %v1283_v29 = vmul.f32 %v1238_v27, %v1165_v25  ;;  %v1168_v30 = vadd.f32 %v1929_v26, %v995_v22  ;;  %v2156_v31 = vpack.c.bf16 %v1321_v24, %v1320_v18  ;;  %v1268_v25 = vpop.permute.xlu0 %1267 }
 0x247   : > { %v1306_v33 = vadd.f32 %v2661_v13, %v1283_v29  ;;  %v1284_v44 = vmul.f32 %v1243_v32, %v1168_v30  ;;  %v1930_v45 = vpop.f32.mrb[20].mxu1  ;;  %2157 = vmatpush3.bf16.xpose.msra.mxu1 %v2156_v31  ;;  %v1273_v29 = vpop.permute.xlu1 %1272 }
 0x248   : > { %v1931_v47 = vpop.f32.mrb[21].mxu1  ;;  %2158 = vmatprep.subr.bf16.mxu1 %v2338_v2 }
 0x249   : > { %v1322_v34 = vmax.f32 %v1306_v33, 0.0  ;;  %v1307_v48 = vadd.f32 %v2661_v13, %v1284_v44  ;;  %v1932_v49 = vadd.f32 %v1931_v47, %v1930_v45  ;;  %v1933_v50 = vpop.f32.mrb[22].mxu1 }
 0x24a   : > { %v1934_v53 = vpop.f32.mrb[23].mxu1 }
 0x24b   : > { %1338 = vst [vmem:[%s2442_s18 + $0x40] sm:$0xff] %v1322_v34  ;;  %1355 = vst [vmem:[%s2668_s9 + $0x40] sm:$0xff] %v1322_v34  ;;  %v1323_v35 = vmax.f32 %v1307_v48, 0.0  ;;  %v1173_v51 = vadd.f32 %v1932_v49, %v996_v46  ;;  %v1935_v54 = vadd.f32 %v1934_v53, %v1933_v50  ;;  %v1363_v46 = vld [vmem:[%s2777_s5 + $0x1] sm:$0x1]  ;;  %v1483_v49 = vlaneseq }
 0x24d   : > { %1339 = vst [vmem:[%s2442_s18 + $0x48] sm:$0xff] %v1323_v35  ;;  %1356 = vst [vmem:[%s2668_s9 + $0x48] sm:$0xff] %v1323_v35  ;;  %v1285_v57 = vmul.f32 %v1248_v55, %v1173_v51  ;;  %v1176_v36 = vadd.f32 %v1935_v54, %v997_v52  ;;  %v2159_v58 = vpack.c.bf16 %v1323_v35, %v1322_v34  ;;  %v2731_v52 = vshrl.u32 %v1483_v49, 7 }
 0x24e   : > { %vm2739_vm2 = vcmp.lt.s32.totalorder %v1483_v49, 256 }
 0x24f   : > { %v1308_v60 = vadd.f32 %v2661_v13, %v1285_v57  ;;  %v1286_v37 = vmul.f32 %v1253_v59, %v1176_v36  ;;  %v1936_v61 = vpop.f32.mrb[24].mxu1  ;;  %2160 = vmatpush3.bf16.xpose.msra.mxu1 %v2159_v58  ;;  %v1434_v36 = vld [vmem:[%s2447_s15] sm:$0x3] }
 0x250   : > { %v1937_v63 = vpop.f32.mrb[25].mxu1  ;;  %2161 = vmatprep.subr.bf16.mxu1 %v2338_v2 }
 0x251   : > { %v1324_v0 = vmax.f32 %v1308_v60, 0.0  ;;  %v1309_v1 = vadd.f32 %v2661_v13, %v1286_v37  ;;  %v1938_v38 = vadd.f32 %v1937_v63, %v1936_v61  ;;  %v1939_v3 = vpop.f32.mrb[26].mxu1 }
 0x252   : > { %v1940_v5 = vpop.f32.mrb[27].mxu1 }
 0x253   : > { %1340 = vst [vmem:[%s2442_s18 + $0x50] sm:$0xff] %v1324_v0  ;;  %1357 = vst [vmem:[%s2668_s9 + $0x50] sm:$0xff] %v1324_v0  ;;  %v1325_v6 = vmax.f32 %v1309_v1, 0.0  ;;  %v1181_v39 = vadd.f32 %v1938_v38, %v998_v62  ;;  %v1941_v7 = vadd.f32 %v1940_v5, %v1939_v3  ;;  %v2342_v3 = vmov (!%p1831_p8), 0  }
 0x254   : > { %2294 = vset.pattern.permute.xlu0 (!%p1831_p8), %v2342_v3 }
 0x255   : > { %1341 = vst [vmem:[%s2442_s18 + $0x58] sm:$0xff] %v1325_v6  ;;  %1358 = vst [vmem:[%s2668_s9 + $0x58] sm:$0xff] %v1325_v6  ;;  %v1287_v10 = vmul.f32 %v1258_v8, %v1181_v39  ;;  %v1184_v11 = vadd.f32 %v1941_v7, %v999_v4  ;;  %v2162_v40 = vpack.c.bf16 %v1325_v6, %v1324_v0 }
 0x257   : > { %v1310_v14 = vadd.f32 %v2661_v13, %v1287_v10  ;;  %v1288_v41 = vmul.f32 %v1263_v12, %v1184_v11  ;;  %v1942_v15 = vpop.f32.mrb[28].mxu1  ;;  %2163 = vmatpush3.bf16.xpose.msra.mxu1 %v2162_v40  ;;  %v1505_v11 = vld [vmem:[%s2777_s5] sm:$0x1] (!%p1831_p8) }
 0x258   : > { %v1943_v42 = vpop.f32.mrb[29].mxu1  ;;  %2164 = vmatprep.subr.bf16.mxu1 %v2338_v2  ;;  %v1539_v40 = vld [vmem:[#allocation4] sm:$0x1] (!%p1831_p8) }
 0x259   : > { %v1326_v43 = vmax.f32 %v1310_v14, 0.0  ;;  %v1311_v17 = vadd.f32 %v2661_v13, %v1288_v41  ;;  %v1944_v18 = vadd.f32 %v1943_v42, %v1942_v15  ;;  %v1945_v19 = vpop.f32.mrb[30].mxu1  ;;  %1542 = vperm.xlu0 (!%p1831_p8), %2294, %v1539_v40  }
 0x25a   : > { %v1946_v21 = vpop.f32.mrb[31].mxu1 }
 0x25b   : > { %1342 = vst [vmem:[%s2442_s18 + $0x60] sm:$0xff] %v1326_v43  ;;  %1359 = vst [vmem:[%s2668_s9 + $0x60] sm:$0xff] %v1326_v43  ;;  %v1327_v22 = vmax.f32 %v1311_v17, 0.0  ;;  %v1189_v23 = vadd.f32 %v1944_v18, %v1000_v16  ;;  %v1947_v24 = vadd.f32 %v1946_v21, %v1945_v19 }
 0x25d   : > { %1343 = vst [vmem:[%s2442_s18 + $0x68] sm:$0xff] %v1327_v22  ;;  %1360 = vst [vmem:[%s2668_s9 + $0x68] sm:$0xff] %v1327_v22  ;;  %v1289_v26 = vmul.f32 %v1268_v25, %v1189_v23  ;;  %v1192_v27 = vadd.f32 %v1947_v24, %v1001_v20  ;;  %v2165_v28 = vpack.c.bf16 %v1327_v22, %v1326_v43 }
 0x25f   : > { %v1312_v30 = vadd.f32 %v2661_v13, %v1289_v26  ;;  %v1290_v31 = vmul.f32 %v1273_v29, %v1192_v27  ;;  %2166 = vmatpush3.bf16.xpose.msra.mxu1 %v2165_v28 }
 0x260   : > { %2167 = vmatprep.subr.bf16.mxu1 %v2338_v2  ;;  %v2341_v2 = vmov 1966171168  }
 0x261   : > { %v1328_v32 = vmax.f32 %v1312_v30, 0.0  ;;  %v1313_v33 = vadd.f32 %v2661_v13, %v1290_v31  ;;  %v1481_v13 = vunpack.c.l.s4 %v2341_v2 }
 0x263   : > { %1344 = vst [vmem:[%s2442_s18 + $0x70] sm:$0xff] %v1328_v32  ;;  %1361 = vst [vmem:[%s2668_s9 + $0x70] sm:$0xff] %v1328_v32  ;;  %v1329_v44 = vmax.f32 %v1313_v33, 0.0  ;;  %v1482_v50 = vunpack.c.0.s8 %v1481_v13 }
 0x265   : > { %1345 = vst [vmem:[%s2442_s18 + $0x78] sm:$0xff] %v1329_v44  ;;  %1362 = vst [vmem:[%s2668_s9 + $0x78] sm:$0xff] %v1329_v44  ;;  %v2168_v45 = vpack.c.bf16 %v1329_v44, %v1328_v32  ;;  %v2734_v35 = vsub.s32 %v1482_v50, %v2731_v52  ;;  %v1547_v50 = vsub.s32 (!%p1831_p8), 0, %v2731_v52 }
 0x267   : > { %2169 = vmatpush3.bf16.xpose.msra.mxu1 %v2168_v45 }
 0x26c   : > { %v1522_v37 = vld [vmem:[#allocation3 + $0x80] sm:$0xff] (!%p1831_p8)  ;;  %v1523_v61 = vld [vmem:[#allocation3 + $0x88] sm:$0xff] (!%p1831_p8)  ;;  %v1524_v1 = vld [vmem:[#allocation3 + $0x90] sm:$0xff] (!%p1831_p8) }
 0x26d   : > { %v1506_v62 = vld [vmem:[#allocation3] sm:$0xff] (!%p1831_p8)  ;;  %v2170_v63 = vpack.c.bf16 (!%p1831_p8), %v1523_v61, %v1522_v37  ;;  %v1507_v0 = vld [vmem:[#allocation3 + $0x8] sm:$0xff] (!%p1831_p8)  ;;  %v1525_v38 = vld [vmem:[#allocation3 + $0x98] sm:$0xff] (!%p1831_p8) }
 0x26e   : > { %2112 = vmatmul.mubr.f32.vlgmr.msra.gmra.mrb[32].mxu1 %v1363_v46  ;;  %v2172_v4 = vpack.c.bf16 (!%p1831_p8), %v1507_v0, %v1506_v62  ;;  %v2174_v5 = vpack.c.bf16 (!%p1831_p8), %v1525_v38, %v1524_v1  ;;  %v1508_v6 = vld [vmem:[#allocation3 + $0x10] sm:$0xff] (!%p1831_p8)  ;;  %v1509_v39 = vld [vmem:[#allocation3 + $0x18] sm:$0xff] (!%p1831_p8)  ;;  %v1526_v7 = vld [vmem:[#allocation3 + $0xa0] sm:$0xff] (!%p1831_p8) }
 0x26f   : > { %2171 = vmatprep.subr.bf16.mxu0 (!%p1831_p8), %v2170_v63  ;;  %v1527_v8 = vld [vmem:[#allocation3 + $0xa8] sm:$0xff] (!%p1831_p8)  ;;  %v2176_v9 = vpack.c.bf16 (!%p1831_p8), %v1509_v39, %v1508_v6  ;;  %v1510_v12 = vld [vmem:[#allocation3 + $0x20] sm:$0xff] (!%p1831_p8)  ;;  %v1528_v41 = vld [vmem:[#allocation3 + $0xb0] sm:$0xff] (!%p1831_p8) }
 0x270   : > { %v2178_v10 = vpack.c.bf16 (!%p1831_p8), %v1527_v8, %v1526_v7  ;;  %v1511_v14 = vld [vmem:[#allocation3 + $0x28] sm:$0xff] (!%p1831_p8)  ;;  %v1529_v15 = vld [vmem:[#allocation3 + $0xb8] sm:$0xff] (!%p1831_p8)  ;;  %v1512_v43 = vld [vmem:[#allocation3 + $0x30] sm:$0xff] (!%p1831_p8) }
 0x271   : > { %v2180_v16 = vpack.c.bf16 (!%p1831_p8), %v1511_v14, %v1510_v12  ;;  %v2182_v42 = vpack.c.bf16 (!%p1831_p8), %v1529_v15, %v1528_v41  ;;  %v1513_v17 = vld [vmem:[#allocation3 + $0x38] sm:$0xff] (!%p1831_p8)  ;;  %v1530_v18 = vld [vmem:[#allocation3 + $0xc0] sm:$0xff] (!%p1831_p8)  ;;  %v1531_v19 = vld [vmem:[#allocation3 + $0xc8] sm:$0xff] (!%p1831_p8) }
 0x272   : > { %v2184_v20 = vpack.c.bf16 (!%p1831_p8), %v1513_v17, %v1512_v43  ;;  %v2186_v21 = vpack.c.bf16 (!%p1831_p8), %v1531_v19, %v1530_v18  ;;  %v1514_v22 = vld [vmem:[#allocation3 + $0x40] sm:$0xff] (!%p1831_p8)  ;;  %v1515_v23 = vld [vmem:[#allocation3 + $0x48] sm:$0xff] (!%p1831_p8)  ;;  %v1532_v24 = vld [vmem:[#allocation3 + $0xd0] sm:$0xff] (!%p1831_p8) }
 0x273   : > { %v1533_v25 = vld [vmem:[#allocation3 + $0xd8] sm:$0xff] (!%p1831_p8)  ;;  %v2188_v26 = vpack.c.bf16 (!%p1831_p8), %v1515_v23, %v1514_v22  ;;  %v1516_v28 = vld [vmem:[#allocation3 + $0x50] sm:$0xff] (!%p1831_p8)  ;;  %v1534_v30 = vld [vmem:[#allocation3 + $0xe0] sm:$0xff] (!%p1831_p8) }
 0x274   : > { %v2190_v27 = vpack.c.bf16 (!%p1831_p8), %v1533_v25, %v1532_v24  ;;  %v1517_v29 = vld [vmem:[#allocation3 + $0x58] sm:$0xff] (!%p1831_p8)  ;;  %v1535_v31 = vld [vmem:[#allocation3 + $0xe8] sm:$0xff] (!%p1831_p8)  ;;  %v1518_v44 = vld [vmem:[#allocation3 + $0x60] sm:$0xff] (!%p1831_p8) }
 0x275   : > { %v2192_v32 = vpack.c.bf16 (!%p1831_p8), %v1517_v29, %v1516_v28  ;;  %v2194_v33 = vpack.c.bf16 (!%p1831_p8), %v1535_v31, %v1534_v30  ;;  %v1519_v45 = vld [vmem:[#allocation3 + $0x68] sm:$0xff] (!%p1831_p8)  ;;  %v1536_v46 = vld [vmem:[#allocation3 + $0xf0] sm:$0xff] (!%p1831_p8)  ;;  %v1521_v13 = vld [vmem:[#allocation3 + $0x78] sm:$0xff] (!%p1831_p8) }
 0x276   : > { %v1520_v2 = vld [vmem:[#allocation3 + $0x70] sm:$0xff] (!%p1831_p8) }
 0x277   : > { %v2200_v49 = vpack.c.bf16 (!%p1831_p8), %v1521_v13, %v1520_v2 }
 0x341   : > { %v1430_v47 = vpop.f32.mrb[32].mxu1 }
 0x342   : > { %v1435_v34 = vpack.c.bf16 %v1430_v47, %v1430_v47  ;;  %v2113_v48 = vpop.f32.mrb[33].mxu1  ;;  %v1537_v47 = vld [vmem:[#allocation3 + $0xf8] sm:$0xff] (!%p1831_p8) }
 0x343   : > { %v2198_v48 = vpack.c.bf16 (!%p1831_p8), %v1537_v47, %v1536_v46 }
 0x344   : > { %1469 = vmatmul.mubr.bf16.vlgmr.msra.gmra.mrb[0].mxu0 %v1435_v34  ;;  %v2196_v34 = vpack.c.bf16 (!%p1831_p8), %v1519_v45, %v1518_v44 }
 0x345   : > { %2173 = vmatpush3.bf16.xpose.msra.mxu0 (!%p1831_p8), %v2172_v4  ;;  %1997 = vmatprep.mubr.f32.mxu0 (!%p1831_p8), %v1505_v11 }
 0x346   : > { %2175 = vmatprep.subr.bf16.mxu0 (!%p1831_p8), %v2174_v5 }
 0x34d   : > { %2177 = vmatpush3.bf16.xpose.msra.mxu0 (!%p1831_p8), %v2176_v9 }
 0x34e   : > { %2179 = vmatprep.subr.bf16.mxu0 (!%p1831_p8), %v2178_v10 }
 0x355   : > { %2181 = vmatpush3.bf16.xpose.msra.mxu0 (!%p1831_p8), %v2180_v16 }
 0x356   : > { %2183 = vmatprep.subr.bf16.mxu0 (!%p1831_p8), %v2182_v42 }
 0x35d   : > { %2185 = vmatpush3.bf16.xpose.msra.mxu0 (!%p1831_p8), %v2184_v20 }
 0x35e   : > { %2187 = vmatprep.subr.bf16.mxu0 (!%p1831_p8), %v2186_v21 }
 0x365   : > { %2189 = vmatpush3.bf16.xpose.msra.mxu0 (!%p1831_p8), %v2188_v26 }
 0x366   : > { %2191 = vmatprep.subr.bf16.mxu0 (!%p1831_p8), %v2190_v27 }
 0x36d   : > { %2193 = vmatpush3.bf16.xpose.msra.mxu0 (!%p1831_p8), %v2192_v32 }
 0x36e   : > { %2195 = vmatprep.subr.bf16.mxu0 (!%p1831_p8), %v2194_v33 }
 0x375   : > { %2197 = vmatpush3.bf16.xpose.msra.mxu0 (!%p1831_p8), %v2196_v34 }
 0x376   : > { %2199 = vmatprep.subr.bf16.mxu0 (!%p1831_p8), %v2198_v48 }
 0x37d   : > { %2201 = vmatpush3.bf16.xpose.msra.mxu0 (!%p1831_p8), %v2200_v49 }
 0x417   : > { %v1470_v53 = vpop.f32.mrb[0].mxu0 }
 0x418   : > { %v1472_v51 = vpop.f32.mrb[1].mxu0  ;;  %1998 = vmatmul.mubr.f32.vlgmr.msra.gmra.mrb[0].mxu0 (!%p1831_p8), %v1505_v11 }
 0x419   : > { %v1479_v54 = vcombine.low %v1470_v53, %v1472_v51  ;;  %v1474_v55 = vpop.f32.mrb[2].mxu0  ;;  %v1543_v53 = vpop.permute.xlu0 (!%p1831_p8), %1542 }
 0x41a   : > { %v1475_v56 = vpop.f32.mrb[3].mxu0  ;;  %v1548_v51 = vrot.slane (!%p1831_p8), %v1543_v53, %v1547_v50 }
 0x41b   : > { %v1486_v57 = vrot.slane %v1479_v54, %v2734_v35  ;;  %1504 = sbr.rel (%p1831_p8) target bundleno = 1272 (0x4f8), region = 56 }
 0x41d   : > { %v1493_v58 = vrot.slane %v1486_v57, %v2734_v35 }
 0x41f   : > { %v1495_v60 = vadd.f32 %v1493_v58, %v1434_v36 }
 0x421   : > { %1500 = vst.msk [vmem:[%s2447_s15] sm:$0x3] %vm2739_vm2, %v1495_v60 }
 0x428   : > { %v1538_v60 = vld [vmem:[%s2447_s15] sm:$0x3] }
 0x4eb   : > { %v1615_v54 = vpop.f32.mrb[0].mxu0 }
 0x4ec   : > { %v1616_v55 = vadd.f32 %v1615_v54, %v1548_v51  ;;  %v1617_v56 = vpop.f32.mrb[1].mxu0 }
 0x4ed   : > { %v1618_v57 = vadd.f32 %v1617_v56, %v1548_v51 }
 0x4ef   : > { %v1622_v36 = vcombine.low %v1616_v55, %v1618_v57 }
 0x4f1   : > { %v1629_v58 = vrot.slane %v1622_v36, %v2734_v35 }
 0x4f3   : > { %v1636_v37 = vrot.slane %v1629_v58, %v2734_v35 }
 0x4f5   : > { %v1638_v61 = vadd.f32 %v1636_v37, %v1538_v60 }
 0x4f7   : > { %1639 = vst.msk [vmem:[%s2447_s15] sm:$0x3] %vm2739_vm2, %v1638_v61 }
 0x4f8 PF: > { %s21_s11 = sadd.s32 1, %s2333_s11   ;;  %s2789_s29 = sld [smem:[#allocation5_spill]] }
 0x4f9   : > { %p18_p9 = scmp.ge.s32.totalorder %s21_s11, 6   ;;  %s2790_s30 = sld [smem:[#allocation6_spill]] }
 0x4fa   : > { %s2791_s9 = sld [smem:[#allocation7_spill]]  ;;  %s2792_s10 = sld [smem:[#allocation8_spill]] }
 0x4fb   :  { %20 = sbr.rel (!%p18_p9) target bundleno = 3 (0x3), region = 107 }

// kernel: _lambda_.5
= control target key start
LH: loop header
LB: loop body
LE: loop exit
PB: predicated region body
PF: predicated region fallthrough
CT: control target
= control target key end

     0   :  { %s1941_s29 = smov 0   ;;  %s1943_s30 = smov 0   ;;  %s2254_s0 = inlined_call_operand.vmem [shape: bf16[2,128,128], index: 0, kind: input, shape index: {}]   ;;  %s2255_s1 = inlined_call_operand.vmem [shape: f32[2,128,128], index: 1, kind: input, shape index: {}]   ;;  %s2256_s2 = inlined_call_operand.vmem [shape: f32[2,128,1], index: 2, kind: input, shape index: {}]   ;;  %s2257_s3 = inlined_call_operand.vmem [shape: f32[128,128], index: 3, kind: input, shape index: {}]   ;;  %s2258_s4 = inlined_call_operand.vmem [shape: f32[1,128], index: 4, kind: input, shape index: {}]   ;;  %s2259_s5 = inlined_call_operand.vmem [shape: f32[2,128], index: 5, kind: input, shape index: {}]   ;;  %s2260_s6 = inlined_call_operand.<no memory space> [shape: f32[1,1], index: 6, kind: input, shape index: {}]   ;;  %s2261_s7 = inlined_call_operand.vmem [shape: f32[2,128,128], index: 7, kind: output, shape index: {0}]   ;;  %s2262_s8 = inlined_call_operand.vmem [shape: f32[2,1,128], index: 8, kind: output, shape index: {1}]  }
   0x1   :  { %v14_v0 = vstv %s2260_s6  ;;  %s1945_s9 = smov 0  }
   0x2   :  { %15 = vst [vmem:[#allocation4] sm:$0x1] %v14_v0 }
   0x3 LB: > { %s33_s6 = sadd.s32 1, %s1883_s30  ;;  %p1454_p0 = scmp.ge.s32.totalorder %s1887_s9, 1  ;;  %s1887_s9 = sphi %s1945_s9, %s21_s9   ;;  %s1883_s30 = sphi %s1943_s30, %s2264_s30   ;;  %s1879_s29 = sphi %s1941_s29, %s2263_s29  }
   0x4   : > { %p35_p1 = scmp.ge.s32.totalorder %s33_s6, 2  ;;  %p308_p2 = scmp.lt.s32.totalorder %s1887_s9, 3 }
   0x6   : > { %s2266_s6 = smov (%p35_p1, %s33_s6), 0  ;;  %p309_p3 = pnand %p1454_p0, %p308_p2 }
   0x7   : > { %v417_v1 = vld [vmem:[%s2257_s3] sm:$0xff] (!%p309_p3)  ;;  %v418_v2 = vld [vmem:[%s2257_s3 + $0x8] sm:$0xff] (!%p309_p3)  ;;  %v419_v3 = vld [vmem:[%s2257_s3 + $0x10] sm:$0xff] (!%p309_p3)  ;;  %p364_p4 = scmp.lt.s32.totalorder (!%p309_p3), %s1879_s29, 1  ;;  %v1889_v6 = vmov (!%p309_p3), 0   ;;  %vm1891_vm0 = vmmov (!%p309_p3), 0  }
   0x8   : > { %312 = sbr.rel (%p309_p3) target bundleno = 1074 (0x432), region = 48  ;;  %v1747_v4 = vpack.c.bf16 (!%p309_p3), %v418_v2, %v417_v1  ;;  %v420_v5 = vld [vmem:[%s2257_s3 + $0x18] sm:$0xff] (!%p309_p3)  ;;  %1855 = vset.pattern.permute.xlu0 (!%p309_p3), %v1889_v6  ;;  %1856 = vset.pattern.permute.xlu1 (!%p309_p3), %v1889_v6  ;;  %v421_v8 = vld [vmem:[%s2257_s3 + $0x20] sm:$0xff] (!%p309_p3)  ;;  %v422_v9 = vld [vmem:[%s2257_s3 + $0x28] sm:$0xff] (!%p309_p3) }
   0x9   : > { %v1751_v7 = vpack.c.bf16 (!%p309_p3), %v420_v5, %v419_v3  ;;  %v1755_v10 = vpack.c.bf16 (!%p309_p3), %v422_v9, %v421_v8  ;;  %v423_v11 = vld [vmem:[%s2257_s3 + $0x30] sm:$0xff] (!%p309_p3)  ;;  %v424_v12 = vld [vmem:[%s2257_s3 + $0x38] sm:$0xff] (!%p309_p3)  ;;  %v425_v16 = vld [vmem:[%s2257_s3 + $0x40] sm:$0xff] (!%p309_p3) }
   0xa   : > { %1748 = vmatprep.subr.bf16.mxu0 (!%p309_p3), %v1747_v4  ;;  %v1759_v14 = vpack.c.bf16 (!%p309_p3), %v424_v12, %v423_v11  ;;  %v426_v17 = vld [vmem:[%s2257_s3 + $0x48] sm:$0xff] (!%p309_p3)  ;;  %v427_v22 = vld [vmem:[%s2257_s3 + $0x50] sm:$0xff] (!%p309_p3)  ;;  %v428_v23 = vld [vmem:[%s2257_s3 + $0x58] sm:$0xff] (!%p309_p3) }
   0xb   : > { %1750 = vmatpush3.bf16.msra.mxu0 (!%p309_p3), %v1747_v4  ;;  %v1763_v20 = vpack.c.bf16 (!%p309_p3), %v426_v17, %v425_v16  ;;  %v1767_v25 = vpack.c.bf16 (!%p309_p3), %v428_v23, %v427_v22  ;;  %v429_v27 = vld [vmem:[%s2257_s3 + $0x60] sm:$0xff] (!%p309_p3)  ;;  %v430_v28 = vld [vmem:[%s2257_s3 + $0x68] sm:$0xff] (!%p309_p3)  ;;  %v431_v32 = vld [vmem:[%s2257_s3 + $0x70] sm:$0xff] (!%p309_p3) }
   0xc   : > { %1752 = vmatprep.subr.bf16.mxu0 (!%p309_p3), %v1751_v7  ;;  %v1771_v30 = vpack.c.bf16 (!%p309_p3), %v430_v28, %v429_v27  ;;  %v432_v33 = vld [vmem:[%s2257_s3 + $0x78] sm:$0xff] (!%p309_p3)  ;;  %v1226_v58 = vld [vmem:[#allocation4] sm:$0x1] (!%p309_p3) }
   0xd   : > { %v1775_v35 = vpack.c.bf16 (!%p309_p3), %v432_v33, %v431_v32 }
   0xf   : > { %s2268_s29 = smov (!%p364_p4, %s1879_s29), 1  ;;  %1754 = vmatpush3.bf16.msra.mxu0 %v1751_v7 }
  0x10   : > { %s1980_s22 = sshll.u32 %s2268_s29, 7  ;;  %1756 = vmatprep.subr.bf16.mxu0 %v1755_v10  ;;  %s2221_s26 = scalar_lea.vmem %s2262_s8, %s2268_s29 }
  0x11   : > { %s1986_s25 = scalar_lea.vmem %s2255_s1, %s1980_s22  ;;  %s1998_s13 = scalar_lea.vmem %s2256_s2, %s1980_s22 }
  0x12   : > { %v401_v13 = vld [vmem:[%s1986_s25] sm:$0xff]  ;;  %v2012_v18 = vld [vmem:[%s1998_s13 + $0x8] sm:$0xff]  ;;  %v2015_v19 = vld [vmem:[%s1998_s13 + $0x10] sm:$0xff]  ;;  %s2150_s20 = scalar_lea.vmem %s2261_s7, %s1980_s22 }
  0x13   : > { %1601 = vmatprep.mubr.f32.mxu0 %v401_v13  ;;  %v2002_v15 = vld [vmem:[%s1998_s13] sm:$0xff]  ;;  %1758 = vmatpush3.bf16.msra.mxu0 %v1755_v10  ;;  %v2019_v21 = vld [vmem:[%s1998_s13 + $0x18] sm:$0xff]  ;;  %v583_v26 = vld [vmem:[%s1998_s13 + $0x28] sm:$0xff] }
  0x14   : > { %596 = vperm.xlu0 %1855, %v2002_v15   ;;  %606 = vperm.xlu1 %1856, %v2015_v19   ;;  %v582_v24 = vld [vmem:[%s1998_s13 + $0x20] sm:$0xff]  ;;  %v584_v29 = vld [vmem:[%s1998_s13 + $0x30] sm:$0xff]  ;;  %v585_v31 = vld [vmem:[%s1998_s13 + $0x38] sm:$0xff] }
  0x15   : > { %1760 = vmatprep.subr.bf16.mxu0 %v1759_v14  ;;  %v586_v34 = vld [vmem:[%s1998_s13 + $0x40] sm:$0xff]  ;;  %v587_v36 = vld [vmem:[%s1998_s13 + $0x48] sm:$0xff]  ;;  %v588_v37 = vld [vmem:[%s1998_s13 + $0x50] sm:$0xff] }
  0x16   : > { %v589_v38 = vld [vmem:[%s1998_s13 + $0x58] sm:$0xff]  ;;  %v590_v39 = vld [vmem:[%s1998_s13 + $0x60] sm:$0xff]  ;;  %v402_v40 = vld [vmem:[%s1986_s25 + $0x8] sm:$0xff] }
  0x17   : > { %1762 = vmatpush3.bf16.msra.mxu0 %v1759_v14  ;;  %v403_v41 = vld [vmem:[%s1986_s25 + $0x10] sm:$0xff]  ;;  %v591_v42 = vld [vmem:[%s1998_s13 + $0x68] sm:$0xff]  ;;  %v404_v44 = vld [vmem:[%s1986_s25 + $0x18] sm:$0xff] }
  0x18   : > { %601 = vperm.xlu0 %1855, %v2012_v18   ;;  %611 = vperm.xlu1 %1856, %v2019_v21   ;;  %v592_v43 = vld [vmem:[%s1998_s13 + $0x70] sm:$0xff]  ;;  %v405_v45 = vld [vmem:[%s1986_s25 + $0x20] sm:$0xff]  ;;  %v593_v46 = vld [vmem:[%s1998_s13 + $0x78] sm:$0xff]  ;;  %s1474_s13 = sshll.u32 %s2268_s29, 6 }
  0x19   : > { %1764 = vmatprep.subr.bf16.mxu0 %v1763_v20  ;;  %v406_v47 = vld [vmem:[%s1986_s25 + $0x28] sm:$0xff]  ;;  %v407_v48 = vld [vmem:[%s1986_s25 + $0x30] sm:$0xff]  ;;  %v408_v49 = vld [vmem:[%s1986_s25 + $0x38] sm:$0xff]  ;;  %s2076_s16 = scalar_lea.vmem %s2254_s0, %s1474_s13 }
  0x1a   : > { %v409_v50 = vld [vmem:[%s1986_s25 + $0x40] sm:$0xff]  ;;  %v410_v51 = vld [vmem:[%s1986_s25 + $0x48] sm:$0xff]  ;;  %v411_v52 = vld [vmem:[%s1986_s25 + $0x50] sm:$0xff] }
  0x1b   : > { %1766 = vmatpush3.bf16.msra.mxu0 %v1763_v20  ;;  %v412_v53 = vld [vmem:[%s1986_s25 + $0x58] sm:$0xff]  ;;  %v413_v54 = vld [vmem:[%s1986_s25 + $0x60] sm:$0xff]  ;;  %v414_v55 = vld [vmem:[%s1986_s25 + $0x68] sm:$0xff] }
  0x1c   : > { %616 = vperm.xlu0 %1855, %v582_v24   ;;  %621 = vperm.xlu1 %1856, %v583_v26   ;;  %v415_v56 = vld [vmem:[%s1986_s25 + $0x70] sm:$0xff]  ;;  %v416_v57 = vld [vmem:[%s1986_s25 + $0x78] sm:$0xff]  ;;  %v2079_v59 = vld [vmem:[%s2076_s16] sm:$0xff]  }
  0x1d   : > { %1768 = vmatprep.subr.bf16.mxu0 %v1767_v25  ;;  %1641 = vmatprep.mubr.bf16.mxu1 %v2079_v59 }
  0x1f   : > { %1770 = vmatpush3.bf16.msra.mxu0 %v1767_v25 }
  0x20   : > { %626 = vperm.xlu0 %1855, %v584_v29   ;;  %631 = vperm.xlu1 %1856, %v585_v31  }
  0x21   : > { %1772 = vmatprep.subr.bf16.mxu0 %v1771_v30 }
  0x23   : > { %1774 = vmatpush3.bf16.msra.mxu0 %v1771_v30 }
  0x24   : > { %636 = vperm.xlu0 %1855, %v586_v34   ;;  %641 = vperm.xlu1 %1856, %v587_v36  }
  0x25   : > { %1776 = vmatprep.subr.bf16.mxu0 %v1775_v35 }
  0x27   : > { %1778 = vmatpush3.bf16.msra.mxu0 %v1775_v35 }
  0x28   : > { %646 = vperm.xlu0 %1855, %v588_v37   ;;  %651 = vperm.xlu1 %1856, %v589_v38  }
  0x2a   : > { %1602 = vmatmul.mubr.f32.vlgmr.msra.gmra.mrb[0].mxu0 %v402_v40 }
  0x2b   : > { %1604 = vmatprep.mubr.f32.mxu0 %v403_v41 }
  0x2c   : > { %656 = vperm.xlu0 %1855, %v590_v39   ;;  %661 = vperm.xlu1 %1856, %v591_v42  }
  0x2e   : > { %1605 = vmatmul.mubr.f32.gmra.mrb[2].mxu0 %v404_v44 }
  0x2f   : > { %1607 = vmatprep.mubr.f32.mxu0 %v405_v45 }
  0x30   : > { %666 = vperm.xlu0 %1855, %v592_v43   ;;  %671 = vperm.xlu1 %1856, %v593_v46  }
  0x32   : > { %1608 = vmatmul.mubr.f32.gmra.mrb[4].mxu0 %v406_v47 }
  0x33   : > { %1610 = vmatprep.mubr.f32.mxu0 %v407_v48 }
  0x34   : > { %924 = vperm.xlu0 %1855, %v2002_v15   ;;  %929 = vperm.xlu1 %1856, %v2012_v18  }
  0x36   : > { %1611 = vmatmul.mubr.f32.gmra.mrb[6].mxu0 %v408_v49 }
  0x37   : > { %1613 = vmatprep.mubr.f32.mxu0 %v409_v50 }
  0x38   : > { %934 = vperm.xlu0 %1855, %v2015_v19   ;;  %939 = vperm.xlu1 %1856, %v2019_v21  }
  0x3a   : > { %1614 = vmatmul.mubr.f32.gmra.mrb[8].mxu0 %v410_v51 }
  0x3b   : > { %1616 = vmatprep.mubr.f32.mxu0 %v411_v52  ;;  %v1858_v52 = vld [vmem:[%s2076_s16 + $0x8] sm:$0xff]  }
  0x3c   : > { %944 = vperm.xlu0 %1855, %v582_v24   ;;  %949 = vperm.xlu1 %1856, %v583_v26  }
  0x3e   : > { %1617 = vmatmul.mubr.f32.gmra.mrb[10].mxu0 %v412_v53  ;;  %v1859_v53 = vld [vmem:[%s2076_s16 + $0x10] sm:$0xff]  }
  0x3f   : > { %1619 = vmatprep.mubr.f32.mxu0 %v413_v54  ;;  %v1860_v54 = vld [vmem:[%s2076_s16 + $0x18] sm:$0xff]  }
  0x40   : > { %954 = vperm.xlu0 %1855, %v584_v29   ;;  %959 = vperm.xlu1 %1856, %v585_v31  }
  0x42   : > { %1620 = vmatmul.mubr.f32.gmra.mrb[12].mxu0 %v414_v55  ;;  %v1861_v55 = vld [vmem:[%s2076_s16 + $0x20] sm:$0xff]  }
  0x43   : > { %1622 = vmatprep.mubr.f32.mxu0 %v415_v56  ;;  %v1862_v56 = vld [vmem:[%s2076_s16 + $0x28] sm:$0xff]  }
  0x44   : > { %964 = vperm.xlu0 %1855, %v586_v34   ;;  %969 = vperm.xlu1 %1856, %v587_v36  }
  0x46   : > { %1623 = vmatmul.mubr.f32.gmra.mrb[14].mxu0 %v416_v57  ;;  %v1863_v57 = vld [vmem:[%s2076_s16 + $0x30] sm:$0xff]  }
  0x48   : > { %974 = vperm.xlu0 %1855, %v588_v37   ;;  %979 = vperm.xlu1 %1856, %v589_v38  }
  0x4c   : > { %984 = vperm.xlu0 %1855, %v590_v39   ;;  %989 = vperm.xlu1 %1856, %v591_v42  }
  0x50   : > { %994 = vperm.xlu0 %1855, %v592_v43   ;;  %999 = vperm.xlu1 %1856, %v593_v46  }
  0x54   : > { %1229 = vperm.xlu0 %1855, %v1226_v58   ;;  %v1864_v58 = vld [vmem:[%s2076_s16 + $0x38] sm:$0xff]  }
  0x93   : > { %v607_v60 = vpop.permute.xlu1 %606  ;;  %v597_v61 = vpop.permute.xlu0 %596 }
  0x97   : > { %v612_v62 = vpop.permute.xlu1 %611  ;;  %v602_v63 = vpop.permute.xlu0 %601 }
  0x9b   : > { %v622_v0 = vpop.permute.xlu1 %621  ;;  %v617_v1 = vpop.permute.xlu0 %616 }
  0x9f   : > { %v632_v6 = vpop.permute.xlu1 %631  ;;  %v627_v9 = vpop.permute.xlu0 %626 }
  0xa3   : > { %v642_v17 = vpop.permute.xlu1 %641  ;;  %v637_v19 = vpop.permute.xlu0 %636 }
  0xa7   : > { %v652_v25 = vpop.permute.xlu1 %651  ;;  %v647_v28 = vpop.permute.xlu0 %646 }
  0xab   : > { %v662_v36 = vpop.permute.xlu1 %661  ;;  %v657_v38 = vpop.permute.xlu0 %656 }
  0xaf   : > { %v672_v44 = vpop.permute.xlu1 %671  ;;  %v667_v47 = vpop.permute.xlu0 %666 }
  0xfd   : > { %v1603_v2 = vpop.f32.mrb[0].mxu0 }
  0xfe   : > { %v675_v3 = vmul.f32 %v1603_v2, %v602_v63  ;;  %v499_v4 = vpop.f32.mrb[1].mxu0 }
  0xff   : > { %v674_v5 = vmul.f32 %v597_v61, %v499_v4  ;;  %v1892_v61 = vmov 0.0  }
 0x100   : > { %1689 = vmatprep.mubr.msk.f32.mxu0 %vm1891_vm0, %v1892_v61  ;;  %706 = vst [vmem:[%s2221_s26] sm:$0x1] %v1892_v61 }
 0x101   : > { %v2082_v7 = vpack.c.bf16 %v675_v3, %v674_v5  ;;  %v1606_v8 = vpop.f32.mrb[2].mxu0 }
 0x102   : > { %v677_v10 = vmul.f32 %v1606_v8, %v612_v62  ;;  %v509_v11 = vpop.f32.mrb[3].mxu0  ;;  %v930_v62 = vpop.permute.xlu1 %929 }
 0x103   : > { %v676_v12 = vmul.f32 %v607_v60, %v509_v11  ;;  %1625 = vmatprep.subr.bf16.mxu1 %v2082_v7  ;;  %v1890_v60 = vmov 0.0|0.0   ;;  %v753_v5 = vunpack.c.l.bf16 %v2082_v7  ;;  %v2142_v11 = vld [vmem:[%s2258_s4] ss:$0 sm:$0xff] }
 0x104   : > { %1626 = vmatpush3.bf16.msra.mxu1 %v2082_v7  ;;  %1779 = vmatprep.subr.bf16.mxu0 %v1890_v60 }
 0x105   : > { %v2086_v13 = vpack.c.bf16 %v677_v10, %v676_v12  ;;  %v1609_v14 = vpop.f32.mrb[4].mxu0 }
 0x106   : > { %v679_v15 = vmul.f32 %v1609_v14, %v622_v0  ;;  %v519_v16 = vpop.f32.mrb[5].mxu0  ;;  %v940_v0 = vpop.permute.xlu1 %939 }
 0x107   : > { %v678_v18 = vmul.f32 %v617_v1, %v519_v16  ;;  %1627 = vmatprep.subr.bf16.mxu1 %v2086_v13  ;;  %v755_v3 = vunpack.c.l.bf16 %v2086_v13 }
 0x108   : > { %1628 = vmatpush3.bf16.msra.mxu1 %v2086_v13 }
 0x109   : > { %v2090_v20 = vpack.c.bf16 %v679_v15, %v678_v18  ;;  %v1612_v21 = vpop.f32.mrb[6].mxu0  ;;  %v754_v15 = vunpack.c.h.bf16 %v2082_v7 }
 0x10a   : > { %v681_v22 = vmul.f32 %v1612_v21, %v632_v6  ;;  %v529_v23 = vpop.f32.mrb[7].mxu0  ;;  %v950_v2 = vpop.permute.xlu1 %949 }
 0x10b   : > { %v680_v24 = vmul.f32 %v627_v9, %v529_v23  ;;  %1629 = vmatprep.subr.bf16.mxu1 %v2090_v20  ;;  %v756_v9 = vunpack.c.h.bf16 %v2086_v13 }
 0x10c   : > { %1630 = vmatpush3.bf16.msra.mxu1 %v2090_v20 }
 0x10d   : > { %v2094_v26 = vpack.c.bf16 %v681_v22, %v680_v24  ;;  %v1615_v27 = vpop.f32.mrb[8].mxu0 }
 0x10e   : > { %v683_v29 = vmul.f32 %v1615_v27, %v642_v17  ;;  %v539_v30 = vpop.f32.mrb[9].mxu0 }
 0x10f   : > { %v682_v31 = vmul.f32 %v637_v19, %v539_v30  ;;  %1631 = vmatprep.subr.bf16.mxu1 %v2094_v26  ;;  %v960_v19 = vpop.permute.xlu1 %959 }
 0x110   : > { %1632 = vmatpush3.bf16.msra.mxu1 %v2094_v26 }
 0x111   : > { %v2098_v32 = vpack.c.bf16 %v683_v29, %v682_v31  ;;  %v1618_v33 = vpop.f32.mrb[10].mxu0 }
 0x112   : > { %v685_v34 = vmul.f32 %v1618_v33, %v652_v25  ;;  %v549_v35 = vpop.f32.mrb[11].mxu0 }
 0x113   : > { %v684_v37 = vmul.f32 %v647_v28, %v549_v35  ;;  %1633 = vmatprep.subr.bf16.mxu1 %v2098_v32  ;;  %v759_v28 = vunpack.c.l.bf16 %v2094_v26 }
 0x114   : > { %1634 = vmatpush3.bf16.msra.mxu1 %v2098_v32 }
 0x115   : > { %v2102_v39 = vpack.c.bf16 %v685_v34, %v684_v37  ;;  %v1621_v40 = vpop.f32.mrb[12].mxu0  ;;  %v757_v34 = vunpack.c.l.bf16 %v2090_v20 }
 0x116   : > { %v687_v41 = vmul.f32 %v1621_v40, %v662_v36  ;;  %v559_v42 = vpop.f32.mrb[13].mxu0  ;;  %v970_v40 = vpop.permute.xlu1 %969 }
 0x117   : > { %v686_v43 = vmul.f32 %v657_v38, %v559_v42  ;;  %1635 = vmatprep.subr.bf16.mxu1 %v2102_v39  ;;  %v760_v38 = vunpack.c.h.bf16 %v2094_v26 }
 0x118   : > { %1636 = vmatpush3.bf16.msra.mxu1 %v2102_v39 }
 0x119   : > { %v2106_v45 = vpack.c.bf16 %v687_v41, %v686_v43  ;;  %v1624_v46 = vpop.f32.mrb[14].mxu0 }
 0x11a   : > { %v689_v48 = vmul.f32 %v1624_v46, %v672_v44  ;;  %v569_v49 = vpop.f32.mrb[15].mxu0  ;;  %v758_v44 = vunpack.c.h.bf16 %v2090_v20 }
 0x11b   : > { %v688_v50 = vmul.f32 %v667_v47, %v569_v49  ;;  %1637 = vmatprep.subr.bf16.mxu1 %v2106_v45 }
 0x11c   : > { %1638 = vmatpush3.bf16.msra.mxu1 %v2106_v45 }
 0x11d   : > { %v2110_v51 = vpack.c.bf16 %v689_v48, %v688_v50 }
 0x11f   : > { %1639 = vmatprep.subr.bf16.mxu1 %v2110_v51 }
 0x120   : > { %1640 = vmatpush3.bf16.msra.mxu1 %v2110_v51 }
 0x121   : > { %1692 = vmatprep.subr.bf16.mxu1 %v1892_v61 }
 0x123   : > { %1642 = vmatmul.mubr.bf16.vlgmr.msra.gmra.mrb[0].mxu1 %v1858_v52 }
 0x124   : > { %1645 = vmatprep.mubr.bf16.mxu1 %v1859_v53  ;;  %1693 = vmatpush3.bf16.msra.mxu1 %v2079_v59  ;;  %v925_v59 = vpop.permute.xlu0 %924 }
 0x125   : > { %1694 = vmatprep.subr.bf16.mxu1 %v1892_v61 }
 0x128   : > { %1695 = vmatpush3.bf16.msra.mxu1 %v1858_v52  ;;  %v935_v63 = vpop.permute.xlu0 %934 }
 0x129   : > { %1696 = vmatprep.subr.bf16.mxu1 %v1892_v61 }
 0x12b   : > { %1646 = vmatmul.mubr.bf16.gmra.mrb[4].mxu1 %v1860_v54 }
 0x12c   : > { %1649 = vmatprep.mubr.bf16.mxu1 %v1861_v55  ;;  %1697 = vmatpush3.bf16.msra.mxu1 %v1859_v53  ;;  %v945_v1 = vpop.permute.xlu0 %944 }
 0x12d   : > { %1698 = vmatprep.subr.bf16.mxu1 %v1892_v61 }
 0x130   : > { %1699 = vmatpush3.bf16.msra.mxu1 %v1860_v54  ;;  %v955_v10 = vpop.permute.xlu0 %954 }
 0x131   : > { %1700 = vmatprep.subr.bf16.mxu1 %v1892_v61 }
 0x133   : > { %1650 = vmatmul.mubr.bf16.gmra.mrb[8].mxu1 %v1862_v56 }
 0x134   : > { %1653 = vmatprep.mubr.bf16.mxu1 %v1863_v57  ;;  %1701 = vmatpush3.bf16.msra.mxu1 %v1861_v55  ;;  %v965_v29 = vpop.permute.xlu0 %964 }
 0x135   : > { %1702 = vmatprep.subr.bf16.mxu1 %v1892_v61 }
 0x138   : > { %1703 = vmatpush3.bf16.msra.mxu1 %v1862_v56  ;;  %v975_v55 = vpop.permute.xlu0 %974 }
 0x139   : > { %1704 = vmatprep.subr.bf16.mxu1 %v1892_v61 }
 0x13b   : > { %1654 = vmatmul.mubr.bf16.gmra.mrb[12].mxu1 %v1864_v58 }
 0x13c   : > { %1708 = vmatprep.mubr.msk.bf16.mxu1 %vm1891_vm0, %v1892_v61  ;;  %1705 = vmatpush3.bf16.msra.mxu1 %v1863_v57 }
 0x13d   : > { %1706 = vmatprep.subr.bf16.mxu1 %v1892_v61 }
 0x140   : > { %1707 = vmatpush3.bf16.msra.mxu1 %v1864_v58 }
 0x141   : > { %1803 = vmatprep.subr.bf16.mxu1 %v1890_v60 }
 0x1f6   : > { %v1643_v4 = vpop.f32.mrb[0].mxu1 }
 0x1f7   : > { %v868_v6 = vadd.f32 %v1643_v4, %v755_v3  ;;  %v859_v8 = vpop.f32.mrb[1].mxu1  ;;  %v761_v3 = vunpack.c.l.bf16 %v2098_v32 }
 0x1f8   : > { %v860_v12 = vadd.f32 %v859_v8, %v753_v5  ;;  %v1644_v14 = vpop.f32.mrb[2].mxu1 }
 0x1f9   : > { %v1004_v16 = vmul.f32 %v935_v63, %v868_v6  ;;  %v871_v17 = vadd.f32 %v1644_v14, %v756_v9  ;;  %v862_v18 = vpop.f32.mrb[3].mxu1  ;;  %v764_v6 = vunpack.c.h.bf16 %v2102_v39 }
 0x1fa   : > { %v1002_v21 = vmul.f32 %v925_v59, %v860_v12  ;;  %v863_v22 = vadd.f32 %v862_v18, %v754_v15  ;;  %v763_v59 = vunpack.c.l.bf16 %v2102_v39  ;;  %v762_v12 = vunpack.c.h.bf16 %v2098_v32  ;;  %v985_v18 = vpop.permute.xlu0 %984 }
 0x1fb   : > { %v1027_v23 = vadd.f32 %v2142_v11, %v1004_v16  ;;  %v1005_v24 = vmul.f32 %v940_v0, %v871_v17 }
 0x1fc   : > { %v1025_v13 = vadd.f32 %v2142_v11, %v1002_v21  ;;  %v1003_v25 = vmul.f32 %v930_v62, %v863_v22  ;;  %v980_v62 = vpop.permute.xlu1 %979 }
 0x1fd   : > { %v1043_v7 = vmax.f32 %v1027_v23, 0.0  ;;  %v1028_v27 = vadd.f32 %v2142_v11, %v1005_v24 }
 0x1fe   : > { %v1041_v30 = vmax.f32 %v1025_v13, 0.0  ;;  %v1026_v31 = vadd.f32 %v2142_v11, %v1003_v25  ;;  %v1647_v33 = vpop.f32.mrb[4].mxu1 }
 0x1ff   : > { %1059 = vst [vmem:[%s2150_s20 + $0x10] sm:$0xff] %v1043_v7  ;;  %v1044_v35 = vmax.f32 %v1028_v27, 0.0  ;;  %v884_v36 = vadd.f32 %v1647_v33, %v759_v28  ;;  %v875_v37 = vpop.f32.mrb[5].mxu1  ;;  %v767_v27 = vunpack.c.l.bf16 %v2110_v51 }
 0x200   : > { %1057 = vst [vmem:[%s2150_s20] sm:$0xff] %v1041_v30  ;;  %v1042_v41 = vmax.f32 %v1026_v31, 0.0  ;;  %v876_v42 = vadd.f32 %v875_v37, %v757_v34  ;;  %v1648_v43 = vpop.f32.mrb[6].mxu1  ;;  %v990_v24 = vpop.permute.xlu1 %989  ;;  %v765_v31 = vunpack.c.l.bf16 %v2106_v45 }
 0x201   : > { %1060 = vst [vmem:[%s2150_s20 + $0x18] sm:$0xff] %v1044_v35  ;;  %v2162_v46 = vpack.c.bf16 %v1044_v35, %v1043_v7  ;;  %v1008_v47 = vmul.f32 %v955_v10, %v884_v36  ;;  %v887_v48 = vadd.f32 %v1648_v43, %v760_v38  ;;  %v878_v49 = vpop.f32.mrb[7].mxu1  ;;  %v768_v36 = vunpack.c.h.bf16 %v2110_v51  ;;  %v995_v37 = vpop.permute.xlu0 %994 }
 0x202   : > { %1058 = vst [vmem:[%s2150_s20 + $0x8] sm:$0xff] %v1042_v41  ;;  %v2165_v50 = vpack.c.bf16 %v1042_v41, %v1041_v30  ;;  %v1006_v52 = vmul.f32 %v945_v1, %v876_v42  ;;  %v879_v53 = vadd.f32 %v878_v49, %v758_v44  ;;  %v766_v42 = vunpack.c.h.bf16 %v2106_v45 }
 0x203   : > { %v1031_v26 = vadd.f32 %v2142_v11, %v1008_v47  ;;  %v1009_v54 = vmul.f32 %v960_v19, %v887_v48 }
 0x204   : > { %v1029_v56 = vadd.f32 %v2142_v11, %v1006_v52  ;;  %v1007_v57 = vmul.f32 %v950_v2, %v879_v53  ;;  %1781 = vmatpush3.bf16.xpose.msra.mxu0 %v2165_v50  ;;  %v1000_v49 = vpop.permute.xlu1 %999 }
 0x205   : > { %v1047_v20 = vmax.f32 %v1031_v26, 0.0  ;;  %v1032_v58 = vadd.f32 %v2142_v11, %v1009_v54  ;;  %1782 = vmatprep.subr.bf16.mxu0 %v1890_v60 }
 0x206   : > { %v1045_v63 = vmax.f32 %v1029_v56, 0.0  ;;  %v1030_v0 = vadd.f32 %v2142_v11, %v1007_v57  ;;  %v1651_v1 = vpop.f32.mrb[8].mxu1 }
 0x207   : > { %1063 = vst [vmem:[%s2150_s20 + $0x30] sm:$0xff] %v1047_v20  ;;  %v1048_v2 = vmax.f32 %v1032_v58, 0.0  ;;  %v900_v4 = vadd.f32 %v1651_v1, %v763_v59  ;;  %v891_v5 = vpop.f32.mrb[9].mxu1 }
 0x208   : > { %1061 = vst [vmem:[%s2150_s20 + $0x20] sm:$0xff] %v1045_v63  ;;  %v1046_v8 = vmax.f32 %v1030_v0, 0.0  ;;  %v892_v9 = vadd.f32 %v891_v5, %v761_v3  ;;  %v1652_v10 = vpop.f32.mrb[10].mxu1 }
 0x209   : > { %1064 = vst [vmem:[%s2150_s20 + $0x38] sm:$0xff] %v1048_v2  ;;  %v2180_v14 = vpack.c.bf16 %v1048_v2, %v1047_v20  ;;  %v1012_v15 = vmul.f32 %v975_v55, %v900_v4  ;;  %v903_v16 = vadd.f32 %v1652_v10, %v764_v6  ;;  %v894_v17 = vpop.f32.mrb[11].mxu1 }
 0x20a   : > { %1062 = vst [vmem:[%s2150_s20 + $0x28] sm:$0xff] %v1046_v8  ;;  %v2183_v19 = vpack.c.bf16 %v1046_v8, %v1045_v63  ;;  %v1010_v21 = vmul.f32 %v965_v29, %v892_v9  ;;  %v895_v22 = vadd.f32 %v894_v17, %v762_v12  ;;  %v1232_v9 = vlaneseq }
 0x20b   : > { %v1035_v39 = vadd.f32 %v2142_v11, %v1012_v15  ;;  %v1013_v23 = vmul.f32 %v980_v62, %v903_v16 }
 0x20c   : > { %v1033_v13 = vadd.f32 %v2142_v11, %v1010_v21  ;;  %v1011_v32 = vmul.f32 %v970_v40, %v895_v22  ;;  %1784 = vmatpush3.bf16.xpose.msra.mxu0 %v2162_v46  ;;  %v1233_v10 = vshrl.u32 %v1232_v9, 7 }
 0x20d   : > { %v1051_v25 = vmax.f32 %v1035_v39, 0.0  ;;  %v1036_v7 = vadd.f32 %v2142_v11, %v1013_v23  ;;  %1785 = vmatprep.subr.bf16.mxu0 %v1890_v60 }
 0x20e   : > { %v1049_v28 = vmax.f32 %v1033_v13, 0.0  ;;  %v1034_v29 = vadd.f32 %v2142_v11, %v1011_v32  ;;  %v1655_v30 = vpop.f32.mrb[12].mxu1  ;;  %v1234_v12 = vsub.s32 0, %v1233_v10 }
 0x20f   : > { %1067 = vst [vmem:[%s2150_s20 + $0x50] sm:$0xff] %v1051_v25  ;;  %v1052_v33 = vmax.f32 %v1036_v7, 0.0  ;;  %v916_v34 = vadd.f32 %v1655_v30, %v767_v27  ;;  %v907_v35 = vpop.f32.mrb[13].mxu1 }
 0x210   : > { %1065 = vst [vmem:[%s2150_s20 + $0x40] sm:$0xff] %v1049_v28  ;;  %v1050_v38 = vmax.f32 %v1034_v29, 0.0  ;;  %v908_v40 = vadd.f32 %v907_v35, %v765_v31  ;;  %v1656_v41 = vpop.f32.mrb[14].mxu1 }
 0x211   : > { %1068 = vst [vmem:[%s2150_s20 + $0x58] sm:$0xff] %v1052_v33  ;;  %v1795_v43 = vpack.c.bf16 %v1052_v33, %v1051_v25  ;;  %v1016_v44 = vmul.f32 %v995_v37, %v916_v34  ;;  %v919_v47 = vadd.f32 %v1656_v41, %v768_v36  ;;  %v910_v48 = vpop.f32.mrb[15].mxu1 }
 0x212   : > { %1066 = vst [vmem:[%s2150_s20 + $0x48] sm:$0xff] %v1050_v38  ;;  %v1792_v52 = vpack.c.bf16 %v1050_v38, %v1049_v28  ;;  %v1014_v53 = vmul.f32 %v985_v18, %v908_v40  ;;  %v911_v51 = vadd.f32 %v910_v48, %v766_v42 }
 0x213   : > { %v1039_v26 = vadd.f32 %v2142_v11, %v1016_v44  ;;  %v1017_v54 = vmul.f32 %v1000_v49, %v919_v47 }
 0x214   : > { %v1037_v55 = vadd.f32 %v2142_v11, %v1014_v53  ;;  %v1015_v45 = vmul.f32 %v990_v24, %v911_v51  ;;  %1787 = vmatpush3.bf16.xpose.msra.mxu0 %v2183_v19 }
 0x215   : > { %v1055_v56 = vmax.f32 %v1039_v26, 0.0  ;;  %v1040_v57 = vadd.f32 %v2142_v11, %v1017_v54  ;;  %1788 = vmatprep.subr.bf16.mxu0 %v1890_v60 }
 0x216   : > { %v1053_v20 = vmax.f32 %v1037_v55, 0.0  ;;  %v1038_v58 = vadd.f32 %v2142_v11, %v1015_v45  ;;  %v1090_v11 = vld [vmem:[%s2259_s5 + $0x1] sm:$0x1] }
 0x217   : > { %1071 = vst [vmem:[%s2150_s20 + $0x70] sm:$0xff] %v1055_v56  ;;  %v1056_v59 = vmax.f32 %v1040_v57, 0.0 }
 0x218   : > { %1069 = vst [vmem:[%s2150_s20 + $0x60] sm:$0xff] %v1053_v20  ;;  %v1054_v62 = vmax.f32 %v1038_v58, 0.0 }
 0x219   : > { %1072 = vst [vmem:[%s2150_s20 + $0x78] sm:$0xff] %v1056_v59  ;;  %v1801_v63 = vpack.c.bf16 %v1056_v59, %v1055_v56 }
 0x21a   : > { %1070 = vst [vmem:[%s2150_s20 + $0x68] sm:$0xff] %v1054_v62  ;;  %v1798_v0 = vpack.c.bf16 %v1054_v62, %v1053_v20 }
 0x21c   : > { %1790 = vmatpush3.bf16.xpose.msra.mxu0 %v2180_v14 }
 0x21d   : > { %1791 = vmatprep.subr.bf16.mxu0 %v1890_v60 }
 0x224   : > { %1793 = vmatpush3.bf16.xpose.msra.mxu0 %v1792_v52 }
 0x225   : > { %1794 = vmatprep.subr.bf16.mxu0 %v1890_v60 }
 0x22c   : > { %1796 = vmatpush3.bf16.xpose.msra.mxu0 %v1795_v43 }
 0x22d   : > { %1797 = vmatprep.subr.bf16.mxu0 %v1890_v60 }
 0x234   : > { %1799 = vmatpush3.bf16.xpose.msra.mxu0 %v1798_v0 }
 0x235   : > { %1800 = vmatprep.subr.bf16.mxu0 %v1890_v60 }
 0x23c   : > { %1802 = vmatpush3.bf16.xpose.msra.mxu0 %v1801_v63 }
 0x243   : > { %1690 = vmatmul.mubr.f32.vlgmr.msra.gmra.mrb[16].mxu0 %v1090_v11 }
 0x316   : > { %v1157_v1 = vpop.f32.mrb[16].mxu0 }
 0x317   : > { %v1162_v3 = vpack.c.bf16 %v1157_v1, %v1157_v1  ;;  %v1691_v2 = vpop.f32.mrb[17].mxu0 }
 0x319   : > { %1709 = vmatmul.mubr.bf16.vlgmr.msra.gmra.mrb[16].mxu1 %v1162_v3 }
 0x31a   : > { %1805 = vmatpush3.bf16.xpose.msra.mxu1 %v2165_v50  ;;  %1744 = vmatprep.mubr.msk.f32.mxu1 %vm1891_vm0, %v1892_v61  ;;  %v1208_v61 = vld [vmem:[%s2259_s5] sm:$0x1] }
 0x31b   : > { %1806 = vmatprep.subr.bf16.mxu1 %v1890_v60 }
 0x322   : > { %1808 = vmatpush3.bf16.xpose.msra.mxu1 %v2162_v46  ;;  %v1161_v46 = vld [vmem:[%s2221_s26] sm:$0x1] }
 0x323   : > { %1809 = vmatprep.subr.bf16.mxu1 %v1890_v60 }
 0x32a   : > { %1811 = vmatpush3.bf16.xpose.msra.mxu1 %v2183_v19 }
 0x32b   : > { %1812 = vmatprep.subr.bf16.mxu1 %v1890_v60 }
 0x332   : > { %1814 = vmatpush3.bf16.xpose.msra.mxu1 %v2180_v14  ;;  %v1230_v14 = vpop.permute.xlu0 %1229 }
 0x333   : > { %1815 = vmatprep.subr.bf16.mxu1 %v1890_v60 }
 0x33a   : > { %1817 = vmatpush3.bf16.xpose.msra.mxu1 %v1792_v52 }
 0x33b   : > { %1818 = vmatprep.subr.bf16.mxu1 %v1890_v60 }
 0x342   : > { %1820 = vmatpush3.bf16.xpose.msra.mxu1 %v1795_v43 }
 0x343   : > { %1821 = vmatprep.subr.bf16.mxu1 %v1890_v60 }
 0x34a   : > { %1823 = vmatpush3.bf16.xpose.msra.mxu1 %v1798_v0 }
 0x34b   : > { %1824 = vmatprep.subr.bf16.mxu1 %v1890_v60  ;;  %v1235_v60 = vrot.slane %v1230_v14, %v1234_v12 }
 0x352   : > { %1826 = vmatpush3.bf16.xpose.msra.mxu1 %v1801_v63 }
 0x359   : > { %1745 = vmatmul.mubr.f32.vlgmr.msra.gmra.mrb[20].mxu1 %v1208_v61 }
 0x3ec   : > { %v1197_v50 = vpop.f32.mrb[16].mxu1 }
 0x3ed   : > { %v1203_v4 = vadd.f32 %v1197_v50, %v1161_v46  ;;  %v1710_v5 = vpop.f32.mrb[17].mxu1 }
 0x3ee   : > { %v1200_v6 = vpop.f32.mrb[18].mxu1 }
 0x3ef   : > { %1204 = vst [vmem:[%s2221_s26] sm:$0x1] %v1203_v4  ;;  %v1711_v8 = vpop.f32.mrb[19].mxu1 }
 0x3f6   : > { %v1225_v18 = vld [vmem:[%s2221_s26] sm:$0x1] }
 0x42c   : > { %v1302_v15 = vpop.f32.mrb[20].mxu1 }
 0x42d   : > { %v1303_v16 = vadd.f32 %v1302_v15, %v1235_v60  ;;  %v1746_v17 = vpop.f32.mrb[21].mxu1 }
 0x42f   : > { %v1306_v19 = vadd.f32 %v1303_v16, %v1225_v18 }
 0x431   : > { %1307 = vst [vmem:[%s2221_s26] sm:$0x1] %v1306_v19 }
 0x432 PF: > { %s21_s9 = sadd.s32 1, %s1887_s9   ;;  %s2263_s29 = smov %s1883_s30 }
 0x433   : > { %p18_p5 = scmp.ge.s32.totalorder %s21_s9, 4   ;;  %s2264_s30 = smov %s2266_s6 }
 0x435   :  { %20 = sbr.rel (!%p18_p5) target bundleno = 3 (0x3), region = 107 }

// kernel: _lambda_.6
= control target key start
LH: loop header
LB: loop body
LE: loop exit
PB: predicated region body
PF: predicated region fallthrough
CT: control target
= control target key end

     0   :  { %s1540_s29 = smov 0   ;;  %s1542_s30 = smov 0   ;;  %s1740_s0 = inlined_call_operand.vmem [shape: bf16[2,64,64], index: 0, kind: input, shape index: {}]   ;;  %s1741_s1 = inlined_call_operand.vmem [shape: f32[2,64,128], index: 1, kind: input, shape index: {}]   ;;  %s1742_s2 = inlined_call_operand.vmem [shape: f32[2,64,1], index: 2, kind: input, shape index: {}]   ;;  %s1743_s3 = inlined_call_operand.vmem [shape: f32[128,128], index: 3, kind: input, shape index: {}]   ;;  %s1744_s4 = inlined_call_operand.vmem [shape: f32[1,128], index: 4, kind: input, shape index: {}]   ;;  %s1745_s5 = inlined_call_operand.vmem [shape: f32[2,128], index: 5, kind: input, shape index: {}]   ;;  %s1746_s6 = inlined_call_operand.<no memory space> [shape: f32[1,1], index: 6, kind: input, shape index: {}]   ;;  %s1747_s7 = inlined_call_operand.vmem [shape: f32[2,64,128], index: 7, kind: output, shape index: {0}]   ;;  %s1748_s8 = inlined_call_operand.vmem [shape: f32[2,1,64], index: 8, kind: output, shape index: {1}]  }
   0x1   :  { %v14_v0 = vstv %s1746_s6  ;;  %s1544_s9 = smov 0  }
   0x2   :  { %15 = vst [vmem:[#allocation4] sm:$0x1] %v14_v0 }
   0x3 LB: > { %s33_s6 = sadd.s32 1, %s1482_s30  ;;  %p1184_p0 = scmp.ge.s32.totalorder %s1486_s9, 1  ;;  %s1486_s9 = sphi %s1544_s9, %s21_s9   ;;  %s1482_s30 = sphi %s1542_s30, %s1750_s30   ;;  %s1478_s29 = sphi %s1540_s29, %s1749_s29  }
   0x4   : > { %p35_p1 = scmp.ge.s32.totalorder %s33_s6, 2  ;;  %p308_p2 = scmp.lt.s32.totalorder %s1486_s9, 3 }
   0x6   : > { %s1752_s6 = smov (%p35_p1, %s33_s6), 0  ;;  %p309_p3 = pnand %p1184_p0, %p308_p2 }
   0x7   : > { %v409_v1 = vld [vmem:[%s1743_s3] sm:$0xff] (!%p309_p3)  ;;  %v410_v2 = vld [vmem:[%s1743_s3 + $0x8] sm:$0xff] (!%p309_p3)  ;;  %v411_v3 = vld [vmem:[%s1743_s3 + $0x10] sm:$0xff] (!%p309_p3)  ;;  %p364_p4 = scmp.lt.s32.totalorder (!%p309_p3), %s1478_s29, 1  ;;  %v1488_v6 = vmov (!%p309_p3), 0   ;;  %vm654_vm0 = vcmask (!%p309_p3), 523264  }
   0x8   : > { %312 = sbr.rel (%p309_p3) target bundleno = 971 (0x3cb), region = 48  ;;  %v1374_v4 = vpack.c.bf16 (!%p309_p3), %v410_v2, %v409_v1  ;;  %v412_v5 = vld [vmem:[%s1743_s3 + $0x18] sm:$0xff] (!%p309_p3)  ;;  %1458 = vset.pattern.permute.xlu0 (!%p309_p3), %v1488_v6  ;;  %1459 = vset.pattern.permute.xlu1 (!%p309_p3), %v1488_v6  ;;  %v413_v8 = vld [vmem:[%s1743_s3 + $0x20] sm:$0xff] (!%p309_p3)  ;;  %v414_v9 = vld [vmem:[%s1743_s3 + $0x28] sm:$0xff] (!%p309_p3)  ;;  %vm1490_vm1 = vmmov (!%p309_p3), 0   ;;  %vm594_vm2 = vcmask (!%p309_p3), 516096  }
   0x9   : > { %v1378_v7 = vpack.c.bf16 (!%p309_p3), %v412_v5, %v411_v3  ;;  %v1382_v10 = vpack.c.bf16 (!%p309_p3), %v414_v9, %v413_v8  ;;  %v415_v11 = vld [vmem:[%s1743_s3 + $0x30] sm:$0xff] (!%p309_p3)  ;;  %v416_v12 = vld [vmem:[%s1743_s3 + $0x38] sm:$0xff] (!%p309_p3)  ;;  %v417_v17 = vld [vmem:[%s1743_s3 + $0x40] sm:$0xff] (!%p309_p3) }
   0xa   : > { %1375 = vmatprep.subr.bf16.mxu0 (!%p309_p3), %v1374_v4  ;;  %v1386_v15 = vpack.c.bf16 (!%p309_p3), %v416_v12, %v415_v11  ;;  %v418_v18 = vld [vmem:[%s1743_s3 + $0x48] sm:$0xff] (!%p309_p3)  ;;  %v419_v22 = vld [vmem:[%s1743_s3 + $0x50] sm:$0xff] (!%p309_p3)  ;;  %v420_v23 = vld [vmem:[%s1743_s3 + $0x58] sm:$0xff] (!%p309_p3)  ;;  %v1489_v11 = vmov (!%p309_p3), 0.0|0.0   ;;  %v1491_v12 = vmov (!%p309_p3), 0.0  }
   0xb   : > { %1377 = vmatpush3.bf16.msra.mxu0 (!%p309_p3), %v1374_v4  ;;  %v1390_v21 = vpack.c.bf16 (!%p309_p3), %v418_v18, %v417_v17  ;;  %v1394_v26 = vpack.c.bf16 (!%p309_p3), %v420_v23, %v419_v22  ;;  %v421_v27 = vld [vmem:[%s1743_s3 + $0x60] sm:$0xff] (!%p309_p3)  ;;  %v422_v28 = vld [vmem:[%s1743_s3 + $0x68] sm:$0xff] (!%p309_p3)  ;;  %v423_v32 = vld [vmem:[%s1743_s3 + $0x70] sm:$0xff] (!%p309_p3) }
   0xc   : > { %1379 = vmatprep.subr.bf16.mxu0 (!%p309_p3), %v1378_v7  ;;  %v1398_v31 = vpack.c.bf16 (!%p309_p3), %v422_v28, %v421_v27  ;;  %v424_v33 = vld [vmem:[%s1743_s3 + $0x78] sm:$0xff] (!%p309_p3)  ;;  %v956_v39 = vld [vmem:[#allocation4] sm:$0x1] (!%p309_p3) }
   0xd   : > { %v1402_v34 = vpack.c.bf16 (!%p309_p3), %v424_v33, %v423_v32  ;;  %v1201_v23 = vld [vmem:[%s1744_s4] ss:$0 sm:$0xff] (!%p309_p3) }
   0xf   : > { %s1754_s29 = smov (!%p364_p4, %s1478_s29), 1  ;;  %1381 = vmatpush3.bf16.msra.mxu0 %v1378_v7 }
  0x10   : > { %s1579_s22 = sshll.u32 %s1754_s29, 6  ;;  %1383 = vmatprep.subr.bf16.mxu0 %v1382_v10  ;;  %s395_s10 = scalar_lea.vmem %s1748_s8, %s1754_s29 }
  0x11   : > { %s1585_s25 = scalar_lea.vmem %s1741_s1, %s1579_s22  ;;  %s1591_s28 = scalar_lea.vmem %s1742_s2, %s1579_s22  ;;  %595 = vst.msk [vmem:[%s395_s10] sm:$0x1] %vm594_vm2, %v1491_v12 }
  0x12   : > { %v401_v13 = vld [vmem:[%s1585_s25] sm:$0xff]  ;;  %v532_v16 = vld [vmem:[%s1591_s28 + $0x10] sm:$0xff]  ;;  %v531_v19 = vld [vmem:[%s1591_s28 + $0x8] sm:$0xff]  ;;  %s1686_s20 = scalar_lea.vmem %s1747_s7, %s1579_s22 }
  0x13   : > { %1296 = vmatprep.mubr.f32.mxu0 %v401_v13  ;;  %v530_v14 = vld [vmem:[%s1591_s28] sm:$0xff]  ;;  %550 = vperm.xlu1 %1459, %v532_v16   ;;  %v533_v20 = vld [vmem:[%s1591_s28 + $0x18] sm:$0xff]  ;;  %v535_v25 = vld [vmem:[%s1591_s28 + $0x28] sm:$0xff] }
  0x14   : > { %540 = vperm.xlu0 %1458, %v530_v14   ;;  %1385 = vmatpush3.bf16.msra.mxu0 %v1382_v10  ;;  %v534_v24 = vld [vmem:[%s1591_s28 + $0x20] sm:$0xff]  ;;  %v536_v29 = vld [vmem:[%s1591_s28 + $0x30] sm:$0xff]  ;;  %v537_v30 = vld [vmem:[%s1591_s28 + $0x38] sm:$0xff]  ;;  %s1205_s28 = sshll.u32 %s1754_s29, 5 }
  0x15   : > { %1387 = vmatprep.subr.bf16.mxu0 %v1386_v15  ;;  %v402_v35 = vld [vmem:[%s1585_s25 + $0x8] sm:$0xff]  ;;  %v403_v36 = vld [vmem:[%s1585_s25 + $0x10] sm:$0xff]  ;;  %v404_v37 = vld [vmem:[%s1585_s25 + $0x18] sm:$0xff]  ;;  %s1643_s16 = scalar_lea.vmem %s1740_s0, %s1205_s28 }
  0x16   : > { %v405_v38 = vld [vmem:[%s1585_s25 + $0x20] sm:$0xff]  ;;  %v406_v40 = vld [vmem:[%s1585_s25 + $0x28] sm:$0xff]  ;;  %v407_v41 = vld [vmem:[%s1585_s25 + $0x30] sm:$0xff] }
  0x17   : > { %555 = vperm.xlu1 %1459, %v533_v20   ;;  %v408_v42 = vld [vmem:[%s1585_s25 + $0x38] sm:$0xff]  ;;  %v1646_v43 = vld [vmem:[%s1643_s16] sm:$0xff]   ;;  %v1658_v8 = vld [vmem:[%s1643_s16 + $0x8] sm:$0xff]  }
  0x18   : > { %545 = vperm.xlu0 %1458, %v531_v19   ;;  %1389 = vmatpush3.bf16.msra.mxu0 %v1386_v15  ;;  %v1662_v9 = vld [vmem:[%s1643_s16 + $0x10] sm:$0xff]   ;;  %v1669_v10 = vld [vmem:[%s1643_s16 + $0x18] sm:$0xff]  }
  0x19   : > { %1391 = vmatprep.subr.bf16.mxu0 %v1390_v21  ;;  %1316 = vmatprep.mubr.msk.bf16.mxu1 %vm654_vm0, %v1646_v43 }
  0x1b   : > { %565 = vperm.xlu1 %1459, %v535_v25  }
  0x1c   : > { %560 = vperm.xlu0 %1458, %v534_v24   ;;  %1393 = vmatpush3.bf16.msra.mxu0 %v1390_v21 }
  0x1d   : > { %1395 = vmatprep.subr.bf16.mxu0 %v1394_v26 }
  0x1f   : > { %575 = vperm.xlu1 %1459, %v537_v30  }
  0x20   : > { %570 = vperm.xlu0 %1458, %v536_v29   ;;  %1397 = vmatpush3.bf16.msra.mxu0 %v1394_v26 }
  0x21   : > { %1399 = vmatprep.subr.bf16.mxu0 %v1398_v31 }
  0x23   : > { %739 = vperm.xlu1 %1459, %v531_v19  }
  0x24   : > { %734 = vperm.xlu0 %1458, %v530_v14   ;;  %1401 = vmatpush3.bf16.msra.mxu0 %v1398_v31 }
  0x25   : > { %1403 = vmatprep.subr.bf16.mxu0 %v1402_v34 }
  0x27   : > { %749 = vperm.xlu1 %1459, %v533_v20  }
  0x28   : > { %744 = vperm.xlu0 %1458, %v532_v16   ;;  %1405 = vmatpush3.bf16.msra.mxu0 %v1402_v34 }
  0x29   : > { %1418 = vmatprep.subr.bf16.mxu0 %v1489_v11 }
  0x2b   : > { %759 = vperm.xlu1 %1459, %v535_v25   ;;  %1297 = vmatmul.mubr.f32.vlgmr.msra.gmra.mrb[0].mxu0 %v402_v35 }
  0x2c   : > { %754 = vperm.xlu0 %1458, %v534_v24   ;;  %1299 = vmatprep.mubr.f32.mxu0 %v403_v36 }
  0x2f   : > { %769 = vperm.xlu1 %1459, %v537_v30   ;;  %1300 = vmatmul.mubr.f32.gmra.mrb[2].mxu0 %v404_v37 }
  0x30   : > { %764 = vperm.xlu0 %1458, %v536_v29   ;;  %1302 = vmatprep.mubr.f32.mxu0 %v405_v38 }
  0x33   : > { %1303 = vmatmul.mubr.f32.gmra.mrb[4].mxu0 %v406_v40 }
  0x34   : > { %959 = vperm.xlu0 %1458, %v956_v39   ;;  %1305 = vmatprep.mubr.f32.mxu0 %v407_v41 }
  0x37   : > { %1306 = vmatmul.mubr.f32.gmra.mrb[6].mxu0 %v408_v42 }
  0x38   : > { %1371 = vmatprep.mubr.msk.f32.mxu0 %vm1490_vm1, %v1491_v12 }
  0x92   : > { %v551_v45 = vpop.permute.xlu1 %550 }
  0x93   : > { %v541_v44 = vpop.permute.xlu0 %540 }
  0x96   : > { %v556_v47 = vpop.permute.xlu1 %555 }
  0x97   : > { %v546_v46 = vpop.permute.xlu0 %545 }
  0x9a   : > { %v566_v56 = vpop.permute.xlu1 %565 }
  0x9b   : > { %v561_v58 = vpop.permute.xlu0 %560 }
  0x9e   : > { %v576_v0 = vpop.permute.xlu1 %575 }
  0x9f   : > { %v571_v3 = vpop.permute.xlu0 %570 }
  0xa2   : > { %v740_v14 = vpop.permute.xlu1 %739 }
  0xa3   : > { %v735_v13 = vpop.permute.xlu0 %734 }
  0xa6   : > { %v750_v17 = vpop.permute.xlu1 %749 }
  0xa7   : > { %v745_v15 = vpop.permute.xlu0 %744 }
  0xaa   : > { %v760_v35 = vpop.permute.xlu1 %759 }
  0xab   : > { %v755_v30 = vpop.permute.xlu0 %754 }
  0xfe   : > { %v1298_v48 = vpop.f32.mrb[0].mxu0 }
  0xff   : > { %v579_v49 = vmul.f32 %v1298_v48, %v546_v46  ;;  %v491_v50 = vpop.f32.mrb[1].mxu0 }
 0x100   : > { %v578_v51 = vmul.f32 %v541_v44, %v491_v50  ;;  %v765_v50 = vpop.permute.xlu0 %764 }
 0x102   : > { %v586_v52 = vpack.c.bf16 %v579_v49, %v578_v51  ;;  %v1301_v53 = vpop.f32.mrb[2].mxu0 }
 0x103   : > { %v581_v54 = vmul.f32 %v1301_v53, %v556_v47  ;;  %v501_v55 = vpop.f32.mrb[3].mxu0 }
 0x104   : > { %v580_v57 = vmul.f32 %v551_v45, %v501_v55  ;;  %1308 = vmatprep.subr.bf16.mxu1 %v586_v52  ;;  %v622_v19 = vunpack.c.l.bf16 %v586_v52  ;;  %v623_v26 = vunpack.c.h.bf16 %v586_v52 }
 0x105   : > { %1309 = vmatpush3.bf16.msra.mxu1 %v586_v52 }
 0x106   : > { %v587_v59 = vpack.c.bf16 %v581_v54, %v580_v57  ;;  %v1304_v60 = vpop.f32.mrb[4].mxu0 }
 0x107   : > { %v583_v61 = vmul.f32 %v1304_v60, %v566_v56  ;;  %v511_v62 = vpop.f32.mrb[5].mxu0 }
 0x108   : > { %v582_v63 = vmul.f32 %v561_v58, %v511_v62  ;;  %1310 = vmatprep.subr.bf16.mxu1 %v587_v59  ;;  %v624_v16 = vunpack.c.l.bf16 %v587_v59  ;;  %v625_v22 = vunpack.c.h.bf16 %v587_v59 }
 0x109   : > { %1311 = vmatpush3.bf16.msra.mxu1 %v587_v59  ;;  %v770_v59 = vpop.permute.xlu1 %769 }
 0x10a   : > { %v1650_v1 = vpack.c.bf16 %v583_v61, %v582_v63  ;;  %v1307_v2 = vpop.f32.mrb[6].mxu0 }
 0x10b   : > { %v585_v4 = vmul.f32 %v1307_v2, %v576_v0  ;;  %v521_v5 = vpop.f32.mrb[7].mxu0 }
 0x10c   : > { %v584_v6 = vmul.f32 %v571_v3, %v521_v5  ;;  %1312 = vmatprep.subr.bf16.mxu1 %v1650_v1  ;;  %v626_v45 = vunpack.c.l.bf16 %v1650_v1  ;;  %v627_v54 = vunpack.c.h.bf16 %v1650_v1 }
 0x10d   : > { %1313 = vmatpush3.bf16.msra.mxu1 %v1650_v1 }
 0x10e   : > { %v1654_v7 = vpack.c.bf16 %v585_v4, %v584_v6 }
 0x110   : > { %1314 = vmatprep.subr.bf16.mxu1 %v1654_v7  ;;  %v628_v40 = vunpack.c.l.bf16 %v1654_v7  ;;  %v629_v49 = vunpack.c.h.bf16 %v1654_v7 }
 0x111   : > { %1315 = vmatpush3.bf16.msra.mxu1 %v1654_v7 }
 0x112   : > { %1406 = vmatprep.subr.bf16.mxu1 %v1489_v11 }
 0x114   : > { %1317 = vmatmul.mubr.msk.bf16.vlgmr.msra.gmra.mrb[0].mxu1 %vm654_vm0, %v1658_v8 }
 0x115   : > { %1320 = vmatprep.mubr.msk.bf16.mxu1 %vm654_vm0, %v1662_v9 }
 0x11c   : > { %1321 = vmatmul.mubr.msk.bf16.gmra.mrb[4].mxu1 %vm654_vm0, %v1669_v10 }
 0x11d   : > { %1340 = vmatprep.mubr.msk.f32.mxu1 %vm1490_vm1, %v1491_v12 }
 0x1e7   : > { %v1318_v18 = vpop.f32.mrb[0].mxu1 }
 0x1e8   : > { %v710_v20 = vadd.f32 %v1318_v18, %v624_v16  ;;  %v701_v21 = vpop.f32.mrb[1].mxu1  ;;  %v820_v16 = vld [vmem:[%s1745_s5 + $0x1] sm:$0x1] }
 0x1e9   : > { %v702_v24 = vadd.f32 %v701_v21, %v622_v19  ;;  %v1319_v25 = vpop.f32.mrb[2].mxu1 }
 0x1ea   : > { %v774_v27 = vmul.f32 %v745_v15, %v710_v20  ;;  %v713_v28 = vadd.f32 %v1319_v25, %v625_v22  ;;  %v704_v29 = vpop.f32.mrb[3].mxu1  ;;  %v891_v20 = vld [vmem:[%s395_s10] sm:$0x1] }
 0x1eb   : > { %v772_v31 = vmul.f32 %v735_v13, %v702_v24  ;;  %v705_v32 = vadd.f32 %v704_v29, %v623_v26 }
 0x1ec   : > { %v789_v33 = vadd.f32 %v1201_v23, %v774_v27  ;;  %v775_v34 = vmul.f32 %v750_v17, %v713_v28  ;;  %v946_v17 = vld [vmem:[%s1745_s5] sm:$0x1]  ;;  %v960_v27 = vpop.permute.xlu0 %959 }
 0x1ed   : > { %v787_v36 = vadd.f32 %v1201_v23, %v772_v31  ;;  %v773_v37 = vmul.f32 %v740_v14, %v705_v32 }
 0x1ee   : > { %v797_v38 = vmax.f32 %v789_v33, 0.0  ;;  %v790_v39 = vadd.f32 %v1201_v23, %v775_v34 }
 0x1ef   : > { %v795_v41 = vmax.f32 %v787_v36, 0.0  ;;  %v788_v42 = vadd.f32 %v1201_v23, %v773_v37  ;;  %v1322_v44 = vpop.f32.mrb[4].mxu1 }
 0x1f0   : > { %805 = vst [vmem:[%s1686_s20 + $0x10] sm:$0xff] %v797_v38  ;;  %v798_v46 = vmax.f32 %v790_v39, 0.0  ;;  %v726_v47 = vadd.f32 %v1322_v44, %v628_v40  ;;  %v717_v48 = vpop.f32.mrb[5].mxu1 }
 0x1f1   : > { %803 = vst [vmem:[%s1686_s20] sm:$0xff] %v795_v41  ;;  %v796_v51 = vmax.f32 %v788_v42, 0.0  ;;  %v718_v52 = vadd.f32 %v717_v48, %v626_v45  ;;  %v1323_v53 = vpop.f32.mrb[6].mxu1 }
 0x1f2   : > { %806 = vst [vmem:[%s1686_s20 + $0x18] sm:$0xff] %v798_v46  ;;  %v1410_v55 = vpack.c.bf16 %v798_v46, %v797_v38  ;;  %v778_v56 = vmul.f32 %v765_v50, %v726_v47  ;;  %v729_v57 = vadd.f32 %v1323_v53, %v629_v49  ;;  %v720_v58 = vpop.f32.mrb[7].mxu1 }
 0x1f3   : > { %804 = vst [vmem:[%s1686_s20 + $0x8] sm:$0xff] %v796_v51  ;;  %v1407_v60 = vpack.c.bf16 %v796_v51, %v795_v41  ;;  %v776_v61 = vmul.f32 %v755_v30, %v718_v52  ;;  %v721_v62 = vadd.f32 %v720_v58, %v627_v54 }
 0x1f4   : > { %v793_v63 = vadd.f32 %v1201_v23, %v778_v56  ;;  %v779_v0 = vmul.f32 %v770_v59, %v729_v57 }
 0x1f5   : > { %v791_v2 = vadd.f32 %v1201_v23, %v776_v61  ;;  %v777_v3 = vmul.f32 %v760_v35, %v721_v62  ;;  %1408 = vmatpush3.bf16.xpose.msra.mxu1 %v1407_v60  ;;  %1420 = vmatpush3.bf16.xpose.msra.mxu0 %v1407_v60 }
 0x1f6   : > { %v801_v1 = vmax.f32 %v793_v63, 0.0  ;;  %v794_v4 = vadd.f32 %v1201_v23, %v779_v0  ;;  %1409 = vmatprep.subr.bf16.mxu1 %v1489_v11  ;;  %1421 = vmatprep.subr.bf16.mxu0 %v1489_v11 }
 0x1f7   : > { %v799_v5 = vmax.f32 %v791_v2, 0.0  ;;  %v792_v6 = vadd.f32 %v1201_v23, %v777_v3 }
 0x1f8   : > { %809 = vst [vmem:[%s1686_s20 + $0x30] sm:$0xff] %v801_v1  ;;  %v802_v7 = vmax.f32 %v794_v4, 0.0 }
 0x1f9   : > { %807 = vst [vmem:[%s1686_s20 + $0x20] sm:$0xff] %v799_v5  ;;  %v800_v13 = vmax.f32 %v792_v6, 0.0 }
 0x1fa   : > { %810 = vst [vmem:[%s1686_s20 + $0x38] sm:$0xff] %v802_v7  ;;  %v1416_v14 = vpack.c.bf16 %v802_v7, %v801_v1 }
 0x1fb   : > { %808 = vst [vmem:[%s1686_s20 + $0x28] sm:$0xff] %v800_v13  ;;  %v1413_v15 = vpack.c.bf16 %v800_v13, %v799_v5 }
 0x1fd   : > { %1411 = vmatpush3.bf16.xpose.msra.mxu1 %v1410_v55  ;;  %1423 = vmatpush3.bf16.xpose.msra.mxu0 %v1410_v55 }
 0x1fe   : > { %1412 = vmatprep.subr.bf16.mxu1 %v1489_v11  ;;  %1424 = vmatprep.subr.bf16.mxu0 %v1489_v11 }
 0x205   : > { %1414 = vmatpush3.bf16.xpose.msra.mxu1 %v1413_v15  ;;  %1426 = vmatpush3.bf16.xpose.msra.mxu0 %v1413_v15 }
 0x206   : > { %1415 = vmatprep.subr.bf16.mxu1 %v1489_v11  ;;  %1427 = vmatprep.subr.bf16.mxu0 %v1489_v11 }
 0x20d   : > { %1417 = vmatpush3.bf16.xpose.msra.mxu1 %v1416_v14  ;;  %1429 = vmatpush3.bf16.xpose.msra.mxu0 %v1416_v14 }
 0x20e   : > { %1343 = vmatprep.subr.bf16.mxu1 %v1491_v12 }
 0x214   : > { %1341 = vmatmul.mubr.f32.vlgmr.msra.gmra.mrb[8].mxu1 %v820_v16  ;;  %1372 = vmatmul.mubr.f32.vlgmr.msra.gmra.mrb[8].mxu0 %v946_v17 }
 0x215   : > { %1344 = vmatpush3.bf16.msra.mxu1 %v1646_v43  ;;  %1351 = vmatprep.mubr.msk.bf16.mxu1 %vm1490_vm1, %v1491_v12 }
 0x216   : > { %1345 = vmatprep.subr.bf16.mxu1 %v1491_v12 }
 0x219   : > { %1346 = vmatpush3.bf16.msra.mxu1 %v1658_v8 }
 0x21a   : > { %1347 = vmatprep.subr.bf16.mxu1 %v1491_v12 }
 0x21d   : > { %1348 = vmatpush3.bf16.msra.mxu1 %v1662_v9  ;;  %v962_v9 = vlaneseq }
 0x21e   : > { %1349 = vmatprep.subr.bf16.mxu1 %v1491_v12 }
 0x21f   : > { %v963_v21 = vshrl.u32 %v962_v9, 7 }
 0x221   : > { %1350 = vmatpush3.bf16.msra.mxu1 %v1669_v10  ;;  %v964_v25 = vsub.s32 0, %v963_v21 }
 0x223   : > { %v965_v12 = vrot.slane %v960_v27, %v964_v25 }
 0x2e7   : > { %v887_v43 = vpop.f32.mrb[8].mxu1  ;;  %v1032_v11 = vpop.f32.mrb[8].mxu0 }
 0x2e8   : > { %v892_v18 = vpack.c.bf16 %v887_v43, %v887_v43  ;;  %v1342_v8 = vpop.f32.mrb[9].mxu1  ;;  %v1373_v19 = vpop.f32.mrb[9].mxu0  ;;  %v1033_v28 = vadd.f32 %v1032_v11, %v965_v12 }
 0x2ea   : > { %1352 = vmatmul.mubr.msk.bf16.vlgmr.msra.gmra.mrb[12].mxu1 %vm654_vm0, %v892_v18 }
 0x3bd   : > { %v934_v22 = vpop.f32.mrb[12].mxu1 }
 0x3be   : > { %v940_v10 = vadd.f32 %v934_v22, %v891_v20  ;;  %v1353_v23 = vpop.f32.mrb[13].mxu1 }
 0x3bf   : > { %v937_v24 = vpop.f32.mrb[14].mxu1 }
 0x3c0   : > { %942 = vst.msk [vmem:[%s395_s10] sm:$0x1] %vm594_vm2, %v940_v10  ;;  %v1354_v26 = vpop.f32.mrb[15].mxu1 }
 0x3c7   : > { %v955_v29 = vld [vmem:[%s395_s10] sm:$0x1] }
 0x3c8   : > { %v1036_v30 = vadd.f32 %v1033_v28, %v955_v29 }
 0x3ca   : > { %1037 = vst.msk [vmem:[%s395_s10] sm:$0x1] %vm594_vm2, %v1036_v30 }
 0x3cb PF: > { %s21_s9 = sadd.s32 1, %s1486_s9   ;;  %s1749_s29 = smov %s1482_s30 }
 0x3cc   : > { %p18_p5 = scmp.ge.s32.totalorder %s21_s9, 4   ;;  %s1750_s30 = smov %s1752_s6 }
 0x3ce   :  { %20 = sbr.rel (!%p18_p5) target bundleno = 3 (0x3), region = 107 }

// kernel: _lambda_.7
= control target key start
LH: loop header
LB: loop body
LE: loop exit
PB: predicated region body
PF: predicated region fallthrough
CT: control target
= control target key end

     0   :  { %s1017_s0 = inlined_call_operand.vmem [shape: f32[2,32,128], index: 0, kind: input, shape index: {}]   ;;  %s1018_s1 = inlined_call_operand.vmem [shape: f32[32,64], index: 1, kind: input, shape index: {}]   ;;  %s1019_s2 = inlined_call_operand.vmem [shape: f32[32,64], index: 2, kind: input, shape index: {}]   ;;  %s1020_s3 = inlined_call_operand.<no memory space> [shape: f32[1,1], index: 3, kind: input, shape index: {}]   ;;  %s1021_s4 = inlined_call_operand.vmem [shape: f32[64,32], index: 4, kind: input, shape index: {}]   ;;  %s1022_s5 = inlined_call_operand.vmem [shape: f32[1,32], index: 5, kind: input, shape index: {}]   ;;  %s1023_s6 = inlined_call_operand.vmem [shape: f32[32,16], index: 6, kind: input, shape index: {}]   ;;  %s1024_s7 = inlined_call_operand.vmem [shape: f32[1,16], index: 7, kind: input, shape index: {}]   ;;  %s1025_s8 = inlined_call_operand.vmem [shape: f32[16,12], index: 8, kind: input, shape index: {}]   ;;  %s1026_s9 = inlined_call_operand.vmem [shape: f32[1,12], index: 9, kind: input, shape index: {}]   ;;  %s1027_s10 = inlined_call_operand.hbm [shape: f32[2,12], index: 10, kind: output, shape index: {}]  }
   0x1   :  { %v15_v0 = vstv %s1020_s3 }
   0x2   :  { %16 = vst [vmem:[#allocation2] sm:$0x1] %v15_v0 }
   0x3   :  { %v42_v1 = vld [vmem:[%s1017_s0 + $0x20] sm:$0xff]  ;;  %v43_v3 = vld [vmem:[%s1017_s0 + $0x28] sm:$0xff] }
   0x4   :  { %v38_v2 = vld [vmem:[%s1017_s0] sm:$0xff]  ;;  %70 = vadd.xlane.f32.xlu1 %v42_v1  ;;  %v39_v4 = vld [vmem:[%s1017_s0 + $0x8] sm:$0xff] }
   0x5   :  { %62 = vadd.xlane.f32.xlu0 %v38_v2 }
   0x6   :  { %17 = vsyncpa [#allocation4], 0  ;;  %v44_v5 = vld [vmem:[%s1017_s0 + $0x30] sm:$0xff]  ;;  %v45_v7 = vld [vmem:[%s1017_s0 + $0x38] sm:$0xff]  ;;  %v802_v12 = vmov 0.0|0.0   ;;  %vm803_vm0 = vmmov 0   ;;  %v103_v29 = vlaneseq }
   0x7   :  { %v40_v6 = vld [vmem:[%s1017_s0 + $0x10] sm:$0xff]  ;;  %v41_v8 = vld [vmem:[%s1017_s0 + $0x18] sm:$0xff]  ;;  %v87_v9 = vld [vmem:[%s1018_s1] sm:$0xff]  ;;  %741 = vmatprep.subr.bf16.mxu1 %v802_v12  ;;  %735 = vmatprep.subr.bf16.mxu0 %v802_v12  ;;  %v804_v19 = vmov 0.0   ;;  %v805_v23 = vmov 0   ;;  %vm114_vm1 = vcmask 130112  }
   0x8   :  { %72 = vadd.xlane.f32.xlu1 %v43_v3  ;;  %v88_v10 = vld [vmem:[%s1018_s1 + $0x8] sm:$0xff]  ;;  %v89_v13 = vld [vmem:[%s1018_s1 + $0x10] sm:$0xff]  ;;  %v90_v14 = vld [vmem:[%s1018_s1 + $0x18] sm:$0xff]  ;;  %695 = vmatprep.mubr.msk.f32.mxu1 %vm803_vm0, %v804_v19  ;;  %v104_v32 = vand.u32 127, %v103_v29  ;;  %v106_v37 = vshrl.u32 %v103_v29, 7  ;;  %vm121_vm2 = vcmask 195712  }
   0x9   :  { %64 = vadd.xlane.f32.xlu0 %v39_v4  ;;  %v742_v11 = vpack.c.bf16 %v88_v10, %v87_v9  ;;  %v745_v15 = vpack.c.bf16 %v90_v14, %v89_v13  ;;  %v91_v16 = vld [vmem:[%s1019_s2] sm:$0xff]  ;;  %v92_v17 = vld [vmem:[%s1019_s2 + $0x8] sm:$0xff]  ;;  %v93_v20 = vld [vmem:[%s1019_s2 + $0x10] sm:$0xff]  ;;  %684 = vmatprep.mubr.msk.f32.mxu0 %vm803_vm0, %v804_v19  ;;  %vm128_vm3 = vcmask 261312   ;;  %vm149_vm4 = vcmask 1041409  }
   0xa   :  { %v736_v18 = vpack.c.bf16 %v92_v17, %v91_v16  ;;  %v94_v21 = vld [vmem:[%s1019_s2 + $0x18] sm:$0xff]  ;;  %773 = vset.pattern.permute.xlu0 %v805_v23  ;;  %v642_v24 = vld [vmem:[#allocation2] ss:$0 sm:$0xff]  ;;  %v109_v33 = vadd.s32 4294967288, %v104_v32  ;;  %v116_v34 = vadd.s32 4294967280, %v104_v32  ;;  %v123_v41 = vadd.s32 4294967272, %v104_v32 }
   0xb   :  { %743 = vmatpush3.bf16.msra.mxu1 %v742_v11  ;;  %v739_v22 = vpack.c.bf16 %v94_v21, %v93_v20  ;;  %v107_v47 = vsub.s32 %v104_v32, %v106_v37  ;;  %vm151_vm5 = vcmask 261120   ;;  %v355_v16 = vld [vmem:[%s1021_s4 + $0x8] sm:$0xff]  ;;  %vm369_vm6 = vcmask 523264  }
   0xc   :  { %74 = vadd.xlane.f32.xlu1 %v44_v5  ;;  %744 = vmatprep.subr.bf16.mxu1 %v802_v12  ;;  %v112_v38 = vsub.s32 %v109_v33, %v106_v37  ;;  %v119_v42 = vsub.s32 %v116_v34, %v106_v37  ;;  %v126_v52 = vsub.s32 %v123_v41, %v106_v37  ;;  %v358_v33 = vld [vmem:[%s1021_s4 + $0x20] sm:$0xff]  ;;  %v359_v34 = vld [vmem:[%s1021_s4 + $0x28] sm:$0xff]  ;;  %v361_v37 = vld [vmem:[%s1021_s4 + $0x38] sm:$0xff]  ;;  %vm538_vm7 = vcmask 130048  }
   0xd   :  { %66 = vadd.xlane.f32.xlu0 %v40_v6  ;;  %737 = vmatpush3.bf16.msra.mxu0 %v736_v18  ;;  %vm612_vm8 = vcmask 91136  }
   0xe   :  { %738 = vmatprep.subr.bf16.mxu0 %v802_v12 }
   0xf   :  { %746 = vmatpush3.bf16.msra.mxu1 %v745_v15  ;;  %v354_v15 = vld [vmem:[%s1021_s4] sm:$0xff] }
  0x10   :  { %48 = vmax.xlane.f32.xlu1 %v39_v4  ;;  %759 = vmatprep.subr.bf16.mxu1 %v802_v12 }
  0x11   :  { %46 = vmax.xlane.f32.xlu0 %v38_v2  ;;  %740 = vmatpush3.bf16.msra.mxu0 %v739_v22 }
  0x12   :  { %747 = vmatprep.subr.bf16.mxu0 %v802_v12 }
  0x14   :  { %56 = vmax.xlane.f32.xlu1 %v43_v3 }
  0x15   :  { %54 = vmax.xlane.f32.xlu0 %v42_v1 }
  0x18   :  { %76 = vadd.xlane.f32.xlu1 %v45_v7 }
  0x19   :  { %68 = vadd.xlane.f32.xlu0 %v41_v8 }
  0x1c   :  { %58 = vmax.xlane.f32.xlu1 %v44_v5 }
  0x1d   :  { %50 = vmax.xlane.f32.xlu0 %v40_v6 }
  0x20   :  { %60 = vmax.xlane.f32.xlu1 %v45_v7 }
  0x21   :  { %52 = vmax.xlane.f32.xlu0 %v41_v8 }
  0x37   :  { %350 = vperm.xlu0 %773, %v642_v24  }
  0x91   :  { %v71_v25 = vpop.xlane.xlu1 %70 }
  0x92   :  { %v63_v26 = vpop.xlane.xlu0 %62  ;;  %v83_v48 = vmul.f32 0.0078125, %v71_v25 }
  0x93   :  { %v79_v49 = vmul.f32 0.0078125, %v63_v26  ;;  %v748_v26 = vpack.c.bf16 %v355_v16, %v354_v15 }
  0x94   :  { %v254_v57 = vrot.slane %v83_v48, %v107_v47 }
  0x95   :  { %v73_v27 = vpop.xlane.xlu1 %72  ;;  %v235_v58 = vrot.slane %v79_v49, %v107_v47  ;;  %v446_v49 = vld [vmem:[%s1023_s6 + $0x10] sm:$0xff] }
  0x96   :  { %v65_v28 = vpop.xlane.xlu0 %64  ;;  %v84_v39 = vmul.f32 0.0078125, %v73_v27 }
  0x97   :  { %v80_v40 = vmul.f32 0.0078125, %v65_v28 }
  0x98   :  { %v258_v50 = vrot.slane %v84_v39, %v112_v38  ;;  %v444_v39 = vld [vmem:[%s1023_s6] sm:$0xff] }
  0x99   :  { %v75_v30 = vpop.xlane.xlu1 %74  ;;  %v239_v51 = vrot.slane %v80_v40, %v112_v38  ;;  %v445_v40 = vld [vmem:[%s1023_s6 + $0x8] sm:$0xff] }
  0x9a   :  { %v67_v31 = vpop.xlane.xlu0 %66  ;;  %v85_v43 = vmul.f32 0.0078125, %v75_v30  ;;  %v259_v61 = vsel %vm114_vm1, %v258_v50, %v254_v57  ;;  %v356_v30 = vld [vmem:[%s1021_s4 + $0x10] sm:$0xff]  ;;  %v760_v41 = vpack.c.bf16 %v445_v40, %v444_v39  ;;  %v447_v50 = vld [vmem:[%s1023_s6 + $0x18] sm:$0xff]  ;;  %v529_v57 = vld [vmem:[%s1025_s8] sm:$0xff] }
  0x9b   :  { %v81_v44 = vmul.f32 0.0078125, %v67_v31  ;;  %v240_v62 = vsel %vm114_vm1, %v239_v51, %v235_v58  ;;  %v357_v31 = vld [vmem:[%s1021_s4 + $0x18] sm:$0xff]  ;;  %v763_v51 = vpack.c.bf16 %v447_v50, %v446_v49 }
  0x9c   :  { %v263_v53 = vrot.slane %v85_v43, %v119_v42  ;;  %v751_v32 = vpack.c.bf16 %v357_v31, %v356_v30 }
  0x9d   :  { %v49_v35 = vpop.xlane.xlu1 %48  ;;  %v244_v54 = vrot.slane %v81_v44, %v119_v42 }
  0x9e   :  { %v47_v36 = vpop.xlane.xlu0 %46  ;;  %v264_v1 = vsel %vm121_vm2, %v263_v53, %v259_v61  ;;  %v113_v3 = vrot.slane %v49_v35, %v112_v38  ;;  %v754_v35 = vpack.c.bf16 %v359_v34, %v358_v33 }
  0x9f   :  { %v245_v2 = vsel %vm121_vm2, %v244_v54, %v240_v62  ;;  %v108_v4 = vrot.slane %v47_v36, %v107_v47  ;;  %v360_v36 = vld [vmem:[%s1021_s4 + $0x30] sm:$0xff] }
  0xa1   :  { %v57_v45 = vpop.xlane.xlu1 %56  ;;  %v115_v20 = vsel %vm114_vm1, %v113_v3, %v108_v4 }
  0xa2   :  { %v55_v46 = vpop.xlane.xlu0 %54  ;;  %v137_v7 = vrot.slane %v57_v45, %v112_v38  ;;  %v757_v38 = vpack.c.bf16 %v361_v37, %v360_v36 }
  0xa3   :  { %v133_v8 = vrot.slane %v55_v46, %v107_v47 }
  0xa5   :  { %v77_v55 = vpop.xlane.xlu1 %76  ;;  %v138_v21 = vsel %vm114_vm1, %v137_v7, %v133_v8 }
  0xa6   :  { %v69_v56 = vpop.xlane.xlu0 %68  ;;  %v86_v59 = vmul.f32 0.0078125, %v77_v55 }
  0xa7   :  { %v82_v60 = vmul.f32 0.0078125, %v69_v56 }
  0xa8   :  { %v268_v63 = vrot.slane %v86_v59, %v126_v52  ;;  %v645_v59 = vld [vmem:[%s1024_s7] ss:$0 sm:$0xff]  ;;  %s806_s7 = smov [#allocation3]  }
  0xa9   :  { %v249_v0 = vrot.slane %v82_v60, %v126_v52  ;;  %v59_v5 = vpop.xlane.xlu1 %58 }
  0xaa   :  { %v51_v6 = vpop.xlane.xlu0 %50  ;;  %v269_v10 = vsel %vm128_vm3, %v268_v63, %v264_v1  ;;  %v142_v11 = vrot.slane %v59_v5, %v119_v42 }
  0xab   :  { %v250_v9 = vsel %vm128_vm3, %v249_v0, %v245_v2  ;;  %v120_v13 = vrot.slane %v51_v6, %v119_v42 }
  0xac   :  { %v270_v14 = vsel %vm149_vm4, %v269_v10, %v250_v9  ;;  %v143_v24 = vsel %vm121_vm2, %v142_v11, %v138_v21 }
  0xad   :  { %696 = vmatmul.mubr.msk.f32.vlgmr.msra.gmra.mrb[0].mxu1 %vm151_vm5, %v270_v14  ;;  %v61_v17 = vpop.xlane.xlu1 %60  ;;  %v122_v25 = vsel %vm121_vm2, %v120_v13, %v115_v20 }
  0xae   :  { %v53_v18 = vpop.xlane.xlu0 %52  ;;  %725 = vmatprep.mubr.msk.f32.mxu1 %vm803_vm0, %v804_v19  ;;  %v147_v22 = vrot.slane %v61_v17, %v126_v52  ;;  %761 = vmatpush3.bf16.msra.mxu1 %v760_v41 }
  0xaf   :  { %v127_v23 = vrot.slane %v53_v18, %v126_v52  ;;  %762 = vmatprep.subr.bf16.mxu1 %v802_v12  ;;  %v643_v52 = vld [vmem:[%s1022_s5] ss:$0 sm:$0xff] }
  0xb0   :  { %v148_v27 = vsel %vm128_vm3, %v147_v22, %v143_v24 }
  0xb1   :  { %v129_v28 = vsel %vm128_vm3, %v127_v23, %v122_v25 }
  0xb2   :  { %v150_v29 = vsel %vm149_vm4, %v148_v27, %v129_v28  ;;  %764 = vmatpush3.bf16.msra.mxu1 %v763_v51 }
  0xb3   :  { %685 = vmatmul.mubr.msk.f32.vlgmr.msra.gmra.mrb[0].mxu0 %vm151_vm5, %v150_v29  ;;  %765 = vmatprep.subr.bf16.mxu1 %v802_v12 }
  0xb4   :  { %749 = vmatpush3.bf16.msra.mxu0 %v748_v26  ;;  %714 = vmatprep.mubr.msk.f32.mxu0 %vm803_vm0, %v804_v19 }
  0xb5   :  { %750 = vmatprep.subr.bf16.mxu0 %v802_v12 }
  0xb6   :  { %v351_v45 = vpop.permute.xlu0 %350 }
  0xb8   :  { %752 = vmatpush3.bf16.msra.mxu0 %v751_v32 }
  0xb9   :  { %753 = vmatprep.subr.bf16.mxu0 %v802_v12 }
  0xbc   :  { %755 = vmatpush3.bf16.msra.mxu0 %v754_v35 }
  0xbd   :  { %756 = vmatprep.subr.bf16.mxu0 %v802_v12  ;;  %v530_v12 = vld [vmem:[%s1025_s8 + $0x8] sm:$0xff]  ;;  %s632_s8 = sshll.u32 %s806_s7, 4  ;;  %s633_s8 = int_to_ptr.vmem [resolvable:$true] %s632_s8 }
  0xbe   :  { %v766_v58 = vpack.c.bf16 %v530_v12, %v529_v57  ;;  %p783_p1 = scmp.lt.s32.totalorder %s633_s8, %s633_s8 }
  0xc0   :  { %758 = vmatpush3.bf16.msra.mxu0 %v757_v38 }
 0x180   :  { %v339_v42 = vpop.f32.mrb[0].mxu1 }
 0x181   :  { %v697_v43 = vpop.f32.mrb[1].mxu1 }
 0x186   :  { %v220_v44 = vpop.f32.mrb[0].mxu0 }
 0x187   :  { %v340_v46 = vadd.f32 %v339_v42, %v220_v44  ;;  %v686_v47 = vpop.f32.mrb[1].mxu0 }
 0x189   :  { %v353_v48 = vadd.f32 %v351_v45, %v340_v46 }
 0x18b   :  { %715 = vmatmul.mubr.msk.f32.vlgmr.msra.gmra.mrb[2].mxu0 %vm369_vm6, %v353_v48 }
 0x25e   :  { %v439_v53 = vpop.f32.mrb[2].mxu0 }
 0x25f   :  { %v440_v54 = vadd.f32 %v643_v52, %v439_v53  ;;  %v716_v55 = vpop.f32.mrb[3].mxu0 }
 0x261   :  { %v443_v56 = vmax.f32 %v440_v54, 0.0 }
 0x263   :  { %726 = vmatmul.mubr.msk.f32.vlgmr.msra.gmra.mrb[2].mxu1 %vm151_vm5, %v443_v56 }
 0x264   :  { %732 = vmatprep.mubr.msk.f32.mxu1 %vm803_vm0, %v804_v19  ;;  %767 = vmatpush3.bf16.msra.mxu1 %v766_v58  ;;  %v647_v19 = vld [vmem:[%s1026_s9] ss:$0 sm:$0xff]  ;;  %s778_s9 = scalar_lea.vmem %s633_s8, 32 }
 0x265   :  { %p779_p0 = scmp.ne.s32.totalorder %s633_s8, %s778_s9  ;;  %p784_p2 = scmp.lt.s32.totalorder %s778_s9, %s778_s9 }
 0x267   :  { %p785_p3 = por %p784_p2, %p783_p1 }
 0x269   :  { %p786_p4 = pnand %p785_p3, %p779_p0 }
 0x336   :  { %v524_v60 = vpop.f32.mrb[2].mxu1 }
 0x337   :  { %v525_v61 = vadd.f32 %v645_v59, %v524_v60  ;;  %v727_v62 = vpop.f32.mrb[3].mxu1 }
 0x339   :  { %v528_v63 = vmax.f32 %v525_v61, 0.0 }
 0x33b   :  { %733 = vmatmul.mubr.msk.f32.vlgmr.msra.gmra.mrb[4].mxu1 %vm538_vm7, %v528_v63 }
 0x40e   :  { %v608_v0 = vpop.f32.mrb[4].mxu1 }
 0x40f   :  { %v609_v1 = vadd.f32 %v647_v19, %v608_v0  ;;  %v734_v2 = vpop.f32.mrb[5].mxu1 }
 0x411   :  { %v613_v3 = vsel %vm612_vm8, %v609_v1, -inf }
 0x412   :  { %614 = vmax.xlane.f32.xlu1 %v613_v3 }
 0x49f   :  { %v615_v4 = vpop.xlane.xlu1 %614 }
 0x4a0   :  { %v616_v5 = vsub.f32 %v609_v1, %v615_v4 }
 0x4a2   :  { %v617_v6 = vmul.f32 1.442695, %v616_v5 }
 0x4a4   :  { %774 = vpow2.f32 %v617_v6 }
 0x4ae   :  { %v775_v7 = vpop.eup %774 }
 0x4af   :  { %v619_v8 = vsel %vm612_vm8, %v775_v7, 0.0 }
 0x4b0   :  { %620 = vadd.xlane.f32.xlu1 %v619_v8 }
 0x53d   :  { %v621_v9 = vpop.xlane.xlu1 %620 }
 0x53e   :  { %776 = vlog2.f32 %v621_v9 }
 0x548   :  { %v777_v10 = vpop.eup %776 }
 0x549   :  { %v623_v11 = vmul.f32 0.6931472, %v777_v10 }
 0x54b   :  { %v624_v13 = vsub.f32 %v616_v5, %v623_v11 }
 0x54d   :  { %625 = vst.msk [vmem:[#allocation3] sm:$0x3] %vm612_vm8, %v624_v13 }
 0x54e   :  { %789 = shalt.err (!%p786_p4)
}
 0x54f   :  { %s790_s11 = scalar_lea.hbm %s1027_s10, 32 }
 0x550   :  { %p791_p5 = scmp.ne.s32.totalorder %s1027_s10, %s790_s11  ;;  %p794_p6 = scmp.lt.u32.totalorder %s790_s11, %s1027_s10 }
 0x552   :  { %p796_p7 = pnand %p794_p6, %p791_p5 }
 0x554   :  { %799 = shalt.err (!%p796_p7)
}
 0x555   :  { %635 = dma.vmem_to_hbm [thread:$0]  %s633_s8, 32, %s1027_s10, [#allocation4]  }
 0x556   :  { %800 = dma.done.wait [#allocation4], 32  }
 0x557   :  { %801 = vsyncadd [#allocation4], 4294967264 }
 0x558   :  { %639 = vsyncpa [#allocation4], 1 }

</bundles_post_ra>
